<compile_context>
chip_gen: v7x
topology: tpu7x:2x2x1
jax: 0.10.0
libtpu: 0.0.40
codegen_flags: <defaults>
</compile_context>

<pallas_src>
import functools

import jax
import jax.numpy as jnp
from jax.experimental import pallas as pl
from jax.experimental.pallas import tpu as pltpu


def _encoder_layer_kernel(x_ref, mask_ref,
                          wq_ref, bq_ref, wkv_ref, bkv_ref, wo_ref, bo_ref,
                          w1_ref, b1_ref, w2_ref, b2_ref,
                          g1_ref, be1_ref, g2_ref, be2_ref,
                          out_ref, kv_ref,
                          *, n_head, encoder_prenorm, alpha, compute_dtype):
    S = x_ref.shape[1]                 # full key/value sequence length
    D = x_ref.shape[2]
    TQ = out_ref.shape[1]              # query rows handled by this grid step
    hd = D // n_head
    scale = 1.0 / float(hd) ** 0.5
    approx_recip = jnp.dtype(compute_dtype).itemsize < 4
    qi = pl.program_id(1)

    def mm(a, b):                      # a @ b, f32 accumulate on MXU
        return jnp.dot(a.astype(compute_dtype), b.astype(compute_dtype),
                       preferred_element_type=jnp.float32)

    def mm_nt(a, b):                   # a @ b.T without explicit transpose
        return jax.lax.dot_general(
            a.astype(compute_dtype), b.astype(compute_dtype),
            (((1,), (1,)), ((), ())), preferred_element_type=jnp.float32)

    def layernorm(h, g, b):
        mu = jnp.mean(h, axis=-1, keepdims=True)
        var = jnp.mean((h - mu) ** 2, axis=-1, keepdims=True)
        return (h - mu) * jax.lax.rsqrt(var + 1e-5) * g + b

    # --- K/V projection cache: computed once per batch element (at its first
    # query tile) and reused by all subsequent tiles.  Requires the q grid
    # axis to be "arbitrary" (sequential per core), which it is.
    @pl.when(qi == 0)
    def _():
        x_full = x_ref[0].astype(jnp.float32)                      # (S, D)
        h_kv = (layernorm(x_full, g1_ref[...], be1_ref[...])
                if encoder_prenorm else x_full)
        kv = mm(h_kv, wkv_ref[...]) + bkv_ref[...]                 # (S, 2D) f32
        kv_ref[...] = kv.astype(kv_ref.dtype)

    # Query / residual tile sliced from the single full-sequence block
    # (no duplicated HBM read of x).
    q_start = pl.multiple_of(qi * TQ, TQ)
    x_tile = x_ref[0, pl.ds(q_start, TQ), :].astype(jnp.float32)   # (TQ, D)
    mask_row = mask_ref[0] > 0                                     # (1, S)

    kv = kv_ref[...]                   # (S, 2D) in compute_dtype
    k = kv[:, :D]
    v = kv[:, D:]

    def attention(h_q):
        # Scale folded into q.  Masked logits are exactly -1e9 (reference uses
        # -1e9/sqrt(hd)); identical after softmax since the fill dominates.
        q = (mm(h_q, wq_ref[...]) + bq_ref[...]) * scale           # (TQ, D)
        heads = []
        # NOTE: for very long S this should become flash-style KV chunking
        # (online softmax) to bound the (TQ,S) scores on v7x's 64 MiB VMEM.
        for hh in range(n_head):       # small & static -> unrolled
            sl = slice(hh * hd, (hh + 1) * hd)
            s = mm_nt(q[:, sl], k[:, sl])                          # (TQ, S)
            s = jnp.where(mask_row, -1.0e9, s)
            p = jnp.exp(s - jnp.max(s, axis=-1, keepdims=True))
            inv = pl.reciprocal(jnp.sum(p, axis=-1, keepdims=True),
                                approx=approx_recip)
            # Deferred normalization: (TQ, hd) multiply instead of (TQ, S).
            heads.append(mm(p, v[:, sl]) * inv)
        o = jnp.concatenate(heads, axis=-1)                        # (TQ, D)
        return mm(o, wo_ref[...]) + bo_ref[...]     # one full-K output proj

    def ffn(h):
        hmid = jnp.maximum(mm(h, w1_ref[...]) + b1_ref[...], 0.0)
        return mm(hmid, w2_ref[...]) + b2_ref[...]

    # TODO(synk): nn.Dropout(p_drop) is identity at inference; no RNG dropout.
    if encoder_prenorm:
        y = x_tile + attention(layernorm(x_tile, g1_ref[...], be1_ref[...]))
        y = y + ffn(layernorm(y, g2_ref[...], be2_ref[...]))
    else:
        y = layernorm(x_tile * alpha + attention(x_tile),
                      g1_ref[...], be1_ref[...])
        y = layernorm(y * alpha + ffn(y), g2_ref[...], be2_ref[...])

    out_ref[0] = y.astype(out_ref.dtype)


def encoder_layer(x, src_mask, params, *, n_head, encoder_prenorm=True,
                  alpha=1.0, q_block=None, compute_dtype=None,
                  vmem_limit_bytes=None):
    B, S, D = x.shape
    d_ff = params["w1"].shape[1]
    assert D % n_head == 0
    if compute_dtype is None:
        compute_dtype = x.dtype
    if q_block is None:
        # Keep the whole sequence as one tile unless it is long; 256 keeps the
        # (TQ,S) scores and per-tile activations bounded (v7x 64 MiB VMEM) and
        # is a multiple of the 128-wide v5e MXU.
        q_block = 256 if (S > 256 and S % 256 == 0) else S
    assert S % q_block == 0 and (q_block == S or q_block % 8 == 0)
    n_q = S // q_block

    f32 = jnp.float32
    # Pack K|V weights/biases; cast matmul weights to the compute dtype once.
    wkv = jnp.concatenate([params["wk"], params["wv"]], axis=1)
    bkv = jnp.concatenate([params["bk"], params["bv"]], axis=1)
    param_list = [
        params["wq"].astype(compute_dtype), params["bq"].astype(f32),
        wkv.astype(compute_dtype), bkv.astype(f32),
        params["wo"].astype(compute_dtype), params["bo"].astype(f32),
        params["w1"].astype(compute_dtype), params["b1"].astype(f32),
        params["w2"].astype(compute_dtype), params["b2"].astype(f32),
        params["g1"].astype(f32), params["be1"].astype(f32),
        params["g2"].astype(f32), params["be2"].astype(f32),
    ]
    # (B, 1, S) so the mask block's last two dims equal the array dims.
    mask3 = src_mask.reshape(B, 1, S).astype(jnp.int32)

    kernel = functools.partial(
        _encoder_layer_kernel, n_head=n_head, encoder_prenorm=encoder_prenorm,
        alpha=float(alpha), compute_dtype=compute_dtype)

    # Advisory cost estimate (QKV + out proj, attention, FFN).
    flops = B * S * (8 * D * D + 4 * S * D + 4 * D * d_ff)
    transcendentals = B * n_head * S * S
    bytes_params = sum(int(p.size) * p.dtype.itemsize for p in param_list)
    bytes_accessed = int(2 * x.size * x.dtype.itemsize
                         + mask3.size * 4 + bytes_params)

    # Generation-aware VMEM budget, computed from the actual residents.
    if vmem_limit_bytes is None:
        try:
            vmem_cap = int(pltpu.get_tpu_info().vmem_capacity_bytes)
            if vmem_cap <= 0:
                vmem_cap = 64 * 1024 * 1024
        except Exception:
            vmem_cap = 64 * 1024 * 1024        # conservative (v7x) fallback
        it_x = x.dtype.itemsize
        it_c = jnp.dtype(compute_dtype).itemsize
        kv_scratch = S * 2 * D * it_c
        block_bytes = (2 * S * D * it_x            # x block (double-buffered)
                       + 2 * S * 4                 # mask block
                       + 2 * q_block * D * it_x    # output block
                       + 2 * bytes_params)         # weights (worst case 2x)
        interm = 4 * (5 * S * D                    # x_full / ln_kv / kv (f32)
                      + 6 * q_block * D            # q/ln/heads/y temporaries
                      + 3 * q_block * S            # per-head scores / exp
                      + 2 * q_block * d_ff)        # FFN hidden
        vmem_limit_bytes = min(int(0.85 * vmem_cap),
                               max(kv_scratch + block_bytes + interm,
                                   32 * 1024 * 1024))

    def build(single_buffer_weights):
        def full_spec(p):
            nd = p.ndim
            idx = lambda b, q, _nd=nd: (0,) * _nd
            if single_buffer_weights:
                # Constant index maps -> block never changes; single-buffer to
                # halve weight VMEM (no pipelining loss).
                return pl.BlockSpec(p.shape, idx, pipeline_mode=pl.Buffered(1))
            return pl.BlockSpec(p.shape, idx)

        grid_spec = pltpu.PrefetchScalarGridSpec(
            num_scalar_prefetch=0,
            grid=(B, n_q),
            in_specs=[pl.BlockSpec((1, S, D), lambda b, q: (b, 0, 0)),  # x
                      pl.BlockSpec((1, 1, S), lambda b, q: (b, 0, 0))]  # mask
                     + [full_spec(p) for p in param_list],
            out_specs=pl.BlockSpec((1, q_block, D), lambda b, q: (b, q, 0)),
            scratch_shapes=[pltpu.VMEM((S, 2 * D), compute_dtype)],     # KV cache
        )
        # NOTE: q axis must be "arbitrary" (KV cache reuse across tiles);
        # batch is "parallel" for megacore.  For B=1 on v7x one core idles —
        # a leading size-2 parallel axis splitting q tiles (each core with its
        # own KV cache) would recover it.
        return pl.pallas_call(
            kernel,
            out_shape=jax.ShapeDtypeStruct((B, S, D), x.dtype),
            grid_spec=grid_spec,
            compiler_params=pltpu.CompilerParams(
                dimension_semantics=("parallel", "arbitrary"),
                vmem_limit_bytes=int(vmem_limit_bytes)),
            cost_estimate=pl.CostEstimate(flops=int(flops),
                                          transcendentals=int(transcendentals),
                                          bytes_accessed=int(bytes_accessed)),
        )

    try:
        return build(True)(x, mask3, *param_list)
    except Exception:
        # Fallback if single-buffered weight blocks (pl.Buffered(1)) are not
        # supported by this jax/Mosaic version.
        return build(False)(x, mask3, *param_list)


# ---------------- plain-JAX reference (for verification) ----------------
def reference(x, src_mask, params, *, n_head, encoder_prenorm=True, alpha=1.0):
    B, S, D = x.shape
    hd = D // n_head

    def ln(h, g, b):
        mu = h.mean(-1, keepdims=True)
        var = ((h - mu) ** 2).mean(-1, keepdims=True)
        return (h - mu) / jnp.sqrt(var + 1e-5) * g + b

    def mha(h):
        q = h @ params["wq"] + params["bq"]
        k = h @ params["wk"] + params["bk"]
        v = h @ params["wv"] + params["bv"]
        q = q.reshape(B, S, n_head, hd).transpose(0, 2, 1, 3)
        k = k.reshape(B, S, n_head, hd).transpose(0, 2, 1, 3)
        v = v.reshape(B, S, n_head, hd).transpose(0, 2, 1, 3)
        s = jnp.einsum("bhqd,bhkd->bhqk", q, k)
        m = (src_mask > 0)[:, None, None, :]
        s = jnp.where(m, -1.0e9, s)
        p = jax.nn.softmax(s / (hd ** 0.5), axis=-1)
        o = jnp.einsum("bhqk,bhkd->bhqd", p, v).transpose(0, 2, 1, 3).reshape(B, S, D)
        return o @ params["wo"] + params["bo"]

    def ffn(h):
        return jnp.maximum(h @ params["w1"] + params["b1"], 0.0) @ params["w2"] + params["b2"]

    if encoder_prenorm:
        x = x + mha(ln(x, params["g1"], params["be1"]))
        x = x + ffn(ln(x, params["g2"], params["be2"]))
    else:
        x = ln(x * alpha + mha(x), params["g1"], params["be1"])
        x = ln(x * alpha + ffn(x), params["g2"], params["be2"])
    return x


def init_params(key, d_model, d_ff):
    ks = jax.random.split(key, 8)
    std = 0.02
    return {
        "wq": jax.random.normal(ks[0], (d_model, d_model), jnp.float32) * std,
        "wk": jax.random.normal(ks[1], (d_model, d_model), jnp.float32) * std,
        "wv": jax.random.normal(ks[2], (d_model, d_model), jnp.float32) * std,
        "wo": jax.random.normal(ks[3], (d_model, d_model), jnp.float32) * std,
        "w1": jax.random.normal(ks[4], (d_model, d_ff), jnp.float32) * std,
        "w2": jax.random.normal(ks[5], (d_ff, d_model), jnp.float32) * std,
        "bq": jax.random.normal(ks[6], (1, d_model), jnp.float32) * std,
        "bk": jnp.full((1, d_model), 0.01, jnp.float32),
        "bv": jnp.full((1, d_model), -0.01, jnp.float32),
        "bo": jax.random.normal(ks[7], (1, d_model), jnp.float32) * std,
        "b1": jnp.full((1, d_ff), 0.02, jnp.float32),
        "b2": jnp.full((1, d_model), -0.02, jnp.float32),
        "g1": jnp.ones((1, d_model), jnp.float32),
        "be1": jnp.zeros((1, d_model), jnp.float32),
        "g2": jnp.ones((1, d_model), jnp.float32),
        "be2": jnp.zeros((1, d_model), jnp.float32),
    }


if __name__ == "__main__":
    B, S, D, D_FF, N_HEAD = 2, 16, 32, 64, 4
    key = jax.random.PRNGKey(0)
    kx, kp = jax.random.split(key)

    x = jax.random.normal(kx, (B, S, D), jnp.float32)
    # pad mask: batch 0 fully valid, batch 1 has last 5 key positions masked
    valid_len = jnp.array([S, S - 5])
    src_mask = (jnp.arange(S)[None, :] >= valid_len[:, None]).astype(jnp.int32)
    params = init_params(kp, D, D_FF)

    # 1) pre-norm, f32 compute, tiled queries (two q-tiles per batch element,
    #    exercising the cached K/V path).
    out = jax.block_until_ready(
        encoder_layer(x, src_mask, params, n_head=N_HEAD,
                      encoder_prenorm=True, alpha=1.0, q_block=8))
    ref = reference(x, src_mask, params, n_head=N_HEAD, encoder_prenorm=True)
    assert out.shape == (B, S, D)
    err = float(jnp.max(jnp.abs(out - ref)))
    assert err < 2e-4, f"prenorm f32 max abs err {err}"

    # 2) post-norm branch, f32, untiled queries
    out2 = jax.block_until_ready(
        encoder_layer(x, src_mask, params, n_head=N_HEAD,
                      encoder_prenorm=False, alpha=0.9))
    ref2 = reference(x, src_mask, params, n_head=N_HEAD,
                     encoder_prenorm=False, alpha=0.9)
    err2 = float(jnp.max(jnp.abs(out2 - ref2)))
    assert err2 < 2e-4, f"postnorm f32 max abs err {err2}"

    # 3) pre-norm with bf16 matmul operands / bf16 KV cache (f32 accumulation
    #    and f32 LayerNorm)
    out3 = jax.block_until_ready(
        encoder_layer(x, src_mask, params, n_head=N_HEAD,
                      encoder_prenorm=True, q_block=8,
                      compute_dtype=jnp.bfloat16))
    err3 = float(jnp.max(jnp.abs(out3 - ref)))
    assert err3 < 3e-2, f"prenorm bf16 max abs err {err3}"

    print("KERNEL_OK")
</pallas_src>

<mosaic_0001>
module attributes {stable_mosaic.version = 11 : i64} {
  func.func @_encoder_layer_kernel(%arg0: i32, %arg1: i32, %arg2: memref<1x16x32xf32, #tpu.memory_space<vmem>>, %arg3: memref<1x1x16xi32, #tpu.memory_space<vmem>>, %arg4: memref<32x32xf32, #tpu.memory_space<vmem>>, %arg5: memref<1x32xf32, #tpu.memory_space<vmem>>, %arg6: memref<32x64xf32, #tpu.memory_space<vmem>>, %arg7: memref<1x64xf32, #tpu.memory_space<vmem>>, %arg8: memref<32x32xf32, #tpu.memory_space<vmem>>, %arg9: memref<1x32xf32, #tpu.memory_space<vmem>>, %arg10: memref<32x64xf32, #tpu.memory_space<vmem>>, %arg11: memref<1x64xf32, #tpu.memory_space<vmem>>, %arg12: memref<64x32xf32, #tpu.memory_space<vmem>>, %arg13: memref<1x32xf32, #tpu.memory_space<vmem>>, %arg14: memref<1x32xf32, #tpu.memory_space<vmem>>, %arg15: memref<1x32xf32, #tpu.memory_space<vmem>>, %arg16: memref<1x32xf32, #tpu.memory_space<vmem>>, %arg17: memref<1x32xf32, #tpu.memory_space<vmem>>, %arg18: memref<1x8x32xf32, #tpu.memory_space<vmem>>, %arg19: memref<16x64xf32, #tpu.memory_space<vmem>>) attributes {dimension_semantics = [#tpu.dimension_semantics<parallel>, #tpu.dimension_semantics<arbitrary>], iteration_bounds = array<i64: 2, 2>, scalar_prefetch = 0 : i64, scratch_operands = 1 : i64, tpu.core_type = #tpu.core_type<tc>, window_params = [{transform_indices = @transform_0, window_bounds = array<i64: 1, 16, 32>}, {transform_indices = @transform_1, window_bounds = array<i64: 1, 1, 16>}, {pipeline_mode = #tpu.pipeline_mode<synchronous>, transform_indices = @transform_2, window_bounds = array<i64: 32, 32>}, {pipeline_mode = #tpu.pipeline_mode<synchronous>, transform_indices = @transform_3, window_bounds = array<i64: 1, 32>}, {pipeline_mode = #tpu.pipeline_mode<synchronous>, transform_indices = @transform_4, window_bounds = array<i64: 32, 64>}, {pipeline_mode = #tpu.pipeline_mode<synchronous>, transform_indices = @transform_5, window_bounds = array<i64: 1, 64>}, {pipeline_mode = #tpu.pipeline_mode<synchronous>, transform_indices = @transform_6, window_bounds = array<i64: 32, 32>}, {pipeline_mode = #tpu.pipeline_mode<synchronous>, transform_indices = @transform_7, window_bounds = array<i64: 1, 32>}, {pipeline_mode = #tpu.pipeline_mode<synchronous>, transform_indices = @transform_8, window_bounds = array<i64: 32, 64>}, {pipeline_mode = #tpu.pipeline_mode<synchronous>, transform_indices = @transform_9, window_bounds = array<i64: 1, 64>}, {pipeline_mode = #tpu.pipeline_mode<synchronous>, transform_indices = @transform_10, window_bounds = array<i64: 64, 32>}, {pipeline_mode = #tpu.pipeline_mode<synchronous>, transform_indices = @transform_11, window_bounds = array<i64: 1, 32>}, {pipeline_mode = #tpu.pipeline_mode<synchronous>, transform_indices = @transform_12, window_bounds = array<i64: 1, 32>}, {pipeline_mode = #tpu.pipeline_mode<synchronous>, transform_indices = @transform_13, window_bounds = array<i64: 1, 32>}, {pipeline_mode = #tpu.pipeline_mode<synchronous>, transform_indices = @transform_14, window_bounds = array<i64: 1, 32>}, {pipeline_mode = #tpu.pipeline_mode<synchronous>, transform_indices = @transform_15, window_bounds = array<i64: 1, 32>}, {transform_indices = @transform_16, window_bounds = array<i64: 1, 8, 32>}]} {
    %c0_i32 = arith.constant 0 : i32
    %0 = arith.cmpi eq, %arg1, %c0_i32 : i32
    %1 = arith.extui %0 : i1 to i32
    %c0_i32_0 = arith.constant 0 : i32
    %2 = arith.cmpi ne, %1, %c0_i32_0 : i32
    scf.if %2 {
      %c0_70 = arith.constant 0 : index
      %c0_71 = arith.constant 0 : index
      %c0_72 = arith.constant 0 : index
      %169 = vector.load %arg2[%c0_70, %c0_71, %c0_72] : memref<1x16x32xf32, #tpu.memory_space<vmem>>, vector<1x16x32xf32>
      %170 = vector.shape_cast %169 : vector<1x16x32xf32> to vector<16x32xf32>
      %c0_73 = arith.constant 0 : index
      %c0_74 = arith.constant 0 : index
      %171 = vector.load %arg14[%c0_73, %c0_74] : memref<1x32xf32, #tpu.memory_space<vmem>>, vector<1x32xf32>
      %c0_75 = arith.constant 0 : index
      %c0_76 = arith.constant 0 : index
      %172 = vector.load %arg15[%c0_75, %c0_76] : memref<1x32xf32, #tpu.memory_space<vmem>>, vector<1x32xf32>
      %cst_77 = arith.constant dense<0.000000e+00> : vector<16xf32>
      %173 = vector.multi_reduction <add>, %170, %cst_77 [1] : vector<16x32xf32> to vector<16xf32>
      %174 = vector.shape_cast %173 : vector<16xf32> to vector<16x1xf32>
      %cst_78 = arith.constant 3.200000e+01 : f32
      %175 = vector.broadcast %cst_78 : f32 to vector<16x1xf32>
      %176 = arith.divf %174, %175 : vector<16x1xf32>
      %177 = vector.broadcast %176 : vector<16x1xf32> to vector<16x32xf32>
      %178 = arith.subf %170, %177 : vector<16x32xf32>
      %179 = arith.mulf %178, %178 : vector<16x32xf32>
      %cst_79 = arith.constant dense<0.000000e+00> : vector<16xf32>
      %180 = vector.multi_reduction <add>, %179, %cst_79 [1] : vector<16x32xf32> to vector<16xf32>
      %181 = vector.shape_cast %180 : vector<16xf32> to vector<16x1xf32>
      %cst_80 = arith.constant 3.200000e+01 : f32
      %182 = vector.broadcast %cst_80 : f32 to vector<16x1xf32>
      %183 = arith.divf %181, %182 : vector<16x1xf32>
      %184 = vector.broadcast %176 : vector<16x1xf32> to vector<16x32xf32>
      %185 = arith.subf %170, %184 : vector<16x32xf32>
      %cst_81 = arith.constant 9.99999974E-6 : f32
      %186 = vector.broadcast %cst_81 : f32 to vector<16x1xf32>
      %187 = arith.addf %183, %186 : vector<16x1xf32>
      %188 = math.rsqrt %187 : vector<16x1xf32>
      %189 = vector.broadcast %188 : vector<16x1xf32> to vector<16x32xf32>
      %190 = arith.mulf %185, %189 : vector<16x32xf32>
      %191 = vector.broadcast %171 : vector<1x32xf32> to vector<16x32xf32>
      %192 = arith.mulf %190, %191 : vector<16x32xf32>
      %193 = vector.broadcast %172 : vector<1x32xf32> to vector<16x32xf32>
      %194 = arith.addf %192, %193 : vector<16x32xf32>
      %c0_82 = arith.constant 0 : index
      %c0_83 = arith.constant 0 : index
      %195 = vector.load %arg6[%c0_82, %c0_83] : memref<32x64xf32, #tpu.memory_space<vmem>>, vector<32x64xf32>
      %cst_84 = arith.constant dense<0.000000e+00> : vector<16x64xf32>
      %196 = tpu.matmul %194, %195, %cst_84 {dimension_numbers = #tpu.dot_dimension_numbers<[1], [0], [0], [1], [0, 0, 1, 1], [], []>} : vector<16x32xf32>, vector<32x64xf32>, vector<16x64xf32> -> vector<16x64xf32>
      %c0_85 = arith.constant 0 : index
      %c0_86 = arith.constant 0 : index
      %197 = vector.load %arg7[%c0_85, %c0_86] : memref<1x64xf32, #tpu.memory_space<vmem>>, vector<1x64xf32>
      %198 = vector.broadcast %197 : vector<1x64xf32> to vector<16x64xf32>
      %199 = arith.addf %196, %198 : vector<16x64xf32>
      %c0_87 = arith.constant 0 : index
      %c0_88 = arith.constant 0 : index
      %200 = vector.load %arg19[%c0_87, %c0_88] : memref<16x64xf32, #tpu.memory_space<vmem>>, vector<16x64xf32>
      tpu.vector_store %arg19[%c0_87, %c0_88], %199 {strides = array<i32>} : memref<16x64xf32, #tpu.memory_space<vmem>>, vector<16x64xf32>,
    } else {
    }
    %c8_i32 = arith.constant 8 : i32
    %3 = arith.muli %arg1, %c8_i32 : i32
    %4 = tpu.assume_multiple %3, 8 : i32
    %c0 = arith.constant 0 : index
    %5 = arith.index_cast %4 : i32 to index
    %c0_1 = arith.constant 0 : index
    %6 = vector.load %arg2[%c0, %5, %c0_1] : memref<1x16x32xf32, #tpu.memory_space<vmem>>, vector<1x8x32xf32>
    %7 = vector.shape_cast %6 : vector<1x8x32xf32> to vector<8x32xf32>
    %c0_2 = arith.constant 0 : index
    %c0_3 = arith.constant 0 : index
    %c0_4 = arith.constant 0 : index
    %8 = vector.load %arg3[%c0_2, %c0_3, %c0_4] : memref<1x1x16xi32, #tpu.memory_space<vmem>>, vector<1x1x16xi32>
    %9 = vector.shape_cast %8 : vector<1x1x16xi32> to vector<1x16xi32>
    %c0_i32_5 = arith.constant 0 : i32
    %10 = vector.broadcast %c0_i32_5 : i32 to vector<1x16xi32>
    %11 = arith.cmpi sgt, %9, %10 : vector<1x16xi32>
    %c0_6 = arith.constant 0 : index
    %c0_7 = arith.constant 0 : index
    %12 = vector.load %arg19[%c0_6, %c0_7] : memref<16x64xf32, #tpu.memory_space<vmem>>, vector<16x64xf32>
    %13 = vector.extract_strided_slice %12 {offsets = [0, 0], sizes = [16, 32], strides = [1, 1]} : vector<16x64xf32> to vector<16x32xf32>
    %14 = vector.extract_strided_slice %12 {offsets = [0, 32], sizes = [16, 32], strides = [1, 1]} : vector<16x64xf32> to vector<16x32xf32>
    %c0_8 = arith.constant 0 : index
    %c0_9 = arith.constant 0 : index
    %15 = vector.load %arg14[%c0_8, %c0_9] : memref<1x32xf32, #tpu.memory_space<vmem>>, vector<1x32xf32>
    %c0_10 = arith.constant 0 : index
    %c0_11 = arith.constant 0 : index
    %16 = vector.load %arg15[%c0_10, %c0_11] : memref<1x32xf32, #tpu.memory_space<vmem>>, vector<1x32xf32>
    %cst = arith.constant dense<0.000000e+00> : vector<8xf32>
    %17 = vector.multi_reduction <add>, %7, %cst [1] : vector<8x32xf32> to vector<8xf32>
    %18 = vector.shape_cast %17 : vector<8xf32> to vector<8x1xf32>
    %cst_12 = arith.constant 3.200000e+01 : f32
    %19 = vector.broadcast %cst_12 : f32 to vector<8x1xf32>
    %20 = arith.divf %18, %19 : vector<8x1xf32>
    %21 = vector.broadcast %20 : vector<8x1xf32> to vector<8x32xf32>
    %22 = arith.subf %7, %21 : vector<8x32xf32>
    %23 = arith.mulf %22, %22 : vector<8x32xf32>
    %cst_13 = arith.constant dense<0.000000e+00> : vector<8xf32>
    %24 = vector.multi_reduction <add>, %23, %cst_13 [1] : vector<8x32xf32> to vector<8xf32>
    %25 = vector.shape_cast %24 : vector<8xf32> to vector<8x1xf32>
    %cst_14 = arith.constant 3.200000e+01 : f32
    %26 = vector.broadcast %cst_14 : f32 to vector<8x1xf32>
    %27 = arith.divf %25, %26 : vector<8x1xf32>
    %28 = vector.broadcast %20 : vector<8x1xf32> to vector<8x32xf32>
    %29 = arith.subf %7, %28 : vector<8x32xf32>
    %cst_15 = arith.constant 9.99999974E-6 : f32
    %30 = vector.broadcast %cst_15 : f32 to vector<8x1xf32>
    %31 = arith.addf %27, %30 : vector<8x1xf32>
    %32 = math.rsqrt %31 : vector<8x1xf32>
    %33 = vector.broadcast %32 : vector<8x1xf32> to vector<8x32xf32>
    %34 = arith.mulf %29, %33 : vector<8x32xf32>
    %35 = vector.broadcast %15 : vector<1x32xf32> to vector<8x32xf32>
    %36 = arith.mulf %34, %35 : vector<8x32xf32>
    %37 = vector.broadcast %16 : vector<1x32xf32> to vector<8x32xf32>
    %38 = arith.addf %36, %37 : vector<8x32xf32>
    %c0_16 = arith.constant 0 : index
    %c0_17 = arith.constant 0 : index
    %39 = vector.load %arg4[%c0_16, %c0_17] : memref<32x32xf32, #tpu.memory_space<vmem>>, vector<32x32xf32>
    %cst_18 = arith.constant dense<0.000000e+00> : vector<8x32xf32>
    %40 = tpu.matmul %38, %39, %cst_18 {dimension_numbers = #tpu.dot_dimension_numbers<[1], [0], [0], [1], [0, 0, 1, 1], [], []>} : vector<8x32xf32>, vector<32x32xf32>, vector<8x32xf32> -> vector<8x32xf32>
    %c0_19 = arith.constant 0 : index
    %c0_20 = arith.constant 0 : index
    %41 = vector.load %arg5[%c0_19, %c0_20] : memref<1x32xf32, #tpu.memory_space<vmem>>, vector<1x32xf32>
    %42 = vector.broadcast %41 : vector<1x32xf32> to vector<8x32xf32>
    %43 = arith.addf %40, %42 : vector<8x32xf32>
    %cst_21 = arith.constant 0.353553385 : f32
    %44 = vector.broadcast %cst_21 : f32 to vector<8x32xf32>
    %45 = arith.mulf %43, %44 : vector<8x32xf32>
    %46 = vector.extract_strided_slice %45 {offsets = [0, 0], sizes = [8, 8], strides = [1, 1]} : vector<8x32xf32> to vector<8x8xf32>
    %47 = vector.extract_strided_slice %13 {offsets = [0, 0], sizes = [16, 8], strides = [1, 1]} : vector<16x32xf32> to vector<16x8xf32>
    %cst_22 = arith.constant dense<0.000000e+00> : vector<8x16xf32>
    %48 = tpu.matmul %46, %47, %cst_22 {dimension_numbers = #tpu.dot_dimension_numbers<[1], [1], [0], [0], [0, 0, 1, 0], [], []>} : vector<8x8xf32>, vector<16x8xf32>, vector<8x16xf32> -> vector<8x16xf32>
    %cst_23 = arith.constant -1.000000e+09 : f32
    %49 = vector.shape_cast %11 : vector<1x16xi1> to vector<1x16xi1>
    %50 = vector.broadcast %49 : vector<1x16xi1> to vector<8x16xi1>
    %51 = vector.broadcast %cst_23 : f32 to vector<8x16xf32>
    %52 = arith.select %50, %51, %48 : vector<8x16xi1>, vector<8x16xf32>
    %cst_24 = arith.constant dense<0xFF800000> : vector<8xf32>
    %53 = vector.multi_reduction <maximumf>, %52, %cst_24 [1] : vector<8x16xf32> to vector<8xf32>
    %54 = vector.shape_cast %53 : vector<8xf32> to vector<8x1xf32>
    %55 = vector.broadcast %54 : vector<8x1xf32> to vector<8x16xf32>
    %56 = arith.subf %52, %55 : vector<8x16xf32>
    %57 = math.exp %56 : vector<8x16xf32>
    %cst_25 = arith.constant dense<0.000000e+00> : vector<8xf32>
    %58 = vector.multi_reduction <add>, %57, %cst_25 [1] : vector<8x16xf32> to vector<8xf32>
    %59 = vector.shape_cast %58 : vector<8xf32> to vector<8x1xf32>
    %60 = tpu.reciprocal %59 : vector<8x1xf32> -> vector<8x1xf32>
    %61 = vector.extract_strided_slice %14 {offsets = [0, 0], sizes = [16, 8], strides = [1, 1]} : vector<16x32xf32> to vector<16x8xf32>
    %cst_26 = arith.constant dense<0.000000e+00> : vector<8x8xf32>
    %62 = tpu.matmul %57, %61, %cst_26 {dimension_numbers = #tpu.dot_dimension_numbers<[1], [0], [0], [1], [0, 0, 1, 1], [], []>} : vector<8x16xf32>, vector<16x8xf32>, vector<8x8xf32> -> vector<8x8xf32>
    %63 = vector.broadcast %60 : vector<8x1xf32> to vector<8x8xf32>
    %64 = arith.mulf %62, %63 : vector<8x8xf32>
    %65 = vector.extract_strided_slice %45 {offsets = [0, 8], sizes = [8, 8], strides = [1, 1]} : vector<8x32xf32> to vector<8x8xf32>
    %66 = vector.extract_strided_slice %13 {offsets = [0, 8], sizes = [16, 8], strides = [1, 1]} : vector<16x32xf32> to vector<16x8xf32>
    %cst_27 = arith.constant dense<0.000000e+00> : vector<8x16xf32>
    %67 = tpu.matmul %65, %66, %cst_27 {dimension_numbers = #tpu.dot_dimension_numbers<[1], [1], [0], [0], [0, 0, 1, 0], [], []>} : vector<8x8xf32>, vector<16x8xf32>, vector<8x16xf32> -> vector<8x16xf32>
    %cst_28 = arith.constant -1.000000e+09 : f32
    %68 = vector.shape_cast %11 : vector<1x16xi1> to vector<1x16xi1>
    %69 = vector.broadcast %68 : vector<1x16xi1> to vector<8x16xi1>
    %70 = vector.broadcast %cst_28 : f32 to vector<8x16xf32>
    %71 = arith.select %69, %70, %67 : vector<8x16xi1>, vector<8x16xf32>
    %cst_29 = arith.constant dense<0xFF800000> : vector<8xf32>
    %72 = vector.multi_reduction <maximumf>, %71, %cst_29 [1] : vector<8x16xf32> to vector<8xf32>
    %73 = vector.shape_cast %72 : vector<8xf32> to vector<8x1xf32>
    %74 = vector.broadcast %73 : vector<8x1xf32> to vector<8x16xf32>
    %75 = arith.subf %71, %74 : vector<8x16xf32>
    %76 = math.exp %75 : vector<8x16xf32>
    %cst_30 = arith.constant dense<0.000000e+00> : vector<8xf32>
    %77 = vector.multi_reduction <add>, %76, %cst_30 [1] : vector<8x16xf32> to vector<8xf32>
    %78 = vector.shape_cast %77 : vector<8xf32> to vector<8x1xf32>
    %79 = tpu.reciprocal %78 : vector<8x1xf32> -> vector<8x1xf32>
    %80 = vector.extract_strided_slice %14 {offsets = [0, 8], sizes = [16, 8], strides = [1, 1]} : vector<16x32xf32> to vector<16x8xf32>
    %cst_31 = arith.constant dense<0.000000e+00> : vector<8x8xf32>
    %81 = tpu.matmul %76, %80, %cst_31 {dimension_numbers = #tpu.dot_dimension_numbers<[1], [0], [0], [1], [0, 0, 1, 1], [], []>} : vector<8x16xf32>, vector<16x8xf32>, vector<8x8xf32> -> vector<8x8xf32>
    %82 = vector.broadcast %79 : vector<8x1xf32> to vector<8x8xf32>
    %83 = arith.mulf %81, %82 : vector<8x8xf32>
    %84 = vector.extract_strided_slice %45 {offsets = [0, 16], sizes = [8, 8], strides = [1, 1]} : vector<8x32xf32> to vector<8x8xf32>
    %85 = vector.extract_strided_slice %13 {offsets = [0, 16], sizes = [16, 8], strides = [1, 1]} : vector<16x32xf32> to vector<16x8xf32>
    %cst_32 = arith.constant dense<0.000000e+00> : vector<8x16xf32>
    %86 = tpu.matmul %84, %85, %cst_32 {dimension_numbers = #tpu.dot_dimension_numbers<[1], [1], [0], [0], [0, 0, 1, 0], [], []>} : vector<8x8xf32>, vector<16x8xf32>, vector<8x16xf32> -> vector<8x16xf32>
    %cst_33 = arith.constant -1.000000e+09 : f32
    %87 = vector.shape_cast %11 : vector<1x16xi1> to vector<1x16xi1>
    %88 = vector.broadcast %87 : vector<1x16xi1> to vector<8x16xi1>
    %89 = vector.broadcast %cst_33 : f32 to vector<8x16xf32>
    %90 = arith.select %88, %89, %86 : vector<8x16xi1>, vector<8x16xf32>
    %cst_34 = arith.constant dense<0xFF800000> : vector<8xf32>
    %91 = vector.multi_reduction <maximumf>, %90, %cst_34 [1] : vector<8x16xf32> to vector<8xf32>
    %92 = vector.shape_cast %91 : vector<8xf32> to vector<8x1xf32>
    %93 = vector.broadcast %92 : vector<8x1xf32> to vector<8x16xf32>
    %94 = arith.subf %90, %93 : vector<8x16xf32>
    %95 = math.exp %94 : vector<8x16xf32>
    %cst_35 = arith.constant dense<0.000000e+00> : vector<8xf32>
    %96 = vector.multi_reduction <add>, %95, %cst_35 [1] : vector<8x16xf32> to vector<8xf32>
    %97 = vector.shape_cast %96 : vector<8xf32> to vector<8x1xf32>
    %98 = tpu.reciprocal %97 : vector<8x1xf32> -> vector<8x1xf32>
    %99 = vector.extract_strided_slice %14 {offsets = [0, 16], sizes = [16, 8], strides = [1, 1]} : vector<16x32xf32> to vector<16x8xf32>
    %cst_36 = arith.constant dense<0.000000e+00> : vector<8x8xf32>
    %100 = tpu.matmul %95, %99, %cst_36 {dimension_numbers = #tpu.dot_dimension_numbers<[1], [0], [0], [1], [0, 0, 1, 1], [], []>} : vector<8x16xf32>, vector<16x8xf32>, vector<8x8xf32> -> vector<8x8xf32>
    %101 = vector.broadcast %98 : vector<8x1xf32> to vector<8x8xf32>
    %102 = arith.mulf %100, %101 : vector<8x8xf32>
    %103 = vector.extract_strided_slice %45 {offsets = [0, 24], sizes = [8, 8], strides = [1, 1]} : vector<8x32xf32> to vector<8x8xf32>
    %104 = vector.extract_strided_slice %13 {offsets = [0, 24], sizes = [16, 8], strides = [1, 1]} : vector<16x32xf32> to vector<16x8xf32>
    %cst_37 = arith.constant dense<0.000000e+00> : vector<8x16xf32>
    %105 = tpu.matmul %103, %104, %cst_37 {dimension_numbers = #tpu.dot_dimension_numbers<[1], [1], [0], [0], [0, 0, 1, 0], [], []>} : vector<8x8xf32>, vector<16x8xf32>, vector<8x16xf32> -> vector<8x16xf32>
    %cst_38 = arith.constant -1.000000e+09 : f32
    %106 = vector.shape_cast %11 : vector<1x16xi1> to vector<1x16xi1>
    %107 = vector.broadcast %106 : vector<1x16xi1> to vector<8x16xi1>
    %108 = vector.broadcast %cst_38 : f32 to vector<8x16xf32>
    %109 = arith.select %107, %108, %105 : vector<8x16xi1>, vector<8x16xf32>
    %cst_39 = arith.constant dense<0xFF800000> : vector<8xf32>
    %110 = vector.multi_reduction <maximumf>, %109, %cst_39 [1] : vector<8x16xf32> to vector<8xf32>
    %111 = vector.shape_cast %110 : vector<8xf32> to vector<8x1xf32>
    %112 = vector.broadcast %111 : vector<8x1xf32> to vector<8x16xf32>
    %113 = arith.subf %109, %112 : vector<8x16xf32>
    %114 = math.exp %113 : vector<8x16xf32>
    %cst_40 = arith.constant dense<0.000000e+00> : vector<8xf32>
    %115 = vector.multi_reduction <add>, %114, %cst_40 [1] : vector<8x16xf32> to vector<8xf32>
    %116 = vector.shape_cast %115 : vector<8xf32> to vector<8x1xf32>
    %117 = tpu.reciprocal %116 : vector<8x1xf32> -> vector<8x1xf32>
    %118 = vector.extract_strided_slice %14 {offsets = [0, 24], sizes = [16, 8], strides = [1, 1]} : vector<16x32xf32> to vector<16x8xf32>
    %cst_41 = arith.constant dense<0.000000e+00> : vector<8x8xf32>
    %119 = tpu.matmul %114, %118, %cst_41 {dimension_numbers = #tpu.dot_dimension_numbers<[1], [0], [0], [1], [0, 0, 1, 1], [], []>} : vector<8x16xf32>, vector<16x8xf32>, vector<8x8xf32> -> vector<8x8xf32>
    %120 = vector.broadcast %117 : vector<8x1xf32> to vector<8x8xf32>
    %121 = arith.mulf %119, %120 : vector<8x8xf32>
    %122 = tpu.concatenate %64, %83, %102, %121 in 1 : vector<8x8xf32>, vector<8x8xf32>, vector<8x8xf32>, vector<8x8xf32> -> vector<8x32xf32>
    %c0_42 = arith.constant 0 : index
    %c0_43 = arith.constant 0 : index
    %123 = vector.load %arg8[%c0_42, %c0_43] : memref<32x32xf32, #tpu.memory_space<vmem>>, vector<32x32xf32>
    %cst_44 = arith.constant dense<0.000000e+00> : vector<8x32xf32>
    %124 = tpu.matmul %122, %123, %cst_44 {dimension_numbers = #tpu.dot_dimension_numbers<[1], [0], [0], [1], [0, 0, 1, 1], [], []>} : vector<8x32xf32>, vector<32x32xf32>, vector<8x32xf32> -> vector<8x32xf32>
    %c0_45 = arith.constant 0 : index
    %c0_46 = arith.constant 0 : index
    %125 = vector.load %arg9[%c0_45, %c0_46] : memref<1x32xf32, #tpu.memory_space<vmem>>, vector<1x32xf32>
    %126 = vector.broadcast %125 : vector<1x32xf32> to vector<8x32xf32>
    %127 = arith.addf %124, %126 : vector<8x32xf32>
    %128 = arith.addf %7, %127 : vector<8x32xf32>
    %c0_47 = arith.constant 0 : index
    %c0_48 = arith.constant 0 : index
    %129 = vector.load %arg16[%c0_47, %c0_48] : memref<1x32xf32, #tpu.memory_space<vmem>>, vector<1x32xf32>
    %c0_49 = arith.constant 0 : index
    %c0_50 = arith.constant 0 : index
    %130 = vector.load %arg17[%c0_49, %c0_50] : memref<1x32xf32, #tpu.memory_space<vmem>>, vector<1x32xf32>
    %cst_51 = arith.constant dense<0.000000e+00> : vector<8xf32>
    %131 = vector.multi_reduction <add>, %128, %cst_51 [1] : vector<8x32xf32> to vector<8xf32>
    %132 = vector.shape_cast %131 : vector<8xf32> to vector<8x1xf32>
    %cst_52 = arith.constant 3.200000e+01 : f32
    %133 = vector.broadcast %cst_52 : f32 to vector<8x1xf32>
    %134 = arith.divf %132, %133 : vector<8x1xf32>
    %135 = vector.broadcast %134 : vector<8x1xf32> to vector<8x32xf32>
    %136 = arith.subf %128, %135 : vector<8x32xf32>
    %137 = arith.mulf %136, %136 : vector<8x32xf32>
    %cst_53 = arith.constant dense<0.000000e+00> : vector<8xf32>
    %138 = vector.multi_reduction <add>, %137, %cst_53 [1] : vector<8x32xf32> to vector<8xf32>
    %139 = vector.shape_cast %138 : vector<8xf32> to vector<8x1xf32>
    %cst_54 = arith.constant 3.200000e+01 : f32
    %140 = vector.broadcast %cst_54 : f32 to vector<8x1xf32>
    %141 = arith.divf %139, %140 : vector<8x1xf32>
    %142 = vector.broadcast %134 : vector<8x1xf32> to vector<8x32xf32>
    %143 = arith.subf %128, %142 : vector<8x32xf32>
    %cst_55 = arith.constant 9.99999974E-6 : f32
    %144 = vector.broadcast %cst_55 : f32 to vector<8x1xf32>
    %145 = arith.addf %141, %144 : vector<8x1xf32>
    %146 = math.rsqrt %145 : vector<8x1xf32>
    %147 = vector.broadcast %146 : vector<8x1xf32> to vector<8x32xf32>
    %148 = arith.mulf %143, %147 : vector<8x32xf32>
    %149 = vector.broadcast %129 : vector<1x32xf32> to vector<8x32xf32>
    %150 = arith.mulf %148, %149 : vector<8x32xf32>
    %151 = vector.broadcast %130 : vector<1x32xf32> to vector<8x32xf32>
    %152 = arith.addf %150, %151 : vector<8x32xf32>
    %c0_56 = arith.constant 0 : index
    %c0_57 = arith.constant 0 : index
    %153 = vector.load %arg10[%c0_56, %c0_57] : memref<32x64xf32, #tpu.memory_space<vmem>>, vector<32x64xf32>
    %cst_58 = arith.constant dense<0.000000e+00> : vector<8x64xf32>
    %154 = tpu.matmul %152, %153, %cst_58 {dimension_numbers = #tpu.dot_dimension_numbers<[1], [0], [0], [1], [0, 0, 1, 1], [], []>} : vector<8x32xf32>, vector<32x64xf32>, vector<8x64xf32> -> vector<8x64xf32>
    %c0_59 = arith.constant 0 : index
    %c0_60 = arith.constant 0 : index
    %155 = vector.load %arg11[%c0_59, %c0_60] : memref<1x64xf32, #tpu.memory_space<vmem>>, vector<1x64xf32>
    %156 = vector.broadcast %155 : vector<1x64xf32> to vector<8x64xf32>
    %157 = arith.addf %154, %156 : vector<8x64xf32>
    %cst_61 = arith.constant 0.000000e+00 : f32
    %158 = vector.broadcast %cst_61 : f32 to vector<8x64xf32>
    %159 = arith.maximumf %157, %158 : vector<8x64xf32>
    %c0_62 = arith.constant 0 : index
    %c0_63 = arith.constant 0 : index
    %160 = vector.load %arg12[%c0_62, %c0_63] : memref<64x32xf32, #tpu.memory_space<vmem>>, vector<64x32xf32>
    %cst_64 = arith.constant dense<0.000000e+00> : vector<8x32xf32>
    %161 = tpu.matmul %159, %160, %cst_64 {dimension_numbers = #tpu.dot_dimension_numbers<[1], [0], [0], [1], [0, 0, 1, 1], [], []>} : vector<8x64xf32>, vector<64x32xf32>, vector<8x32xf32> -> vector<8x32xf32>
    %c0_65 = arith.constant 0 : index
    %c0_66 = arith.constant 0 : index
    %162 = vector.load %arg13[%c0_65, %c0_66] : memref<1x32xf32, #tpu.memory_space<vmem>>, vector<1x32xf32>
    %163 = vector.broadcast %162 : vector<1x32xf32> to vector<8x32xf32>
    %164 = arith.addf %161, %163 : vector<8x32xf32>
    %165 = arith.addf %128, %164 : vector<8x32xf32>
    %c0_67 = arith.constant 0 : index
    %c0_68 = arith.constant 0 : index
    %c0_69 = arith.constant 0 : index
    %166 = vector.load %arg18[%c0_67, %c0_68, %c0_69] : memref<1x8x32xf32, #tpu.memory_space<vmem>>, vector<1x8x32xf32>
    %167 = vector.shape_cast %166 : vector<1x8x32xf32> to vector<8x32xf32>
    %168 = vector.shape_cast %165 : vector<8x32xf32> to vector<1x8x32xf32>
    tpu.vector_store %arg18[%c0_67, %c0_68, %c0_69], %168 {strides = array<i32>} : memref<1x8x32xf32, #tpu.memory_space<vmem>>, vector<1x8x32xf32>,
    return
  }
  func.func @transform_0(%arg0: i32, %arg1: i32) -> (i32, i32, i32) {
    %c0_i32 = arith.constant 0 : i32
    %c0_i32_0 = arith.constant 0 : i32
    %c0_i32_1 = arith.constant 0 : i32
    return %arg0, %c0_i32, %c0_i32_0 : i32, i32, i32
  }
  func.func @transform_1(%arg0: i32, %arg1: i32) -> (i32, i32, i32) {
    %c0_i32 = arith.constant 0 : i32
    %c0_i32_0 = arith.constant 0 : i32
    %c0_i32_1 = arith.constant 0 : i32
    return %arg0, %c0_i32, %c0_i32_0 : i32, i32, i32
  }
  func.func @transform_2(%arg0: i32, %arg1: i32) -> (i32, i32) {
    %c0_i32 = arith.constant 0 : i32
    %c0_i32_0 = arith.constant 0 : i32
    %c0_i32_1 = arith.constant 0 : i32
    return %c0_i32, %c0_i32_0 : i32, i32
  }
  func.func @transform_3(%arg0: i32, %arg1: i32) -> (i32, i32) {
    %c0_i32 = arith.constant 0 : i32
    %c0_i32_0 = arith.constant 0 : i32
    %c0_i32_1 = arith.constant 0 : i32
    return %c0_i32, %c0_i32_0 : i32, i32
  }
  func.func @transform_4(%arg0: i32, %arg1: i32) -> (i32, i32) {
    %c0_i32 = arith.constant 0 : i32
    %c0_i32_0 = arith.constant 0 : i32
    %c0_i32_1 = arith.constant 0 : i32
    return %c0_i32, %c0_i32_0 : i32, i32
  }
  func.func @transform_5(%arg0: i32, %arg1: i32) -> (i32, i32) {
    %c0_i32 = arith.constant 0 : i32
    %c0_i32_0 = arith.constant 0 : i32
    %c0_i32_1 = arith.constant 0 : i32
    return %c0_i32, %c0_i32_0 : i32, i32
  }
  func.func @transform_6(%arg0: i32, %arg1: i32) -> (i32, i32) {
    %c0_i32 = arith.constant 0 : i32
    %c0_i32_0 = arith.constant 0 : i32
    %c0_i32_1 = arith.constant 0 : i32
    return %c0_i32, %c0_i32_0 : i32, i32
  }
  func.func @transform_7(%arg0: i32, %arg1: i32) -> (i32, i32) {
    %c0_i32 = arith.constant 0 : i32
    %c0_i32_0 = arith.constant 0 : i32
    %c0_i32_1 = arith.constant 0 : i32
    return %c0_i32, %c0_i32_0 : i32, i32
  }
  func.func @transform_8(%arg0: i32, %arg1: i32) -> (i32, i32) {
    %c0_i32 = arith.constant 0 : i32
    %c0_i32_0 = arith.constant 0 : i32
    %c0_i32_1 = arith.constant 0 : i32
    return %c0_i32, %c0_i32_0 : i32, i32
  }
  func.func @transform_9(%arg0: i32, %arg1: i32) -> (i32, i32) {
    %c0_i32 = arith.constant 0 : i32
    %c0_i32_0 = arith.constant 0 : i32
    %c0_i32_1 = arith.constant 0 : i32
    return %c0_i32, %c0_i32_0 : i32, i32
  }
  func.func @transform_10(%arg0: i32, %arg1: i32) -> (i32, i32) {
    %c0_i32 = arith.constant 0 : i32
    %c0_i32_0 = arith.constant 0 : i32
    %c0_i32_1 = arith.constant 0 : i32
    return %c0_i32, %c0_i32_0 : i32, i32
  }
  func.func @transform_11(%arg0: i32, %arg1: i32) -> (i32, i32) {
    %c0_i32 = arith.constant 0 : i32
    %c0_i32_0 = arith.constant 0 : i32
    %c0_i32_1 = arith.constant 0 : i32
    return %c0_i32, %c0_i32_0 : i32, i32
  }
  func.func @transform_12(%arg0: i32, %arg1: i32) -> (i32, i32) {
    %c0_i32 = arith.constant 0 : i32
    %c0_i32_0 = arith.constant 0 : i32
    %c0_i32_1 = arith.constant 0 : i32
    return %c0_i32, %c0_i32_0 : i32, i32
  }
  func.func @transform_13(%arg0: i32, %arg1: i32) -> (i32, i32) {
    %c0_i32 = arith.constant 0 : i32
    %c0_i32_0 = arith.constant 0 : i32
    %c0_i32_1 = arith.constant 0 : i32
    return %c0_i32, %c0_i32_0 : i32, i32
  }
  func.func @transform_14(%arg0: i32, %arg1: i32) -> (i32, i32) {
    %c0_i32 = arith.constant 0 : i32
    %c0_i32_0 = arith.constant 0 : i32
    %c0_i32_1 = arith.constant 0 : i32
    return %c0_i32, %c0_i32_0 : i32, i32
  }
  func.func @transform_15(%arg0: i32, %arg1: i32) -> (i32, i32) {
    %c0_i32 = arith.constant 0 : i32
    %c0_i32_0 = arith.constant 0 : i32
    %c0_i32_1 = arith.constant 0 : i32
    return %c0_i32, %c0_i32_0 : i32, i32
  }
  func.func @transform_16(%arg0: i32, %arg1: i32) -> (i32, i32, i32) {
    %c0_i32 = arith.constant 0 : i32
    %c0_i32_0 = arith.constant 0 : i32
    return %arg0, %arg1, %c0_i32 : i32, i32, i32
  }
}

module attributes {stable_mosaic.version = 11 : i64} {
  func.func @_encoder_layer_kernel(%arg0: i32, %arg1: i32, %arg2: memref<1x16x32xf32, #tpu.memory_space<vmem>>, %arg3: memref<1x1x16xi32, #tpu.memory_space<vmem>>, %arg4: memref<32x32xf32, #tpu.memory_space<vmem>>, %arg5: memref<1x32xf32, #tpu.memory_space<vmem>>, %arg6: memref<32x64xf32, #tpu.memory_space<vmem>>, %arg7: memref<1x64xf32, #tpu.memory_space<vmem>>, %arg8: memref<32x32xf32, #tpu.memory_space<vmem>>, %arg9: memref<1x32xf32, #tpu.memory_space<vmem>>, %arg10: memref<32x64xf32, #tpu.memory_space<vmem>>, %arg11: memref<1x64xf32, #tpu.memory_space<vmem>>, %arg12: memref<64x32xf32, #tpu.memory_space<vmem>>, %arg13: memref<1x32xf32, #tpu.memory_space<vmem>>, %arg14: memref<1x32xf32, #tpu.memory_space<vmem>>, %arg15: memref<1x32xf32, #tpu.memory_space<vmem>>, %arg16: memref<1x32xf32, #tpu.memory_space<vmem>>, %arg17: memref<1x32xf32, #tpu.memory_space<vmem>>, %arg18: memref<1x8x32xf32, #tpu.memory_space<vmem>>, %arg19: memref<16x64xf32, #tpu.memory_space<vmem>>) attributes {dimension_semantics = [#tpu.dimension_semantics<parallel>, #tpu.dimension_semantics<arbitrary>], iteration_bounds = array<i64: 2, 2>, scalar_prefetch = 0 : i64, scratch_operands = 1 : i64, tpu.core_type = #tpu.core_type<tc>, window_params = [{transform_indices = @transform_0, window_bounds = array<i64: 1, 16, 32>}, {transform_indices = @transform_1, window_bounds = array<i64: 1, 1, 16>}, {pipeline_mode = #tpu.pipeline_mode<synchronous>, transform_indices = @transform_2, window_bounds = array<i64: 32, 32>}, {pipeline_mode = #tpu.pipeline_mode<synchronous>, transform_indices = @transform_3, window_bounds = array<i64: 1, 32>}, {pipeline_mode = #tpu.pipeline_mode<synchronous>, transform_indices = @transform_4, window_bounds = array<i64: 32, 64>}, {pipeline_mode = #tpu.pipeline_mode<synchronous>, transform_indices = @transform_5, window_bounds = array<i64: 1, 64>}, {pipeline_mode = #tpu.pipeline_mode<synchronous>, transform_indices = @transform_6, window_bounds = array<i64: 32, 32>}, {pipeline_mode = #tpu.pipeline_mode<synchronous>, transform_indices = @transform_7, window_bounds = array<i64: 1, 32>}, {pipeline_mode = #tpu.pipeline_mode<synchronous>, transform_indices = @transform_8, window_bounds = array<i64: 32, 64>}, {pipeline_mode = #tpu.pipeline_mode<synchronous>, transform_indices = @transform_9, window_bounds = array<i64: 1, 64>}, {pipeline_mode = #tpu.pipeline_mode<synchronous>, transform_indices = @transform_10, window_bounds = array<i64: 64, 32>}, {pipeline_mode = #tpu.pipeline_mode<synchronous>, transform_indices = @transform_11, window_bounds = array<i64: 1, 32>}, {pipeline_mode = #tpu.pipeline_mode<synchronous>, transform_indices = @transform_12, window_bounds = array<i64: 1, 32>}, {pipeline_mode = #tpu.pipeline_mode<synchronous>, transform_indices = @transform_13, window_bounds = array<i64: 1, 32>}, {pipeline_mode = #tpu.pipeline_mode<synchronous>, transform_indices = @transform_14, window_bounds = array<i64: 1, 32>}, {pipeline_mode = #tpu.pipeline_mode<synchronous>, transform_indices = @transform_15, window_bounds = array<i64: 1, 32>}, {transform_indices = @transform_16, window_bounds = array<i64: 1, 8, 32>}]} {
    %c0_i32 = arith.constant 0 : i32
    %0 = arith.cmpi eq, %arg1, %c0_i32 : i32
    %1 = arith.extui %0 : i1 to i32
    %c0_i32_0 = arith.constant 0 : i32
    %2 = arith.cmpi ne, %1, %c0_i32_0 : i32
    scf.if %2 {
      %c0_70 = arith.constant 0 : index
      %c0_71 = arith.constant 0 : index
      %c0_72 = arith.constant 0 : index
      %169 = vector.load %arg2[%c0_70, %c0_71, %c0_72] : memref<1x16x32xf32, #tpu.memory_space<vmem>>, vector<1x16x32xf32>
      %170 = vector.shape_cast %169 : vector<1x16x32xf32> to vector<16x32xf32>
      %c0_73 = arith.constant 0 : index
      %c0_74 = arith.constant 0 : index
      %171 = vector.load %arg14[%c0_73, %c0_74] : memref<1x32xf32, #tpu.memory_space<vmem>>, vector<1x32xf32>
      %c0_75 = arith.constant 0 : index
      %c0_76 = arith.constant 0 : index
      %172 = vector.load %arg15[%c0_75, %c0_76] : memref<1x32xf32, #tpu.memory_space<vmem>>, vector<1x32xf32>
      %cst_77 = arith.constant dense<0.000000e+00> : vector<16xf32>
      %173 = vector.multi_reduction <add>, %170, %cst_77 [1] : vector<16x32xf32> to vector<16xf32>
      %174 = vector.shape_cast %173 : vector<16xf32> to vector<16x1xf32>
      %cst_78 = arith.constant 3.200000e+01 : f32
      %175 = vector.broadcast %cst_78 : f32 to vector<16x1xf32>
      %176 = arith.divf %174, %175 : vector<16x1xf32>
      %177 = vector.broadcast %176 : vector<16x1xf32> to vector<16x32xf32>
      %178 = arith.subf %170, %177 : vector<16x32xf32>
      %179 = arith.mulf %178, %178 : vector<16x32xf32>
      %cst_79 = arith.constant dense<0.000000e+00> : vector<16xf32>
      %180 = vector.multi_reduction <add>, %179, %cst_79 [1] : vector<16x32xf32> to vector<16xf32>
      %181 = vector.shape_cast %180 : vector<16xf32> to vector<16x1xf32>
      %cst_80 = arith.constant 3.200000e+01 : f32
      %182 = vector.broadcast %cst_80 : f32 to vector<16x1xf32>
      %183 = arith.divf %181, %182 : vector<16x1xf32>
      %184 = vector.broadcast %176 : vector<16x1xf32> to vector<16x32xf32>
      %185 = arith.subf %170, %184 : vector<16x32xf32>
      %cst_81 = arith.constant 9.99999974E-6 : f32
      %186 = vector.broadcast %cst_81 : f32 to vector<16x1xf32>
      %187 = arith.addf %183, %186 : vector<16x1xf32>
      %188 = math.rsqrt %187 : vector<16x1xf32>
      %189 = vector.broadcast %188 : vector<16x1xf32> to vector<16x32xf32>
      %190 = arith.mulf %185, %189 : vector<16x32xf32>
      %191 = vector.broadcast %171 : vector<1x32xf32> to vector<16x32xf32>
      %192 = arith.mulf %190, %191 : vector<16x32xf32>
      %193 = vector.broadcast %172 : vector<1x32xf32> to vector<16x32xf32>
      %194 = arith.addf %192, %193 : vector<16x32xf32>
      %c0_82 = arith.constant 0 : index
      %c0_83 = arith.constant 0 : index
      %195 = vector.load %arg6[%c0_82, %c0_83] : memref<32x64xf32, #tpu.memory_space<vmem>>, vector<32x64xf32>
      %cst_84 = arith.constant dense<0.000000e+00> : vector<16x64xf32>
      %196 = tpu.matmul %194, %195, %cst_84 {dimension_numbers = #tpu.dot_dimension_numbers<[1], [0], [0], [1], [0, 0, 1, 1], [], []>} : vector<16x32xf32>, vector<32x64xf32>, vector<16x64xf32> -> vector<16x64xf32>
      %c0_85 = arith.constant 0 : index
      %c0_86 = arith.constant 0 : index
      %197 = vector.load %arg7[%c0_85, %c0_86] : memref<1x64xf32, #tpu.memory_space<vmem>>, vector<1x64xf32>
      %198 = vector.broadcast %197 : vector<1x64xf32> to vector<16x64xf32>
      %199 = arith.addf %196, %198 : vector<16x64xf32>
      %c0_87 = arith.constant 0 : index
      %c0_88 = arith.constant 0 : index
      %200 = vector.load %arg19[%c0_87, %c0_88] : memref<16x64xf32, #tpu.memory_space<vmem>>, vector<16x64xf32>
      tpu.vector_store %arg19[%c0_87, %c0_88], %199 {strides = array<i32>} : memref<16x64xf32, #tpu.memory_space<vmem>>, vector<16x64xf32>,
    } else {
    }
    %c8_i32 = arith.constant 8 : i32
    %3 = arith.muli %arg1, %c8_i32 : i32
    %4 = tpu.assume_multiple %3, 8 : i32
    %c0 = arith.constant 0 : index
    %5 = arith.index_cast %4 : i32 to index
    %c0_1 = arith.constant 0 : index
    %6 = vector.load %arg2[%c0, %5, %c0_1] : memref<1x16x32xf32, #tpu.memory_space<vmem>>, vector<1x8x32xf32>
    %7 = vector.shape_cast %6 : vector<1x8x32xf32> to vector<8x32xf32>
    %c0_2 = arith.constant 0 : index
    %c0_3 = arith.constant 0 : index
    %c0_4 = arith.constant 0 : index
    %8 = vector.load %arg3[%c0_2, %c0_3, %c0_4] : memref<1x1x16xi32, #tpu.memory_space<vmem>>, vector<1x1x16xi32>
    %9 = vector.shape_cast %8 : vector<1x1x16xi32> to vector<1x16xi32>
    %c0_i32_5 = arith.constant 0 : i32
    %10 = vector.broadcast %c0_i32_5 : i32 to vector<1x16xi32>
    %11 = arith.cmpi sgt, %9, %10 : vector<1x16xi32>
    %c0_6 = arith.constant 0 : index
    %c0_7 = arith.constant 0 : index
    %12 = vector.load %arg19[%c0_6, %c0_7] : memref<16x64xf32, #tpu.memory_space<vmem>>, vector<16x64xf32>
    %13 = vector.extract_strided_slice %12 {offsets = [0, 0], sizes = [16, 32], strides = [1, 1]} : vector<16x64xf32> to vector<16x32xf32>
    %14 = vector.extract_strided_slice %12 {offsets = [0, 32], sizes = [16, 32], strides = [1, 1]} : vector<16x64xf32> to vector<16x32xf32>
    %c0_8 = arith.constant 0 : index
    %c0_9 = arith.constant 0 : index
    %15 = vector.load %arg14[%c0_8, %c0_9] : memref<1x32xf32, #tpu.memory_space<vmem>>, vector<1x32xf32>
    %c0_10 = arith.constant 0 : index
    %c0_11 = arith.constant 0 : index
    %16 = vector.load %arg15[%c0_10, %c0_11] : memref<1x32xf32, #tpu.memory_space<vmem>>, vector<1x32xf32>
    %cst = arith.constant dense<0.000000e+00> : vector<8xf32>
    %17 = vector.multi_reduction <add>, %7, %cst [1] : vector<8x32xf32> to vector<8xf32>
    %18 = vector.shape_cast %17 : vector<8xf32> to vector<8x1xf32>
    %cst_12 = arith.constant 3.200000e+01 : f32
    %19 = vector.broadcast %cst_12 : f32 to vector<8x1xf32>
    %20 = arith.divf %18, %19 : vector<8x1xf32>
    %21 = vector.broadcast %20 : vector<8x1xf32> to vector<8x32xf32>
    %22 = arith.subf %7, %21 : vector<8x32xf32>
    %23 = arith.mulf %22, %22 : vector<8x32xf32>
    %cst_13 = arith.constant dense<0.000000e+00> : vector<8xf32>
    %24 = vector.multi_reduction <add>, %23, %cst_13 [1] : vector<8x32xf32> to vector<8xf32>
    %25 = vector.shape_cast %24 : vector<8xf32> to vector<8x1xf32>
    %cst_14 = arith.constant 3.200000e+01 : f32
    %26 = vector.broadcast %cst_14 : f32 to vector<8x1xf32>
    %27 = arith.divf %25, %26 : vector<8x1xf32>
    %28 = vector.broadcast %20 : vector<8x1xf32> to vector<8x32xf32>
    %29 = arith.subf %7, %28 : vector<8x32xf32>
    %cst_15 = arith.constant 9.99999974E-6 : f32
    %30 = vector.broadcast %cst_15 : f32 to vector<8x1xf32>
    %31 = arith.addf %27, %30 : vector<8x1xf32>
    %32 = math.rsqrt %31 : vector<8x1xf32>
    %33 = vector.broadcast %32 : vector<8x1xf32> to vector<8x32xf32>
    %34 = arith.mulf %29, %33 : vector<8x32xf32>
    %35 = vector.broadcast %15 : vector<1x32xf32> to vector<8x32xf32>
    %36 = arith.mulf %34, %35 : vector<8x32xf32>
    %37 = vector.broadcast %16 : vector<1x32xf32> to vector<8x32xf32>
    %38 = arith.addf %36, %37 : vector<8x32xf32>
    %c0_16 = arith.constant 0 : index
    %c0_17 = arith.constant 0 : index
    %39 = vector.load %arg4[%c0_16, %c0_17] : memref<32x32xf32, #tpu.memory_space<vmem>>, vector<32x32xf32>
    %cst_18 = arith.constant dense<0.000000e+00> : vector<8x32xf32>
    %40 = tpu.matmul %38, %39, %cst_18 {dimension_numbers = #tpu.dot_dimension_numbers<[1], [0], [0], [1], [0, 0, 1, 1], [], []>} : vector<8x32xf32>, vector<32x32xf32>, vector<8x32xf32> -> vector<8x32xf32>
    %c0_19 = arith.constant 0 : index
    %c0_20 = arith.constant 0 : index
    %41 = vector.load %arg5[%c0_19, %c0_20] : memref<1x32xf32, #tpu.memory_space<vmem>>, vector<1x32xf32>
    %42 = vector.broadcast %41 : vector<1x32xf32> to vector<8x32xf32>
    %43 = arith.addf %40, %42 : vector<8x32xf32>
    %cst_21 = arith.constant 0.353553385 : f32
    %44 = vector.broadcast %cst_21 : f32 to vector<8x32xf32>
    %45 = arith.mulf %43, %44 : vector<8x32xf32>
    %46 = vector.extract_strided_slice %45 {offsets = [0, 0], sizes = [8, 8], strides = [1, 1]} : vector<8x32xf32> to vector<8x8xf32>
    %47 = vector.extract_strided_slice %13 {offsets = [0, 0], sizes = [16, 8], strides = [1, 1]} : vector<16x32xf32> to vector<16x8xf32>
    %cst_22 = arith.constant dense<0.000000e+00> : vector<8x16xf32>
    %48 = tpu.matmul %46, %47, %cst_22 {dimension_numbers = #tpu.dot_dimension_numbers<[1], [1], [0], [0], [0, 0, 1, 0], [], []>} : vector<8x8xf32>, vector<16x8xf32>, vector<8x16xf32> -> vector<8x16xf32>
    %cst_23 = arith.constant -1.000000e+09 : f32
    %49 = vector.shape_cast %11 : vector<1x16xi1> to vector<1x16xi1>
    %50 = vector.broadcast %49 : vector<1x16xi1> to vector<8x16xi1>
    %51 = vector.broadcast %cst_23 : f32 to vector<8x16xf32>
    %52 = arith.select %50, %51, %48 : vector<8x16xi1>, vector<8x16xf32>
    %cst_24 = arith.constant dense<0xFF800000> : vector<8xf32>
    %53 = vector.multi_reduction <maximumf>, %52, %cst_24 [1] : vector<8x16xf32> to vector<8xf32>
    %54 = vector.shape_cast %53 : vector<8xf32> to vector<8x1xf32>
    %55 = vector.broadcast %54 : vector<8x1xf32> to vector<8x16xf32>
    %56 = arith.subf %52, %55 : vector<8x16xf32>
    %57 = math.exp %56 : vector<8x16xf32>
    %cst_25 = arith.constant dense<0.000000e+00> : vector<8xf32>
    %58 = vector.multi_reduction <add>, %57, %cst_25 [1] : vector<8x16xf32> to vector<8xf32>
    %59 = vector.shape_cast %58 : vector<8xf32> to vector<8x1xf32>
    %60 = tpu.reciprocal %59 : vector<8x1xf32> -> vector<8x1xf32>
    %61 = vector.extract_strided_slice %14 {offsets = [0, 0], sizes = [16, 8], strides = [1, 1]} : vector<16x32xf32> to vector<16x8xf32>
    %cst_26 = arith.constant dense<0.000000e+00> : vector<8x8xf32>
    %62 = tpu.matmul %57, %61, %cst_26 {dimension_numbers = #tpu.dot_dimension_numbers<[1], [0], [0], [1], [0, 0, 1, 1], [], []>} : vector<8x16xf32>, vector<16x8xf32>, vector<8x8xf32> -> vector<8x8xf32>
    %63 = vector.broadcast %60 : vector<8x1xf32> to vector<8x8xf32>
    %64 = arith.mulf %62, %63 : vector<8x8xf32>
    %65 = vector.extract_strided_slice %45 {offsets = [0, 8], sizes = [8, 8], strides = [1, 1]} : vector<8x32xf32> to vector<8x8xf32>
    %66 = vector.extract_strided_slice %13 {offsets = [0, 8], sizes = [16, 8], strides = [1, 1]} : vector<16x32xf32> to vector<16x8xf32>
    %cst_27 = arith.constant dense<0.000000e+00> : vector<8x16xf32>
    %67 = tpu.matmul %65, %66, %cst_27 {dimension_numbers = #tpu.dot_dimension_numbers<[1], [1], [0], [0], [0, 0, 1, 0], [], []>} : vector<8x8xf32>, vector<16x8xf32>, vector<8x16xf32> -> vector<8x16xf32>
    %cst_28 = arith.constant -1.000000e+09 : f32
    %68 = vector.shape_cast %11 : vector<1x16xi1> to vector<1x16xi1>
    %69 = vector.broadcast %68 : vector<1x16xi1> to vector<8x16xi1>
    %70 = vector.broadcast %cst_28 : f32 to vector<8x16xf32>
    %71 = arith.select %69, %70, %67 : vector<8x16xi1>, vector<8x16xf32>
    %cst_29 = arith.constant dense<0xFF800000> : vector<8xf32>
    %72 = vector.multi_reduction <maximumf>, %71, %cst_29 [1] : vector<8x16xf32> to vector<8xf32>
    %73 = vector.shape_cast %72 : vector<8xf32> to vector<8x1xf32>
    %74 = vector.broadcast %73 : vector<8x1xf32> to vector<8x16xf32>
    %75 = arith.subf %71, %74 : vector<8x16xf32>
    %76 = math.exp %75 : vector<8x16xf32>
    %cst_30 = arith.constant dense<0.000000e+00> : vector<8xf32>
    %77 = vector.multi_reduction <add>, %76, %cst_30 [1] : vector<8x16xf32> to vector<8xf32>
    %78 = vector.shape_cast %77 : vector<8xf32> to vector<8x1xf32>
    %79 = tpu.reciprocal %78 : vector<8x1xf32> -> vector<8x1xf32>
    %80 = vector.extract_strided_slice %14 {offsets = [0, 8], sizes = [16, 8], strides = [1, 1]} : vector<16x32xf32> to vector<16x8xf32>
    %cst_31 = arith.constant dense<0.000000e+00> : vector<8x8xf32>
    %81 = tpu.matmul %76, %80, %cst_31 {dimension_numbers = #tpu.dot_dimension_numbers<[1], [0], [0], [1], [0, 0, 1, 1], [], []>} : vector<8x16xf32>, vector<16x8xf32>, vector<8x8xf32> -> vector<8x8xf32>
    %82 = vector.broadcast %79 : vector<8x1xf32> to vector<8x8xf32>
    %83 = arith.mulf %81, %82 : vector<8x8xf32>
    %84 = vector.extract_strided_slice %45 {offsets = [0, 16], sizes = [8, 8], strides = [1, 1]} : vector<8x32xf32> to vector<8x8xf32>
    %85 = vector.extract_strided_slice %13 {offsets = [0, 16], sizes = [16, 8], strides = [1, 1]} : vector<16x32xf32> to vector<16x8xf32>
    %cst_32 = arith.constant dense<0.000000e+00> : vector<8x16xf32>
    %86 = tpu.matmul %84, %85, %cst_32 {dimension_numbers = #tpu.dot_dimension_numbers<[1], [1], [0], [0], [0, 0, 1, 0], [], []>} : vector<8x8xf32>, vector<16x8xf32>, vector<8x16xf32> -> vector<8x16xf32>
    %cst_33 = arith.constant -1.000000e+09 : f32
    %87 = vector.shape_cast %11 : vector<1x16xi1> to vector<1x16xi1>
    %88 = vector.broadcast %87 : vector<1x16xi1> to vector<8x16xi1>
    %89 = vector.broadcast %cst_33 : f32 to vector<8x16xf32>
    %90 = arith.select %88, %89, %86 : vector<8x16xi1>, vector<8x16xf32>
    %cst_34 = arith.constant dense<0xFF800000> : vector<8xf32>
    %91 = vector.multi_reduction <maximumf>, %90, %cst_34 [1] : vector<8x16xf32> to vector<8xf32>
    %92 = vector.shape_cast %91 : vector<8xf32> to vector<8x1xf32>
    %93 = vector.broadcast %92 : vector<8x1xf32> to vector<8x16xf32>
    %94 = arith.subf %90, %93 : vector<8x16xf32>
    %95 = math.exp %94 : vector<8x16xf32>
    %cst_35 = arith.constant dense<0.000000e+00> : vector<8xf32>
    %96 = vector.multi_reduction <add>, %95, %cst_35 [1] : vector<8x16xf32> to vector<8xf32>
    %97 = vector.shape_cast %96 : vector<8xf32> to vector<8x1xf32>
    %98 = tpu.reciprocal %97 : vector<8x1xf32> -> vector<8x1xf32>
    %99 = vector.extract_strided_slice %14 {offsets = [0, 16], sizes = [16, 8], strides = [1, 1]} : vector<16x32xf32> to vector<16x8xf32>
    %cst_36 = arith.constant dense<0.000000e+00> : vector<8x8xf32>
    %100 = tpu.matmul %95, %99, %cst_36 {dimension_numbers = #tpu.dot_dimension_numbers<[1], [0], [0], [1], [0, 0, 1, 1], [], []>} : vector<8x16xf32>, vector<16x8xf32>, vector<8x8xf32> -> vector<8x8xf32>
    %101 = vector.broadcast %98 : vector<8x1xf32> to vector<8x8xf32>
    %102 = arith.mulf %100, %101 : vector<8x8xf32>
    %103 = vector.extract_strided_slice %45 {offsets = [0, 24], sizes = [8, 8], strides = [1, 1]} : vector<8x32xf32> to vector<8x8xf32>
    %104 = vector.extract_strided_slice %13 {offsets = [0, 24], sizes = [16, 8], strides = [1, 1]} : vector<16x32xf32> to vector<16x8xf32>
    %cst_37 = arith.constant dense<0.000000e+00> : vector<8x16xf32>
    %105 = tpu.matmul %103, %104, %cst_37 {dimension_numbers = #tpu.dot_dimension_numbers<[1], [1], [0], [0], [0, 0, 1, 0], [], []>} : vector<8x8xf32>, vector<16x8xf32>, vector<8x16xf32> -> vector<8x16xf32>
    %cst_38 = arith.constant -1.000000e+09 : f32
    %106 = vector.shape_cast %11 : vector<1x16xi1> to vector<1x16xi1>
    %107 = vector.broadcast %106 : vector<1x16xi1> to vector<8x16xi1>
    %108 = vector.broadcast %cst_38 : f32 to vector<8x16xf32>
    %109 = arith.select %107, %108, %105 : vector<8x16xi1>, vector<8x16xf32>
    %cst_39 = arith.constant dense<0xFF800000> : vector<8xf32>
    %110 = vector.multi_reduction <maximumf>, %109, %cst_39 [1] : vector<8x16xf32> to vector<8xf32>
    %111 = vector.shape_cast %110 : vector<8xf32> to vector<8x1xf32>
    %112 = vector.broadcast %111 : vector<8x1xf32> to vector<8x16xf32>
    %113 = arith.subf %109, %112 : vector<8x16xf32>
    %114 = math.exp %113 : vector<8x16xf32>
    %cst_40 = arith.constant dense<0.000000e+00> : vector<8xf32>
    %115 = vector.multi_reduction <add>, %114, %cst_40 [1] : vector<8x16xf32> to vector<8xf32>
    %116 = vector.shape_cast %115 : vector<8xf32> to vector<8x1xf32>
    %117 = tpu.reciprocal %116 : vector<8x1xf32> -> vector<8x1xf32>
    %118 = vector.extract_strided_slice %14 {offsets = [0, 24], sizes = [16, 8], strides = [1, 1]} : vector<16x32xf32> to vector<16x8xf32>
    %cst_41 = arith.constant dense<0.000000e+00> : vector<8x8xf32>
    %119 = tpu.matmul %114, %118, %cst_41 {dimension_numbers = #tpu.dot_dimension_numbers<[1], [0], [0], [1], [0, 0, 1, 1], [], []>} : vector<8x16xf32>, vector<16x8xf32>, vector<8x8xf32> -> vector<8x8xf32>
    %120 = vector.broadcast %117 : vector<8x1xf32> to vector<8x8xf32>
    %121 = arith.mulf %119, %120 : vector<8x8xf32>
    %122 = tpu.concatenate %64, %83, %102, %121 in 1 : vector<8x8xf32>, vector<8x8xf32>, vector<8x8xf32>, vector<8x8xf32> -> vector<8x32xf32>
    %c0_42 = arith.constant 0 : index
    %c0_43 = arith.constant 0 : index
    %123 = vector.load %arg8[%c0_42, %c0_43] : memref<32x32xf32, #tpu.memory_space<vmem>>, vector<32x32xf32>
    %cst_44 = arith.constant dense<0.000000e+00> : vector<8x32xf32>
    %124 = tpu.matmul %122, %123, %cst_44 {dimension_numbers = #tpu.dot_dimension_numbers<[1], [0], [0], [1], [0, 0, 1, 1], [], []>} : vector<8x32xf32>, vector<32x32xf32>, vector<8x32xf32> -> vector<8x32xf32>
    %c0_45 = arith.constant 0 : index
    %c0_46 = arith.constant 0 : index
    %125 = vector.load %arg9[%c0_45, %c0_46] : memref<1x32xf32, #tpu.memory_space<vmem>>, vector<1x32xf32>
    %126 = vector.broadcast %125 : vector<1x32xf32> to vector<8x32xf32>
    %127 = arith.addf %124, %126 : vector<8x32xf32>
    %128 = arith.addf %7, %127 : vector<8x32xf32>
    %c0_47 = arith.constant 0 : index
    %c0_48 = arith.constant 0 : index
    %129 = vector.load %arg16[%c0_47, %c0_48] : memref<1x32xf32, #tpu.memory_space<vmem>>, vector<1x32xf32>
    %c0_49 = arith.constant 0 : index
    %c0_50 = arith.constant 0 : index
    %130 = vector.load %arg17[%c0_49, %c0_50] : memref<1x32xf32, #tpu.memory_space<vmem>>, vector<1x32xf32>
    %cst_51 = arith.constant dense<0.000000e+00> : vector<8xf32>
    %131 = vector.multi_reduction <add>, %128, %cst_51 [1] : vector<8x32xf32> to vector<8xf32>
    %132 = vector.shape_cast %131 : vector<8xf32> to vector<8x1xf32>
    %cst_52 = arith.constant 3.200000e+01 : f32
    %133 = vector.broadcast %cst_52 : f32 to vector<8x1xf32>
    %134 = arith.divf %132, %133 : vector<8x1xf32>
    %135 = vector.broadcast %134 : vector<8x1xf32> to vector<8x32xf32>
    %136 = arith.subf %128, %135 : vector<8x32xf32>
    %137 = arith.mulf %136, %136 : vector<8x32xf32>
    %cst_53 = arith.constant dense<0.000000e+00> : vector<8xf32>
    %138 = vector.multi_reduction <add>, %137, %cst_53 [1] : vector<8x32xf32> to vector<8xf32>
    %139 = vector.shape_cast %138 : vector<8xf32> to vector<8x1xf32>
    %cst_54 = arith.constant 3.200000e+01 : f32
    %140 = vector.broadcast %cst_54 : f32 to vector<8x1xf32>
    %141 = arith.divf %139, %140 : vector<8x1xf32>
    %142 = vector.broadcast %134 : vector<8x1xf32> to vector<8x32xf32>
    %143 = arith.subf %128, %142 : vector<8x32xf32>
    %cst_55 = arith.constant 9.99999974E-6 : f32
    %144 = vector.broadcast %cst_55 : f32 to vector<8x1xf32>
    %145 = arith.addf %141, %144 : vector<8x1xf32>
    %146 = math.rsqrt %145 : vector<8x1xf32>
    %147 = vector.broadcast %146 : vector<8x1xf32> to vector<8x32xf32>
    %148 = arith.mulf %143, %147 : vector<8x32xf32>
    %149 = vector.broadcast %129 : vector<1x32xf32> to vector<8x32xf32>
    %150 = arith.mulf %148, %149 : vector<8x32xf32>
    %151 = vector.broadcast %130 : vector<1x32xf32> to vector<8x32xf32>
    %152 = arith.addf %150, %151 : vector<8x32xf32>
    %c0_56 = arith.constant 0 : index
    %c0_57 = arith.constant 0 : index
    %153 = vector.load %arg10[%c0_56, %c0_57] : memref<32x64xf32, #tpu.memory_space<vmem>>, vector<32x64xf32>
    %cst_58 = arith.constant dense<0.000000e+00> : vector<8x64xf32>
    %154 = tpu.matmul %152, %153, %cst_58 {dimension_numbers = #tpu.dot_dimension_numbers<[1], [0], [0], [1], [0, 0, 1, 1], [], []>} : vector<8x32xf32>, vector<32x64xf32>, vector<8x64xf32> -> vector<8x64xf32>
    %c0_59 = arith.constant 0 : index
    %c0_60 = arith.constant 0 : index
    %155 = vector.load %arg11[%c0_59, %c0_60] : memref<1x64xf32, #tpu.memory_space<vmem>>, vector<1x64xf32>
    %156 = vector.broadcast %155 : vector<1x64xf32> to vector<8x64xf32>
    %157 = arith.addf %154, %156 : vector<8x64xf32>
    %cst_61 = arith.constant 0.000000e+00 : f32
    %158 = vector.broadcast %cst_61 : f32 to vector<8x64xf32>
    %159 = arith.maximumf %157, %158 : vector<8x64xf32>
    %c0_62 = arith.constant 0 : index
    %c0_63 = arith.constant 0 : index
    %160 = vector.load %arg12[%c0_62, %c0_63] : memref<64x32xf32, #tpu.memory_space<vmem>>, vector<64x32xf32>
    %cst_64 = arith.constant dense<0.000000e+00> : vector<8x32xf32>
    %161 = tpu.matmul %159, %160, %cst_64 {dimension_numbers = #tpu.dot_dimension_numbers<[1], [0], [0], [1], [0, 0, 1, 1], [], []>} : vector<8x64xf32>, vector<64x32xf32>, vector<8x32xf32> -> vector<8x32xf32>
    %c0_65 = arith.constant 0 : index
    %c0_66 = arith.constant 0 : index
    %162 = vector.load %arg13[%c0_65, %c0_66] : memref<1x32xf32, #tpu.memory_space<vmem>>, vector<1x32xf32>
    %163 = vector.broadcast %162 : vector<1x32xf32> to vector<8x32xf32>
    %164 = arith.addf %161, %163 : vector<8x32xf32>
    %165 = arith.addf %128, %164 : vector<8x32xf32>
    %c0_67 = arith.constant 0 : index
    %c0_68 = arith.constant 0 : index
    %c0_69 = arith.constant 0 : index
    %166 = vector.load %arg18[%c0_67, %c0_68, %c0_69] : memref<1x8x32xf32, #tpu.memory_space<vmem>>, vector<1x8x32xf32>
    %167 = vector.shape_cast %166 : vector<1x8x32xf32> to vector<8x32xf32>
    %168 = vector.shape_cast %165 : vector<8x32xf32> to vector<1x8x32xf32>
    tpu.vector_store %arg18[%c0_67, %c0_68, %c0_69], %168 {strides = array<i32>} : memref<1x8x32xf32, #tpu.memory_space<vmem>>, vector<1x8x32xf32>,
    return
  }
  func.func @transform_0(%arg0: i32, %arg1: i32) -> (i32, i32, i32) {
    %c0_i32 = arith.constant 0 : i32
    %c0_i32_0 = arith.constant 0 : i32
    %c0_i32_1 = arith.constant 0 : i32
    return %arg0, %c0_i32, %c0_i32_0 : i32, i32, i32
  }
  func.func @transform_1(%arg0: i32, %arg1: i32) -> (i32, i32, i32) {
    %c0_i32 = arith.constant 0 : i32
    %c0_i32_0 = arith.constant 0 : i32
    %c0_i32_1 = arith.constant 0 : i32
    return %arg0, %c0_i32, %c0_i32_0 : i32, i32, i32
  }
  func.func @transform_2(%arg0: i32, %arg1: i32) -> (i32, i32) {
    %c0_i32 = arith.constant 0 : i32
    %c0_i32_0 = arith.constant 0 : i32
    %c0_i32_1 = arith.constant 0 : i32
    return %c0_i32, %c0_i32_0 : i32, i32
  }
  func.func @transform_3(%arg0: i32, %arg1: i32) -> (i32, i32) {
    %c0_i32 = arith.constant 0 : i32
    %c0_i32_0 = arith.constant 0 : i32
    %c0_i32_1 = arith.constant 0 : i32
    return %c0_i32, %c0_i32_0 : i32, i32
  }
  func.func @transform_4(%arg0: i32, %arg1: i32) -> (i32, i32) {
    %c0_i32 = arith.constant 0 : i32
    %c0_i32_0 = arith.constant 0 : i32
    %c0_i32_1 = arith.constant 0 : i32
    return %c0_i32, %c0_i32_0 : i32, i32
  }
  func.func @transform_5(%arg0: i32, %arg1: i32) -> (i32, i32) {
    %c0_i32 = arith.constant 0 : i32
    %c0_i32_0 = arith.constant 0 : i32
    %c0_i32_1 = arith.constant 0 : i32
    return %c0_i32, %c0_i32_0 : i32, i32
  }
  func.func @transform_6(%arg0: i32, %arg1: i32) -> (i32, i32) {
    %c0_i32 = arith.constant 0 : i32
    %c0_i32_0 = arith.constant 0 : i32
    %c0_i32_1 = arith.constant 0 : i32
    return %c0_i32, %c0_i32_0 : i32, i32
  }
  func.func @transform_7(%arg0: i32, %arg1: i32) -> (i32, i32) {
    %c0_i32 = arith.constant 0 : i32
    %c0_i32_0 = arith.constant 0 : i32
    %c0_i32_1 = arith.constant 0 : i32
    return %c0_i32, %c0_i32_0 : i32, i32
  }
  func.func @transform_8(%arg0: i32, %arg1: i32) -> (i32, i32) {
    %c0_i32 = arith.constant 0 : i32
    %c0_i32_0 = arith.constant 0 : i32
    %c0_i32_1 = arith.constant 0 : i32
    return %c0_i32, %c0_i32_0 : i32, i32
  }
  func.func @transform_9(%arg0: i32, %arg1: i32) -> (i32, i32) {
    %c0_i32 = arith.constant 0 : i32
    %c0_i32_0 = arith.constant 0 : i32
    %c0_i32_1 = arith.constant 0 : i32
    return %c0_i32, %c0_i32_0 : i32, i32
  }
  func.func @transform_10(%arg0: i32, %arg1: i32) -> (i32, i32) {
    %c0_i32 = arith.constant 0 : i32
    %c0_i32_0 = arith.constant 0 : i32
    %c0_i32_1 = arith.constant 0 : i32
    return %c0_i32, %c0_i32_0 : i32, i32
  }
  func.func @transform_11(%arg0: i32, %arg1: i32) -> (i32, i32) {
    %c0_i32 = arith.constant 0 : i32
    %c0_i32_0 = arith.constant 0 : i32
    %c0_i32_1 = arith.constant 0 : i32
    return %c0_i32, %c0_i32_0 : i32, i32
  }
  func.func @transform_12(%arg0: i32, %arg1: i32) -> (i32, i32) {
    %c0_i32 = arith.constant 0 : i32
    %c0_i32_0 = arith.constant 0 : i32
    %c0_i32_1 = arith.constant 0 : i32
    return %c0_i32, %c0_i32_0 : i32, i32
  }
  func.func @transform_13(%arg0: i32, %arg1: i32) -> (i32, i32) {
    %c0_i32 = arith.constant 0 : i32
    %c0_i32_0 = arith.constant 0 : i32
    %c0_i32_1 = arith.constant 0 : i32
    return %c0_i32, %c0_i32_0 : i32, i32
  }
  func.func @transform_14(%arg0: i32, %arg1: i32) -> (i32, i32) {
    %c0_i32 = arith.constant 0 : i32
    %c0_i32_0 = arith.constant 0 : i32
    %c0_i32_1 = arith.constant 0 : i32
    return %c0_i32, %c0_i32_0 : i32, i32
  }
  func.func @transform_15(%arg0: i32, %arg1: i32) -> (i32, i32) {
    %c0_i32 = arith.constant 0 : i32
    %c0_i32_0 = arith.constant 0 : i32
    %c0_i32_1 = arith.constant 0 : i32
    return %c0_i32, %c0_i32_0 : i32, i32
  }
  func.func @transform_16(%arg0: i32, %arg1: i32) -> (i32, i32, i32) {
    %c0_i32 = arith.constant 0 : i32
    %c0_i32_0 = arith.constant 0 : i32
    return %arg0, %arg1, %c0_i32 : i32, i32, i32
  }
}

</mosaic_0001>

<bundles_post_ra>
// kernel: tpu_custom_call.1
= control target key start
LH: loop header
LB: loop body
LE: loop exit
PB: predicated region body
PF: predicated region fallthrough
CT: control target
= control target key end

     0   :  { %s3224_s0 = inlined_call_operand.vmem [shape: f32[2,16,32], index: 0, kind: input, shape index: {}]   ;;  %s3225_s1 = inlined_call_operand.vmem [shape: s32[2,1,16], index: 1, kind: input, shape index: {}]   ;;  %s3226_s2 = inlined_call_operand.vmem [shape: f32[32,32], index: 2, kind: input, shape index: {}]   ;;  %s3227_s3 = inlined_call_operand.vmem [shape: f32[1,32], index: 3, kind: input, shape index: {}]   ;;  %s3228_s4 = inlined_call_operand.vmem [shape: f32[32,64], index: 4, kind: input, shape index: {}]   ;;  %s3229_s5 = inlined_call_operand.vmem [shape: f32[1,64], index: 5, kind: input, shape index: {}]   ;;  %s3230_s6 = inlined_call_operand.hbm [shape: f32[32,32], index: 6, kind: input, shape index: {}]   ;;  %s3231_s7 = inlined_call_operand.vmem [shape: f32[1,32], index: 7, kind: input, shape index: {}]   ;;  %s3232_s8 = inlined_call_operand.hbm [shape: f32[32,64], index: 8, kind: input, shape index: {}]   ;;  %s3233_s9 = inlined_call_operand.hbm [shape: f32[1,64], index: 9, kind: input, shape index: {}]   ;;  %s3234_s10 = inlined_call_operand.vmem [shape: f32[64,32], index: 10, kind: input, shape index: {}]   ;;  %s3235_s11 = inlined_call_operand.vmem [shape: f32[1,32], index: 11, kind: input, shape index: {}]   ;;  %s3236_s12 = inlined_call_operand.vmem [shape: f32[1,32], index: 12, kind: input, shape index: {}]   ;;  %s3237_s13 = inlined_call_operand.vmem [shape: f32[1,32], index: 13, kind: input, shape index: {}]   ;;  %s3238_s14 = inlined_call_operand.vmem [shape: f32[1,32], index: 14, kind: input, shape index: {}]   ;;  %s3239_s15 = inlined_call_operand.vmem [shape: f32[1,32], index: 15, kind: input, shape index: {}]   ;;  %s3240_s16 = inlined_call_operand.hbm [shape: f32[2,16,32], index: 16, kind: output, shape index: {}]  }
   0x1   :  { %3258 = sst [smem:[#allocation23_spill]] %s3224_s0 }
   0x2   :  { %3259 = sst [smem:[#allocation24_spill]] %s3231_s7 }
   0x3   :  { %3260 = sst [smem:[#allocation25_spill]] %s3234_s10 }
   0x4   :  { %3261 = sst [smem:[#allocation26_spill]] %s3235_s11 }
   0x5   :  { %3262 = sst [smem:[#allocation27_spill]] %s3238_s14 }
   0x6   :  { %3263 = sst [smem:[#allocation28_spill]] %s3239_s15 }
   0x7   :  { %3264 = sst [smem:[#allocation29_spill]] %s3240_s16 }
   0x8   :  { %21 = vsyncpa [#allocation4], 0 }
   0x9   :  { %22 = vsyncpa [#allocation7], 0 }
   0xa   :  { %23 = vsyncpa [#allocation5], 0 }
   0xb   :  { %25 = vsyncpa [#allocation5 + $0x1], 0  ;;  %s2757_s21 = smov 0   ;;  %s2759_s22 = smov 0  }
   0xc   :  { %s2761_s23 = smov 0   ;;  %s2763_s24 = smov 0  }
   0xd   :  { %s2765_s25 = smov 0   ;;  %s2767_s26 = smov 0  }
   0xe   :  { %s2769_s27 = smov 0   ;;  %s2771_s28 = smov 0  }
   0xf LB: > { %3265 = sst [smem:[#allocation13_spill]] %s2622_s21  ;;  %s1993_s29 = sadd.s32 4294967295, %s2650_s28   ;;  %s2650_s28 = sphi %s2771_s28, %s31_s28   ;;  %s2646_s27 = sphi %s2769_s27, %s3303_s27   ;;  %s2642_s26 = sphi %s2767_s26, %s3302_s26   ;;  %s2638_s25 = sphi %s2765_s25, %s3301_s25   ;;  %s2634_s24 = sphi %s2763_s24, %s3300_s24   ;;  %s2630_s23 = sphi %s2761_s23, %s3299_s23   ;;  %s2626_s22 = sphi %s2759_s22, %s3305_s22   ;;  %s2622_s21 = sphi %s2757_s21, %s3304_s21  }
  0x10   : > { %3266 = sst [smem:[#allocation14_spill]] %s2630_s23  ;;  %s1994_s30 = sadd.s32 4294967294, %s2650_s28  }
  0x11   : > { %3267 = sst [smem:[#allocation15_spill]] %s2642_s26  ;;  %s40_s0 = sadd.s32 1, %s2642_s26 }
  0x12   : > { %3268 = sst [smem:[#allocation16_spill]] %s2646_s27  ;;  %s43_s17 = sadd.s32 1, %s2646_s27 }
  0x13   : > { %3269 = sst [smem:[#allocation17_spill]] %s2650_s28  ;;  %p41_p0 = scmp.ge.s32.totalorder %s40_s0, 2 }
  0x14   : > { %s398_s18 = sadd.s32 1, %s2630_s23  ;;  %p408_p1 = scmp.ne.s32.totalorder %s2630_s23, %s2626_s22 }
  0x15   : > { %p409_p2 = scmp.eq.s32.totalorder %s1993_s29, 3  ;;  %s3307_s0 = smov (%p41_p0, %s40_s0), 0 }
  0x16   : > { %3270 = sst [smem:[#allocation18_spill]] %s3307_s0  ;;  %s3309_s17 = smov (!%p41_p0, %s43_s17), %s2646_s27 }
  0x17   : > { %s394_s19 = ssub.s32 %s2642_s26, %s3307_s0  ;;  %p2809_p3 = por %p409_p2, %p408_p1 }
  0x18   : > { %p45_p4 = scmp.ge.s32.totalorder %s3309_s17, 2  ;;  %p414_p5 = scmp.ne.s32.totalorder %s2626_s22, %s2622_s21 }
  0x19   : > { %s3271_s20 = scalar_select %p2809_p3, 1, 0 }
  0x1a   : > { %p415_p6 = scmp.eq.s32.totalorder %s1994_s30, 3  ;;  %p1995_p7 = scmp.ge.s32.totalorder %s2650_s28, 1 }
  0x1b   : > { %3272 = sst [smem:[#allocation19_spill]] %s3271_s20  ;;  %s3311_s17 = smov (%p45_p4, %s3309_s17), 0 }
  0x1c   : > { %3273 = sst [smem:[#allocation20_spill]] %s3311_s17  ;;  %p2818_p8 = por %p415_p6, %p414_p5 }
  0x1d   : > { %p422_p9 = scmp.lt.s32.totalorder %s2650_s28, 5  ;;  %s393_s11 = ssub.s32 %s2646_s27, %s3311_s17 }
  0x1e   : > { %s3274_s16 = scalar_select %p2818_p8, 1, 0 }
  0x1f   : > { %s395_s15 = sor.u32 %s394_s19, %s393_s11  ;;  %p2825_p10 = pnand %p1995_p7, %p422_p9 }
  0x20   : > { %3275 = sst [smem:[#allocation21_spill]] %s3274_s16  ;;  %p396_p11 = scmp.eq.s32.totalorder %s395_s15, 0 }
  0x21   : > { %s3276_s0 = scalar_select %p2825_p10, 1, 0 }
  0x22   : > { %p2829_p12 = scmp.eq.s32.totalorder %s1993_s29, 0  ;;  %p2301_p13 = pneg %p2825_p10 }
  0x23   : > { %s2836_s30 = scalar_select %p396_p11, %s2630_s23, %s398_s18  }
  0x24   : > { %s3277_s26 = scalar_select %p2829_p12, 1, 0 }
  0x25   : > { %3278 = sst [smem:[#allocation22_spill]] %s2836_s30  ;;  %p2840_p0 = pnand %p2829_p12, %p2301_p13 }
  0x26   : > { %s2652_s11 = smov [#allocation6]   ;;  %s2464_s29 = scalar_lea.hbm %s3232_s8, 512 }
  0x27   : > { %s462_s19 = sshll.u32 %s2652_s11, 4  ;;  %p2465_p1 = scmp.ne.s32.totalorder %s3232_s8, %s2464_s29  ;;  %s463_s19 = int_to_ptr.vmem [resolvable:$true] %s462_s19 }
  0x28   : > { %p2852_p2 = pneg %p2840_p0  ;;  %p2471_p6 = scmp.lt.u32.totalorder %s2464_s29, %s3232_s8 }
  0x2a   : > { %p2467_p4 = pnand %p2852_p2, %p2465_p1 }
  0x2c   : > { %p2468_p5 = pneg %p2467_p4 }
  0x2e   : > { %p2473_p7 = pnand %p2471_p6, %p2468_p5 }
  0x30   : > { %2476 = shalt.err (!%p2473_p7)
}
  0x31   : > { %s2477_s17 = scalar_lea.vmem %s463_s19, 512  ;;  %p2485_p8 = scmp.lt.s32.totalorder %s463_s19, %s463_s19 }
  0x32   : > { %p2478_p9 = scmp.ne.s32.totalorder %s463_s19, %s2477_s17  ;;  %p2486_p3 = scmp.lt.s32.totalorder %s2477_s17, %s2477_s17 }
  0x34   : > { %p2480_p11 = pnand %p2478_p9, %p2852_p2  ;;  %p2487_p12 = por %p2486_p3, %p2485_p8 }
  0x36   : > { %p2481_p13 = pneg %p2480_p11 }
  0x38   : > { %p2488_p10 = pnand %p2487_p12, %p2481_p13 }
  0x3a   : > { %2491 = shalt.err (!%p2488_p10)
}
  0x3b   : > { %s2653_s21 = smov 128   ;;  %s2654_s27 = smov 8  }
  0x3c   : > { %2307 = dma.hbm_to_vmem [thread:$0]  (!%p2840_p0), %s3232_s8, 512, %s463_s19, [#allocation7], %s2653_s21, %s2653_s21, %s2654_s27  }
  0x3d   : > { %s2655_s29 = smov [#allocation3]   ;;  %s2656_s23 = smov [#allocation8]  }
  0x3e   : > { %s446_s11 = sshll.u32 %s2655_s29, 4  ;;  %s476_s28 = sshll.u32 %s2656_s23, 4  ;;  %s447_s11 = int_to_ptr.vmem [resolvable:$true] %s446_s11  ;;  %s2868_s28 = int_to_ptr.vmem [resolvable:$true] %s476_s28 }
  0x3f   : > { %s2492_s14 = scalar_lea.hbm %s3230_s6, 512 }
  0x40   : > { %p2493_p3 = scmp.ne.s32.totalorder %s3230_s6, %s2492_s14  ;;  %p2499_p12 = scmp.lt.u32.totalorder %s2492_s14, %s3230_s6 }
  0x42   : > { %p2495_p8 = pnand %p2493_p3, %p2852_p2 }
  0x44   : > { %p2496_p10 = pneg %p2495_p8 }
  0x46   : > { %p2501_p1 = pnand %p2499_p12, %p2496_p10 }
  0x48   : > { %2504 = shalt.err (!%p2501_p1)
}
  0x49   : > { %s2505_s23 = scalar_lea.vmem %s447_s11, 512  ;;  %p2513_p7 = scmp.lt.s32.totalorder %s447_s11, %s447_s11 }
  0x4a   : > { %p2506_p4 = scmp.ne.s32.totalorder %s447_s11, %s2505_s23  ;;  %p2514_p9 = scmp.lt.s32.totalorder %s2505_s23, %s2505_s23 }
  0x4c   : > { %p2508_p5 = pnand %p2506_p4, %p2852_p2  ;;  %p2515_p11 = por %p2514_p9, %p2513_p7 }
  0x4e   : > { %p2509_p6 = pneg %p2508_p5 }
  0x50   : > { %p2516_p13 = pnand %p2515_p11, %p2509_p6 }
  0x52   : > { %2519 = shalt.err (!%p2516_p13)
}
  0x53   : > { %2304 = dma.hbm_to_vmem [thread:$0]  (!%p2840_p0), %s3230_s6, 512, %s447_s11, [#allocation4], %s2653_s21, %s2653_s21, %s2654_s27  }
  0x54   : > { %s2520_s15 = scalar_lea.hbm %s3233_s9, 16 }
  0x55   : > { %p2521_p3 = scmp.ne.s32.totalorder %s3233_s9, %s2520_s15  ;;  %p2527_p12 = scmp.lt.u32.totalorder %s2520_s15, %s3233_s9 }
  0x57   : > { %p2523_p8 = pnand %p2521_p3, %p2852_p2 }
  0x59   : > { %p2524_p10 = pneg %p2523_p8 }
  0x5b   : > { %p2529_p1 = pnand %p2527_p12, %p2524_p10 }
  0x5d   : > { %2532 = shalt.err (!%p2529_p1)
}
  0x5e   : > { %s2533_s21 = scalar_lea.vmem %s2868_s28, 16  ;;  %s2540_s27 = scalar_lea.vmem %s2868_s28, 32 }
  0x5f   : > { %p2534_p4 = scmp.ne.s32.totalorder %s2868_s28, %s2533_s21  ;;  %p2541_p7 = scmp.lt.s32.totalorder %s2868_s28, %s2868_s28 }
  0x60   : > { %p2542_p9 = scmp.lt.s32.totalorder %s2540_s27, %s2533_s21 }
  0x61   : > { %p2536_p5 = pnand %p2534_p4, %p2852_p2 }
  0x62   : > { %p2543_p11 = por %p2542_p9, %p2541_p7 }
  0x63   : > { %p2537_p6 = pneg %p2536_p5 }
  0x65   : > { %p2544_p13 = pnand %p2543_p11, %p2537_p6 }
  0x67   : > { %2547 = shalt.err (!%p2544_p13)
}
  0x68   : > { %2310 = dma.hbm_to_vmem [thread:$0]  (!%p2840_p0), %s3233_s9, 16, %s2868_s28, [#allocation7]  }
  0x69   : > { %p3281_p3 = scmp.ne.s32.totalorder %s3276_s0, 0 }
  0x6a   : > { %p3282_p2 = scmp.ne.s32.totalorder (!%p3281_p3), %s3277_s26, 0 }
  0x6b   : > { %521 = sbr.rel (%p3281_p3) target bundleno = 3740 (0xe9c), region = 84 }
  0x72   : > { %2609 = dma.done.wait (%p3282_p2), [#allocation4], 512  }
  0x73   : > { %2611 = vsyncadd (%p3282_p2), [#allocation4], 4294966784 }
  0x74   : > { %2613 = dma.done.wait (%p3282_p2), [#allocation7], 528  }
  0x75   : > { %2615 = vsyncadd (%p3282_p2), [#allocation7], 4294966768  ;;  %s579_s16 = sand.u32 1, %s2626_s22   ;;  %p582_p0 = scmp.lt.s32.totalorder %s2638_s25, 1 }
  0x76   : > { %s2926_s28 = sshll.u32 %s579_s16, 3  ;;  %s3283_s15 = sld [smem:[#allocation23_spill]] }
  0x77   : > { %s2929_s0 = scalar_select %p582_p0, %s2638_s25, 1 }
  0x78   : > { %s581_s17 = scalar_lea.vmem [#allocation9], %s2926_s28  ;;  %p2007_p8 = scmp.ne.s32.totalorder %s2634_s24, 0 }
  0x79   : > { %s2047_s18 = sshll.u32 %s2929_s0, 4  ;;  %s589_s26 = scalar_lea.vmem %s3225_s1, %s2929_s0  ;;  %vm598_vm0 = vcmask (!%p2007_p8), 261120   ;;  %v642_v14 = vld [vmem:[%s3228_s4] sm:$0xff] (!%p2007_p8)  ;;  %v643_v15 = vld [vmem:[%s3228_s4 + $0x8] sm:$0xff] (!%p2007_p8)  ;;  %v644_v16 = vld [vmem:[%s3228_s4 + $0x10] sm:$0xff] (!%p2007_p8)  ;;  %vm734_vm1 = vcmask (!%p2007_p8), 523264  }
  0x7a   : > { %593 = sbr.rel (%p2007_p8) target bundleno = 659 (0x293), region = 100  ;;  %v2221_v17 = vpack.c.bf16 (!%p2007_p8), %v643_v15, %v642_v14  ;;  %v645_v18 = vld [vmem:[%s3228_s4 + $0x18] sm:$0xff] (!%p2007_p8)  ;;  %v2008_v27 = vld [vmem:[%s3236_s12] ss:$0 sm:$0xff] (!%p2007_p8) }
  0x7b   : > { %v2225_v19 = vpack.c.bf16 (!%p2007_p8), %v645_v18, %v644_v16  ;;  %v2009_v29 = vld [vmem:[%s3237_s13] ss:$0 sm:$0xff] (!%p2007_p8) }
  0x7c   : > { %s2939_s29 = scalar_lea.vmem %s3283_s15, %s2047_s18  ;;  %2222 = vmatprep.subr.bf16.mxu0 (!%p2007_p8), %v2221_v17  ;;  %v2010_v36 = vld [vmem:[%s3229_s5] ss:$0 sm:$0xff] (!%p2007_p8) }
  0x7d   : > { %v594_v0 = vld [vmem:[%s2939_s29] sm:$0xff] (!%p2007_p8)  ;;  %v595_v1 = vld [vmem:[%s2939_s29 + $0x8] sm:$0xff] (!%p2007_p8)  ;;  %2224 = vmatpush3.bf16.msra.mxu0 (!%p2007_p8), %v2221_v17 }
  0x7e   : > { %v599_v2 = vsel (!%p2007_p8), %vm598_vm0, %v594_v0, 0.0  ;;  %v602_v3 = vsel (!%p2007_p8), %vm598_vm0, %v595_v1, 0.0  ;;  %2226 = vmatprep.subr.bf16.mxu0 (!%p2007_p8), %v2225_v19 }
  0x7f   : > { %600 = vadd.xlane.f32.xlu0 (!%p2007_p8), %v599_v2 }
  0x81   : > { %2228 = vmatpush3.bf16.msra.mxu0 %v2225_v19 }
  0x83   : > { %603 = vadd.xlane.f32.xlu0 %v602_v3 }
 0x10c   : > { %v601_v4 = vpop.xlane.xlu0 %600 }
 0x10d   : > { %v606_v5 = vmul.f32 0.03125, %v601_v4 }
 0x10f   : > { %v608_v6 = vsub.f32 %v594_v0, %v606_v5 }
 0x110   : > { %v604_v7 = vpop.xlane.xlu0 %603 }
 0x111   : > { %v607_v8 = vmul.f32 0.03125, %v604_v7  ;;  %v610_v9 = vmul.f32 %v608_v6, %v608_v6 }
 0x113   : > { %v609_v10 = vsub.f32 %v595_v1, %v607_v8  ;;  %v612_v11 = vsel %vm598_vm0, %v610_v9, 0.0 }
 0x114   : > { %613 = vadd.xlane.f32.xlu1 %v612_v11 }
 0x115   : > { %v611_v12 = vmul.f32 %v609_v10, %v609_v10 }
 0x117   : > { %v615_v13 = vsel %vm598_vm0, %v611_v12, 0.0 }
 0x118   : > { %616 = vadd.xlane.f32.xlu1 %v615_v13 }
 0x1a1   : > { %v614_v20 = vpop.xlane.xlu1 %613 }
 0x1a2   : > { %v618_v21 = vmul.f32 0.03125, %v614_v20 }
 0x1a4   : > { %v620_v22 = vadd.f32 1e-05, %v618_v21 }
 0x1a5   : > { %v617_v23 = vpop.xlane.xlu1 %616 }
 0x1a6   : > { %2405 = vrsqrt.f32 %v620_v22  ;;  %v619_v24 = vmul.f32 0.03125, %v617_v23 }
 0x1a8   : > { %v621_v25 = vadd.f32 1e-05, %v619_v24 }
 0x1aa   : > { %2407 = vrsqrt.f32 %v621_v25 }
 0x1b0   : > { %v2406_v26 = vpop.eup %2405 }
 0x1b1   : > { %v624_v28 = vmul.f32 %v2406_v26, %v608_v6 }
 0x1b3   : > { %v632_v30 = vmul.f32 %v2008_v27, %v624_v28 }
 0x1b4   : > { %v2408_v31 = vpop.eup %2407 }
 0x1b5   : > { %v625_v32 = vmul.f32 %v2408_v31, %v609_v10  ;;  %v640_v33 = vadd.f32 %v2009_v29, %v632_v30 }
 0x1b7   : > { %v633_v34 = vmul.f32 %v2008_v27, %v625_v32  ;;  %2110 = vmatprep.mubr.msk.f32.mxu0 %vm598_vm0, %v640_v33 }
 0x1b9   : > { %v641_v35 = vadd.f32 %v2009_v29, %v633_v34 }
 0x1bb   : > { %2111 = vmatmul.mubr.msk.f32.vlgmr.msra.gmra.mrb[0].mxu0 %vm598_vm0, %v641_v35 }
 0x28e   : > { %v2112_v37 = vpop.f32.mrb[0].mxu0 }
 0x28f   : > { %v731_v38 = vadd.f32 %v2112_v37, %v2010_v36  ;;  %v725_v39 = vpop.f32.mrb[1].mxu0 }
 0x290   : > { %v726_v40 = vadd.f32 %v2010_v36, %v725_v39 }
 0x291   : > { %736 = vst.msk [vmem:[#allocation2 + $0x8] sm:$0xff] %vm734_vm1, %v731_v38 }
 0x292   : > { %735 = vst.msk [vmem:[#allocation2] sm:$0xff] %vm734_vm1, %v726_v40 }
 0x293 PF: > { %s2013_s21 = sshll.u32 %s2634_s24, 3  ;;  %vm746_vm2 = vcmask 261120   ;;  %v775_v48 = vld [vmem:[%s3226_s2] sm:$0xff]  ;;  %v776_v49 = vld [vmem:[%s3226_s2 + $0x8] sm:$0xff]  ;;  %v777_v50 = vld [vmem:[%s3226_s2 + $0x10] sm:$0xff]  ;;  %v2657_v51 = vmov 0.0|0.0   ;;  %v941_v16 = vlaneseq }
 0x294   : > { %s738_s27 = scalar_lea.vmem %s2939_s29, %s2013_s21  ;;  %2229 = vmatprep.subr.bf16.mxu1 %v2657_v51  ;;  %v2230_v52 = vpack.c.bf16 %v776_v49, %v775_v48  ;;  %v778_v53 = vld [vmem:[%s3226_s2 + $0x18] sm:$0xff]  ;;  %vm2658_vm3 = vmmov 0   ;;  %v2659_v54 = vmov 0.0   ;;  %2239 = vmatprep.subr.bf16.mxu0 %v2657_v51  ;;  %s2660_s15 = smov 120   ;;  %v2014_v63 = vld [vmem:[%s3236_s12] ss:$0 sm:$0xff] }
 0x295   : > { %v2974_v41 = vld [vmem:[%s738_s27] sm:$0xff]  ;;  %2121 = vmatprep.mubr.msk.f32.mxu1 %vm2658_vm3, %v2659_v54  ;;  %2135 = vmatprep.mubr.msk.f32.mxu0 %vm2658_vm3, %v2659_v54  ;;  %v2233_v55 = vpack.c.bf16 %v778_v53, %v777_v50  ;;  %vm860_vm4 = vcmask 64512   ;;  %v942_v18 = vshrl.u32 %v941_v16, 7  ;;  %v2661_v20 = vmov 0   ;;  %s2662_s0 = smov 96   ;;  %s2664_s7 = smov 112  }
 0x296   : > { %v747_v42 = vsel %vm746_vm2, %v2974_v41, 0.0  ;;  %2231 = vmatpush3.bf16.msra.mxu1 %v2230_v52  ;;  %v2015_v1 = vld [vmem:[%s3237_s13] ss:$0 sm:$0xff]  ;;  %vm3011_vm5 = vmpackc.low %vm860_vm4, %vm860_vm4  ;;  %vm947_vm8 = vcmask 130048   ;;  %s2665_s10 = smov 80   ;;  %s2666_s14 = smov 104  }
 0x297   : > { %748 = vadd.xlane.f32.xlu0 %v747_v42  ;;  %2232 = vmatprep.subr.bf16.mxu1 %v2657_v51  ;;  %v2016_v7 = vld [vmem:[%s3227_s3] ss:$0 sm:$0xff]  ;;  %v943_v19 = vsub.s32 0, %v942_v18  ;;  %s2667_s20 = smov 72   ;;  %s2669_s30 = smov 8   ;;  %vm1571_vm9 = vcmask 195584  }
 0x298   : > { %v743_v57 = vld [vmem:[#allocation2 + $0x8] sm:$0xff]  ;;  %v740_v17 = vld [vmem:[%s589_s26] sm:$0x1]  ;;  %s2663_s26 = smov 88   ;;  %s2670_s19 = smov 24   ;;  %vm1787_vm10 = vcmask 523264  }
 0x299   : > { %v742_v56 = vld [vmem:[#allocation2] sm:$0xff]  ;;  %vm741_vm6 = vcmp.gt.s32.totalorder %v740_v17, 0  ;;  %s3286_s11 = sld [smem:[#allocation24_spill]]  ;;  %s3287_s29 = sld [smem:[#allocation25_spill]] }
 0x29a   : > { %2234 = vmatpush3.bf16.msra.mxu1 %v2233_v55  ;;  %v3000_v58 = vpack.i.bf16 %v743_v57, %v742_v56  ;;  %v2236_v3 = vpack.c.bf16 %v743_v57, %v742_v56  ;;  %v940_v21 = vsel %vm741_vm6, 1, %v2661_v20  ;;  %s3288_s23 = sld [smem:[#allocation27_spill]]  ;;  %s1879_s18 = sshll.u32 %s581_s17, 4  ;;  %s3168_s18 = int_to_ptr.vmem [resolvable:$true] %s1879_s18 }
 0x29b   : > { %2235 = vmatprep.subr.bf16.mxu1 %v2657_v51  ;;  %v3038_v22 = vrot.slane %v940_v21, %v943_v19 }
 0x29c   : > { %2410 = vrot.lane.b32.xlu1 %v3000_v58, %s2660_s15 }
 0x29d   : > { %vm945_vm7 = vcmp.eq.s32.totalorder %v3038_v22, 1 }
 0x30e   : > { %v2411_v6 = vpop.permute.xlu1 %2410 }
 0x30f   : > { %v2413_v8 = vunpack.i.h.bf16 %v2411_v6  ;;  %v2412_v9 = vunpack.i.l.bf16 %v2411_v6 }
 0x311   : > { %v2243_v13 = vpack.c.bf16 %v2413_v8, %v2412_v9 }
 0x324   : > { %v749_v43 = vpop.xlane.xlu0 %748 }
 0x325   : > { %v751_v44 = vmul.f32 0.03125, %v749_v43 }
 0x327   : > { %v752_v45 = vsub.f32 %v2974_v41, %v751_v44 }
 0x329   : > { %v753_v46 = vmul.f32 %v752_v45, %v752_v45 }
 0x32b   : > { %v754_v47 = vsel %vm746_vm2, %v753_v46, 0.0 }
 0x32c   : > { %755 = vadd.xlane.f32.xlu0 %v754_v47 }
 0x3b9   : > { %v756_v59 = vpop.xlane.xlu0 %755 }
 0x3ba   : > { %v757_v60 = vmul.f32 0.03125, %v756_v59 }
 0x3bc   : > { %v758_v61 = vadd.f32 1e-05, %v757_v60 }
 0x3be   : > { %2444 = vrsqrt.f32 %v758_v61 }
 0x3c8   : > { %v2445_v62 = vpop.eup %2444 }
 0x3c9   : > { %v760_v0 = vmul.f32 %v2445_v62, %v752_v45 }
 0x3cb   : > { %v767_v2 = vmul.f32 %v2014_v63, %v760_v0 }
 0x3cd   : > { %v774_v4 = vadd.f32 %v2015_v1, %v767_v2 }
 0x3cf   : > { %2122 = vmatmul.mubr.msk.f32.vlgmr.msra.gmra.mrb[0].mxu1 %vm746_vm2, %v774_v4 }
 0x3d0   : > { %2238 = vmatpush3.bf16.xpose.msk.msra.mxu1 %vm3011_vm5, %v2236_v3  ;;  %2128 = vmatprep.mubr.msk.f32.mxu1 %vm2658_vm3, %v2659_v54 }
 0x3d1   : > { %2242 = vmatprep.subr.bf16.mxu1 %v2657_v51 }
 0x4a2   : > { %v855_v10 = vpop.f32.mrb[0].mxu1 }
 0x4a3   : > { %v856_v11 = vadd.f32 %v2016_v7, %v855_v10  ;;  %v2123_v12 = vpop.f32.mrb[1].mxu1 }
 0x4a5   : > { %v859_v14 = vmul.f32 0.35355338, %v856_v11 }
 0x4a7   : > { %1038 = vrot.lane.b32.xlu1 %v859_v14, %s2660_s15  ;;  %2129 = vmatmul.mubr.msk.f32.vlgmr.msra.gmra.mrb[2].mxu1 %vm860_vm4, %v859_v14  ;;  %s2668_s15 = smov 16  }
 0x4a8   : > { %2245 = vmatpush3.bf16.xpose.msk.msra.mxu1 %vm3011_vm5, %v2243_v13  ;;  %2142 = vmatprep.mubr.msk.f32.mxu1 %vm2658_vm3, %v2659_v54 }
 0x4a9   : > { %2253 = vmatprep.subr.bf16.mxu1 %v2657_v51 }
 0x519   : > { %v1039_v15 = vpop.permute.xlu1 %1038 }
 0x51a   : > { %2143 = vmatmul.mubr.msk.f32.vlgmr.msra.gmra.mrb[4].mxu1 %vm860_vm4, %v1039_v15 }
 0x51b   : > { %2163 = vmatprep.mubr.msk.f32.mxu1 %vm2658_vm3, %v2659_v54 }
 0x57a   : > { %v936_v23 = vpop.f32.mrb[2].mxu1 }
 0x57b   : > { %v946_v24 = vsel %vm945_vm7, -1e+09, %v936_v23  ;;  %v2130_v25 = vpop.f32.mrb[3].mxu1 }
 0x57c   : > { %v948_v26 = vsel %vm947_vm8, %v946_v24, -inf }
 0x57d   : > { %949 = vmax.xlane.f32.xlu0 %v948_v26 }
 0x593   : > { %2415 = vrot.lane.b32.xlu0 %v3000_v58, %s2662_s0 }
 0x597   : > { %2420 = vrot.lane.b32.xlu0 %v3000_v58, %s2663_s26  ;;  %s3289_s26 = sld [smem:[#allocation28_spill]] }
 0x59b   : > { %2425 = vrot.lane.b32.xlu0 %v3000_v58, %s2664_s7 }
 0x59f   : > { %1211 = vrot.lane.b32.xlu0 %v859_v14, %s2664_s7  ;;  %s3292_s7 = sld [smem:[#allocation29_spill]] }
 0x5a3   : > { %2430 = vrot.lane.b32.xlu0 %v3000_v58, %s2665_s10 }
 0x5a7   : > { %1384 = vrot.lane.b32.xlu0 %v859_v14, %s2666_s14 }
 0x5ed   : > { %v1116_v27 = vpop.f32.mrb[4].mxu1 }
 0x5ee   : > { %v1120_v28 = vsel %vm945_vm7, -1e+09, %v1116_v27  ;;  %v2144_v29 = vpop.f32.mrb[5].mxu1 }
 0x5ef   : > { %v1121_v30 = vsel %vm947_vm8, %v1120_v28, -inf }
 0x5f0   : > { %1122 = vmax.xlane.f32.xlu1 %v1121_v30 }
 0x60a   : > { %v950_v31 = vpop.xlane.xlu0 %949 }
 0x60b   : > { %v951_v32 = vsub.f32 %v946_v24, %v950_v31 }
 0x60d   : > { %v952_v33 = vmul.f32 1.442695, %v951_v32 }
 0x60e   : > { %v2416_v34 = vpop.permute.xlu0 %2415 }
 0x60f   : > { %2446 = vpow2.f32 %v952_v33  ;;  %v2418_v35 = vunpack.i.h.bf16 %v2416_v34  ;;  %v2417_v36 = vunpack.i.l.bf16 %v2416_v34 }
 0x611   : > { %v2240_v37 = vpack.c.bf16 %v2418_v35, %v2417_v36  ;;  %v1573_v36 = vld [vmem:[#allocation3] sm:$0xff] }
 0x612   : > { %v2421_v38 = vpop.permute.xlu0 %2420 }
 0x613   : > { %v2423_v39 = vunpack.i.h.bf16 %v2421_v38  ;;  %v2422_v40 = vunpack.i.l.bf16 %v2421_v38  ;;  %2241 = vmatpush3.bf16.msra.mxu0 %v2240_v37  ;;  %v1574_v37 = vld [vmem:[#allocation3 + $0x8] sm:$0xff]  ;;  %v1575_v38 = vld [vmem:[#allocation3 + $0x10] sm:$0xff] }
 0x614   : > { %2246 = vmatprep.subr.bf16.mxu0 %v2657_v51 }
 0x615   : > { %v2247_v43 = vpack.c.bf16 %v2423_v39, %v2422_v40  ;;  %v2264_v39 = vpack.c.bf16 %v1574_v37, %v1573_v36  ;;  %v1576_v40 = vld [vmem:[#allocation3 + $0x18] sm:$0xff] }
 0x616   : > { %v2426_v42 = vpop.permute.xlu0 %2425 }
 0x617   : > { %v2428_v55 = vunpack.i.h.bf16 %v2426_v42  ;;  %v2427_v56 = vunpack.i.l.bf16 %v2426_v42  ;;  %v2267_v42 = vpack.c.bf16 %v1576_v40, %v1575_v38 }
 0x619   : > { %v3053_v44 = vpop.eup %2446  ;;  %v2250_v57 = vpack.c.bf16 %v2428_v55, %v2427_v56 }
 0x61a   : > { %v1212_v45 = vpop.permute.xlu0 %1211  ;;  %2136 = vmatmul.mubr.msk.f32.vlgmr.msra.gmra.mrb[0].mxu0 %vm947_vm8, %v3053_v44  ;;  %v954_v32 = vsel %vm947_vm8, %v3053_v44, 0.0 }
 0x61b   : > { %2248 = vmatpush3.bf16.msra.mxu0 %v2247_v43  ;;  %2149 = vmatprep.mubr.msk.f32.mxu0 %vm2658_vm3, %v2659_v54 }
 0x61c   : > { %2249 = vmatprep.subr.bf16.mxu0 %v2657_v51 }
 0x61e   : > { %v2431_v46 = vpop.permute.xlu0 %2430 }
 0x61f   : > { %v2433_v47 = vunpack.i.h.bf16 %v2431_v46  ;;  %v2432_v48 = vunpack.i.l.bf16 %v2431_v46 }
 0x621   : > { %v2254_v49 = vpack.c.bf16 %v2433_v47, %v2432_v48 }
 0x623   : > { %2255 = vmatpush3.bf16.msra.mxu1 %v2254_v49 }
 0x624   : > { %2256 = vmatprep.subr.bf16.mxu1 %v2657_v51 }
 0x67d   : > { %v1123_v50 = vpop.xlane.xlu1 %1122 }
 0x67e   : > { %v1124_v52 = vsub.f32 %v1120_v28, %v1123_v50 }
 0x680   : > { %v1125_v53 = vmul.f32 1.442695, %v1124_v52 }
 0x682   : > { %2448 = vpow2.f32 %v1125_v53 }
 0x68c   : > { %v2449_v59 = vpop.eup %2448 }
 0x68d   : > { %2150 = vmatmul.mubr.msk.f32.vlgmr.msra.gmra.mrb[2].mxu0 %vm947_vm8, %v2449_v59  ;;  %v1127_v4 = vsel %vm947_vm8, %v2449_v59, 0.0 }
 0x68e   : > { %2252 = vmatpush3.bf16.xpose.msk.msra.mxu0 %vm3011_vm5, %v2250_v57  ;;  %2156 = vmatprep.mubr.msk.f32.mxu0 %vm2658_vm3, %v2659_v54 }
 0x68f   : > { %2260 = vmatprep.subr.bf16.mxu0 %v2657_v51 }
 0x695   : > { %2157 = vmatmul.mubr.msk.f32.vlgmr.msra.gmra.mrb[4].mxu0 %vm860_vm4, %v1212_v45 }
 0x696   : > { %2177 = vmatprep.mubr.msk.f32.mxu0 %vm2658_vm3, %v2659_v54 }
 0x6ed   : > { %v3070_v60 = vpop.f32.mrb[0].mxu0 }
 0x6ee   : > { %v2137_v61 = vpop.f32.mrb[1].mxu0 }
 0x6ef   : > { %v2034_v61 = vld [vmem:[%s3286_s11] ss:$0 sm:$0xff]  ;;  %s3291_s11 = sld [smem:[#allocation26_spill]] }
 0x760   : > { %v3072_v62 = vpop.f32.mrb[2].mxu0 }
 0x761   : > { %v2151_v63 = vpop.f32.mrb[3].mxu0 }
 0x768   : > { %v1289_v0 = vpop.f32.mrb[4].mxu0 }
 0x769   : > { %v1293_v1 = vsel %vm945_vm7, -1e+09, %v1289_v0  ;;  %v2158_v2 = vpop.f32.mrb[5].mxu0 }
 0x76a   : > { %v1294_v3 = vsel %vm947_vm8, %v1293_v1, -inf }
 0x76b   : > { %1295 = vmax.xlane.f32.xlu1 %v1294_v3 }
 0x77c   : > { %2435 = vrot.lane.b32.xlu1 %v3000_v58, %s2666_s14  ;;  %s2671_s14 = smov [#allocation9]  }
 0x780   : > { %2440 = vrot.lane.b32.xlu1 %v3000_v58, %s2667_s20  ;;  %v1385_v58 = vpop.permute.xlu0 %1384  ;;  %s2552_s20 = sshll.u32 %s2671_s14, 4  ;;  %s2553_s20 = int_to_ptr.vmem [resolvable:$false] %s2552_s20 }
 0x781   : > { %p2555_p5 = scmp.lt.s32.totalorder %s3168_s18, %s2553_s20 }
 0x7a4   : > { %1128 = vadd.xlane.f32.xlu1 %v1127_v4 }
 0x7f8   : > { %v1296_v6 = vpop.xlane.xlu1 %1295 }
 0x7f9   : > { %v1297_v7 = vsub.f32 %v1293_v1, %v1296_v6 }
 0x7fb   : > { %v1298_v8 = vmul.f32 1.442695, %v1297_v7  ;;  %v1687_v7 = vld [vmem:[#allocation6] sm:$0xff] }
 0x7fc   : > { %v2436_v9 = vpop.permute.xlu1 %2435 }
 0x7fd   : > { %2450 = vpow2.f32 %v1298_v8  ;;  %v2438_v11 = vunpack.i.h.bf16 %v2436_v9  ;;  %v2437_v12 = vunpack.i.l.bf16 %v2436_v9  ;;  %v1688_v8 = vld [vmem:[#allocation6 + $0x8] sm:$0xff] }
 0x7fe   : > { %v2270_v9 = vpack.c.bf16 %v1688_v8, %v1687_v7 }
 0x7ff   : > { %v2257_v16 = vpack.c.bf16 %v2438_v11, %v2437_v12  ;;  %v1772_v12 = vld [vmem:[%s3287_s29] sm:$0xff] }
 0x800   : > { %v2441_v10 = vpop.permute.xlu1 %2440 }
 0x801   : > { %v2443_v13 = vunpack.i.h.bf16 %v2441_v10  ;;  %v2442_v14 = vunpack.i.l.bf16 %v2441_v10  ;;  %v1690_v10 = vld [vmem:[#allocation6 + $0x18] sm:$0xff] }
 0x803   : > { %v2261_v15 = vpack.c.bf16 %v2443_v13, %v2442_v14  ;;  %v1773_v13 = vld [vmem:[%s3287_s29 + $0x8] sm:$0xff]  ;;  %v1774_v14 = vld [vmem:[%s3287_s29 + $0x10] sm:$0xff] }
 0x805   : > { %2262 = vmatpush3.bf16.msra.mxu0 %v2261_v15  ;;  %v2276_v15 = vpack.c.bf16 %v1773_v13, %v1772_v12 }
 0x806   : > { %2263 = vmatprep.subr.bf16.mxu0 %v2657_v51 }
 0x807   : > { %v2451_v17 = vpop.eup %2450 }
 0x808   : > { %2164 = vmatmul.mubr.msk.f32.vlgmr.msra.gmra.mrb[6].mxu1 %vm947_vm8, %v2451_v17  ;;  %v1300_v24 = vsel %vm947_vm8, %v2451_v17, 0.0 }
 0x809   : > { %2259 = vmatpush3.bf16.xpose.msk.msra.mxu1 %vm3011_vm5, %v2257_v16  ;;  %2170 = vmatprep.mubr.msk.f32.mxu1 %vm2658_vm3, %v2659_v54  ;;  %v1775_v16 = vld [vmem:[%s3287_s29 + $0x18] sm:$0xff] }
 0x80a   : > { %2269 = vmatprep.subr.bf16.mxu1 %v2657_v51  ;;  %v2279_v17 = vpack.c.bf16 %v1775_v16, %v1774_v14 }
 0x810   : > { %2171 = vmatmul.mubr.msk.f32.vlgmr.msra.gmra.mrb[8].mxu1 %vm860_vm4, %v1385_v58  ;;  %v1776_v58 = vld [vmem:[%s3287_s29 + $0x20] sm:$0xff] }
 0x811   : > { %2199 = vmatprep.mubr.msk.f32.mxu1 %vm2658_vm3, %v2659_v54  ;;  %2271 = vmatpush3.bf16.msra.mxu1 %v2270_v9 }
 0x812   : > { %2272 = vmatprep.subr.bf16.mxu1 %v2657_v51 }
 0x831   : > { %v1129_v33 = vpop.xlane.xlu1 %1128 }
 0x8db   : > { %v1379_v18 = vpop.f32.mrb[6].mxu1 }
 0x8dc   : > { %v2165_v19 = vpop.f32.mrb[7].mxu1 }
 0x8e3   : > { %v1462_v20 = vpop.f32.mrb[8].mxu1 }
 0x8e4   : > { %v1466_v21 = vsel %vm945_vm7, -1e+09, %v1462_v20  ;;  %v2172_v23 = vpop.f32.mrb[9].mxu1 }
 0x8e5   : > { %v1467_v5 = vsel %vm947_vm8, %v1466_v21, -inf }
 0x8e6   : > { %1468 = vmax.xlane.f32.xlu0 %v1467_v5 }
 0x8ea   : > { %1301 = vadd.xlane.f32.xlu0 %v1300_v24  ;;  %v2036_v24 = vld [vmem:[%s3288_s23] ss:$0 sm:$0xff] }
 0x973   : > { %v1469_v25 = vpop.xlane.xlu0 %1468 }
 0x974   : > { %v1470_v26 = vsub.f32 %v1466_v21, %v1469_v25 }
 0x976   : > { %v1471_v27 = vmul.f32 1.442695, %v1470_v26  ;;  %v2037_v26 = vld [vmem:[%s3289_s26] ss:$0 sm:$0xff] }
 0x977   : > { %v1302_v28 = vpop.xlane.xlu0 %1301 }
 0x978   : > { %2452 = vpow2.f32 %v1471_v27 }
 0x979   : > { %2454 = vrcp.f32 %v1302_v28 }
 0x97a   : > { %2456 = vrcp.f32 %v1129_v33 }
 0x982   : > { %v2453_v29 = vpop.eup %2452 }
 0x983   : > { %v2455_v30 = vpop.eup %2454  ;;  %2178 = vmatmul.mubr.msk.f32.vlgmr.msra.gmra.mrb[6].mxu0 %vm947_vm8, %v2453_v29  ;;  %v1473_v22 = vsel %vm947_vm8, %v2453_v29, 0.0  ;;  %v1779_v29 = vld [vmem:[%s3287_s29 + $0x38] sm:$0xff] }
 0x984   : > { %1474 = vadd.xlane.f32.xlu0 %v1473_v22  ;;  %v1383_v31 = vmul.f32 %v2455_v30, %v1379_v18  ;;  %2188 = vmatprep.mubr.msk.f32.mxu0 %vm2658_vm3, %v2659_v54  ;;  %v2457_v34 = vpop.eup %2456  ;;  %v1777_v18 = vld [vmem:[%s3287_s29 + $0x28] sm:$0xff]  ;;  %v2038_v22 = vld [vmem:[#allocation8] ss:$0 sm:$0xff] }
 0x985   : > { %v1210_v35 = vmul.f32 %v2457_v34, %v3072_v62  ;;  %2265 = vmatpush3.bf16.msra.mxu0 %v2264_v39  ;;  %v2282_v19 = vpack.c.bf16 %v1777_v18, %v1776_v58 }
 0x986   : > { %1562 = vrot.lane.b32.xlu1 %v1383_v31, %s2668_s15  ;;  %2266 = vmatprep.subr.bf16.mxu0 %v2657_v51  ;;  %s3290_s15 = sld [smem:[#allocation19_spill]] }
 0x988   : > { %955 = vadd.xlane.f32.xlu0 %v954_v32 }
 0x989   : > { %2268 = vmatpush3.bf16.msra.mxu0 %v2267_v42 }
 0x98a   : > { %2275 = vmatprep.subr.bf16.mxu0 %v2657_v51 }
 0x98c   : > { %p3293_p12 = scmp.ne.s32.totalorder %s3290_s15, 0 }
 0x99e   : > { %1558 = vrot.lane.b32.xlu0 %v1210_v35, %s2669_s30  ;;  %s2043_s30 = sshll.u32 %s2638_s25, 1  ;;  %v2040_v35 = vld [vmem:[%s3291_s11] ss:$0 sm:$0xff]  ;;  %s2548_s25 = scalar_lea.vmem %s3168_s18, 128 }
 0x99f   : > { %p2549_p10 = scmp.ne.s32.totalorder %s3168_s18, %s2548_s25 }
 0x9a1   : > { %p2550_p1 = pnand %p2549_p10, %p3293_p12 }
 0x9a3   : > { %p2551_p4 = pneg %p2550_p1 }
 0x9f8   : > { %v1563_v55 = vpop.permute.xlu1 %1562 }
 0xa11   : > { %v1475_v43 = vpop.xlane.xlu0 %1474 }
 0xa12   : > { %2458 = vrcp.f32 %v1475_v43 }
 0xa15   : > { %v956_v48 = vpop.xlane.xlu0 %955 }
 0xa16   : > { %2460 = vrcp.f32 %v956_v48 }
 0xa19   : > { %v1559_v52 = vpop.permute.xlu0 %1558 }
 0xa1c   : > { %v2459_v44 = vpop.eup %2458 }
 0xa20   : > { %v2461_v49 = vpop.eup %2460 }
 0xa21   : > { %v1037_v50 = vmul.f32 %v2461_v49, %v3070_v60 }
 0xa23   : > { %v1569_v53 = vsel %vm860_vm4, %v1037_v50, %v1559_v52 }
 0xa24   : > { %v1570_v56 = vsel %vm947_vm8, %v1569_v53, %v1563_v55 }
 0xa56   : > { %v1552_v45 = vpop.f32.mrb[6].mxu0 }
 0xa57   : > { %v1556_v46 = vmul.f32 %v2459_v44, %v1552_v45  ;;  %v2179_v47 = vpop.f32.mrb[7].mxu0 }
 0xa59   : > { %1566 = vrot.lane.b32.xlu0 %v1556_v46, %s2670_s19  ;;  %s1875_s19 = sadd.s32 %s2634_s24, %s2043_s30  ;;  %s1864_s24 = scalar_lea.sflag [#allocation5], %s579_s16 }
 0xa5a   : > { %s2044_s23 = sshll.u32 %s1875_s19, 7  ;;  %s2554_s30 = scalar_lea.vmem %s2553_s20, 256 }
 0xa5b   : > { %s3166_s10 = scalar_lea.hbm %s3292_s7, %s2044_s23  ;;  %p2556_p6 = scmp.lt.s32.totalorder %s2554_s30, %s2548_s25 }
 0xa5d   : > { %p2557_p7 = por %p2556_p6, %p2555_p5 }
 0xa5f   : > { %p2558_p9 = pnand %p2557_p7, %p2551_p4 }
 0xacb   : > { %v1567_v57 = vpop.permute.xlu0 %1566 }
 0xacc   : > { %v1572_v59 = vsel %vm1571_vm9, %v1570_v56, %v1567_v57 }
 0xacd   : > { %2189 = vmatmul.mubr.msk.f32.vlgmr.msra.gmra.mrb[8].mxu0 %vm746_vm2, %v1572_v59 }
 0xace   : > { %2218 = vmatprep.mubr.msk.f32.mxu0 %vm2658_vm3, %v2659_v54  ;;  %2277 = vmatpush3.bf16.msra.mxu0 %v2276_v15 }
 0xacf   : > { %2278 = vmatprep.subr.bf16.mxu0 %v2657_v51 }
 0xad2   : > { %2280 = vmatpush3.bf16.msra.mxu0 %v2279_v17 }
 0xad3   : > { %2281 = vmatprep.subr.bf16.mxu0 %v2657_v51 }
 0xad6   : > { %2283 = vmatpush3.bf16.msra.mxu0 %v2282_v19 }
 0xad7   : > { %2284 = vmatprep.subr.bf16.mxu0 %v2657_v51  ;;  %v1778_v51 = vld [vmem:[%s3287_s29 + $0x30] sm:$0xff] }
 0xad8   : > { %v2285_v30 = vpack.c.bf16 %v1779_v29, %v1778_v51 }
 0xada   : > { %2286 = vmatpush3.bf16.msra.mxu0 %v2285_v30 }
 0xba0   : > { %v1653_v62 = vpop.f32.mrb[8].mxu0 }
 0xba1   : > { %v1654_v60 = vadd.f32 %v2034_v61, %v1653_v62  ;;  %v2190_v63 = vpop.f32.mrb[9].mxu0 }
 0xba3   : > { %v3114_v0 = vadd.f32 %v1654_v60, %v2974_v41  ;;  %v1689_v41 = vld [vmem:[#allocation6 + $0x10] sm:$0xff] }
 0xba4   : > { %v2273_v11 = vpack.c.bf16 %v1690_v10, %v1689_v41 }
 0xba5   : > { %v1660_v1 = vsel %vm746_vm2, %v3114_v0, 0.0 }
 0xba6   : > { %1661 = vadd.xlane.f32.xlu1 %v1660_v1  ;;  %2274 = vmatpush3.bf16.msra.mxu1 %v2273_v11 }
 0xc33   : > { %v1662_v2 = vpop.xlane.xlu1 %1661 }
 0xc34   : > { %v1663_v3 = vmul.f32 0.03125, %v1662_v2 }
 0xc36   : > { %v1664_v4 = vsub.f32 %v3114_v0, %v1663_v3 }
 0xc38   : > { %v1665_v6 = vmul.f32 %v1664_v4, %v1664_v4 }
 0xc3a   : > { %v1666_v54 = vsel %vm746_vm2, %v1665_v6, 0.0 }
 0xc3b   : > { %1667 = vadd.xlane.f32.xlu0 %v1666_v54 }
 0xcc8   : > { %v1668_v20 = vpop.xlane.xlu0 %1667 }
 0xcc9   : > { %v1669_v21 = vmul.f32 0.03125, %v1668_v20 }
 0xccb   : > { %v1670_v23 = vadd.f32 1e-05, %v1669_v21 }
 0xccd   : > { %2462 = vrsqrt.f32 %v1670_v23 }
 0xcd7   : > { %v2463_v5 = vpop.eup %2462 }
 0xcd8   : > { %v1672_v25 = vmul.f32 %v2463_v5, %v1664_v4 }
 0xcda   : > { %v1679_v27 = vmul.f32 %v2036_v24, %v1672_v25 }
 0xcdc   : > { %v1686_v28 = vadd.f32 %v2037_v26, %v1679_v27 }
 0xcde   : > { %2200 = vmatmul.mubr.msk.f32.vlgmr.msra.gmra.mrb[10].mxu1 %vm746_vm2, %v1686_v28 }
 0xdb1   : > { %v1767_v31 = vpop.f32.mrb[10].mxu1 }
 0xdb2   : > { %v1768_v32 = vadd.f32 %v2038_v22, %v1767_v31  ;;  %v2201_v33 = vpop.f32.mrb[11].mxu1 }
 0xdb4   : > { %v1771_v34 = vmax.f32 %v1768_v32, 0.0 }
 0xdb6   : > { %2219 = vmatmul.mubr.msk.f32.vlgmr.msra.gmra.mrb[10].mxu0 %vm1787_vm10, %v1771_v34 }
 0xe89   : > { %v1857_v36 = vpop.f32.mrb[10].mxu0 }
 0xe8a   : > { %v1858_v37 = vadd.f32 %v2040_v35, %v1857_v36  ;;  %v2220_v38 = vpop.f32.mrb[11].mxu0 }
 0xe8c   : > { %v1861_v39 = vadd.f32 %v1858_v37, %v3114_v0 }
 0xe8e   : > { %1862 = vst.msk [vmem:[%s581_s17] sm:$0xff] %vm746_vm2, %v1861_v39 }
 0xe8f   : > { %2561 = shalt.err (!%p2558_p9)
}
 0xe90   : > { %s2562_s16 = scalar_lea.hbm %s3166_s10, 128  ;;  %s2566_s19 = scalar_lea.hbm %s3292_s7, 512 }
 0xe91   : > { %p2563_p11 = scmp.ne.s32.totalorder %s3166_s10, %s2562_s16  ;;  %p2567_p2 = scmp.lt.u32.totalorder %s3166_s10, %s3292_s7 }
 0xe92   : > { %p2568_p0 = scmp.lt.u32.totalorder %s2566_s19, %s2562_s16  ;;  %p2570_p10 = scmp.lt.u32.totalorder %s2562_s16, %s3166_s10 }
 0xe93   : > { %p2564_p13 = pnand %p2563_p11, %p3293_p12 }
 0xe94   : > { %p2569_p8 = por %p2568_p0, %p2567_p2 }
 0xe95   : > { %p2565_p3 = pneg %p2564_p13 }
 0xe96   : > { %p2571_p1 = por %p2570_p10, %p2569_p8 }
 0xe98   : > { %p2572_p4 = pnand %p2571_p1, %p2565_p3 }
 0xe9a   : > { %2575 = shalt.err (!%p2572_p4)
}
 0xe9b   : > { %2299 = dma.vmem_to_hbm [thread:$0]  (%p3293_p12), %s3168_s18, 128, %s3166_s10, %s1864_s24  }
 0xe9c PF: > { %s3294_s11 = sld [smem:[#allocation17_spill]]  ;;  %s3295_s23 = sld [smem:[#allocation13_spill]] }
 0xe9d   : > { %s3296_s0 = sld [smem:[#allocation21_spill]] }
 0xea2   : > { %p2321_p5 = scmp.ge.s32.totalorder %s3294_s11, 2  ;;  %s1891_s26 = sand.u32 1, %s3295_s23  }
 0xea3   : > { %p3297_p6 = scmp.ne.s32.totalorder %s3296_s0, 0  ;;  %s1892_s25 = scalar_lea.sflag [#allocation5], %s1891_s26 }
 0xea5   : > { %p2312_p7 = pnand %p2321_p5, %p3297_p6 }
 0xea7   : > { %2617 = dma.done.wait (!%p2312_p7), %s1892_s25, 128  }
 0xea8   : > { %2619 = vsyncadd (!%p2312_p7), %s1892_s25, 4294967168  ;;  %s31_s28 = sadd.s32 1, %s3294_s11   ;;  %s3298_s14 = sld [smem:[#allocation14_spill]] }
 0xea9   : > { %p28_p9 = scmp.ge.s32.totalorder %s31_s28, 6   ;;  %s3299_s23 = sld [smem:[#allocation22_spill]] }
 0xeaa   : > { %s3300_s24 = sld [smem:[#allocation15_spill]]  ;;  %s3301_s25 = sld [smem:[#allocation16_spill]] }
 0xeab   : > { %s3302_s26 = sld [smem:[#allocation18_spill]]  ;;  %s3303_s27 = sld [smem:[#allocation20_spill]] }
 0xeac   : > { %s3304_s21 = smov %s2626_s22  ;;  %30 = sbr.rel (!%p28_p9) target bundleno = 15 (0xf), region = 140 }
 0xeae   : > { %s3305_s22 = smov %s3298_s14 }
 0xeb3   :  { %1897 = vsyncpa [#allocation4], 1 }
 0xeb4   :  { %1899 = vsyncpa [#allocation4 + $0x1], 1 }
 0xeb5   :  { %1900 = vsyncpa [#allocation7], 1 }
 0xeb6   :  { %1901 = vsyncpa [#allocation5], 1 }
 0xeb7   :  { %1903 = vsyncpa [#allocation5 + $0x1], 1 }

// kernel: tpu_custom_call.1
= control target key start
LH: loop header
LB: loop body
LE: loop exit
PB: predicated region body
PF: predicated region fallthrough
CT: control target
= control target key end

     0   :  { %s3224_s0 = inlined_call_operand.vmem [shape: f32[2,16,32], index: 0, kind: input, shape index: {}]   ;;  %s3225_s1 = inlined_call_operand.vmem [shape: s32[2,1,16], index: 1, kind: input, shape index: {}]   ;;  %s3226_s2 = inlined_call_operand.vmem [shape: f32[32,32], index: 2, kind: input, shape index: {}]   ;;  %s3227_s3 = inlined_call_operand.vmem [shape: f32[1,32], index: 3, kind: input, shape index: {}]   ;;  %s3228_s4 = inlined_call_operand.vmem [shape: f32[32,64], index: 4, kind: input, shape index: {}]   ;;  %s3229_s5 = inlined_call_operand.vmem [shape: f32[1,64], index: 5, kind: input, shape index: {}]   ;;  %s3230_s6 = inlined_call_operand.hbm [shape: f32[32,32], index: 6, kind: input, shape index: {}]   ;;  %s3231_s7 = inlined_call_operand.vmem [shape: f32[1,32], index: 7, kind: input, shape index: {}]   ;;  %s3232_s8 = inlined_call_operand.hbm [shape: f32[32,64], index: 8, kind: input, shape index: {}]   ;;  %s3233_s9 = inlined_call_operand.hbm [shape: f32[1,64], index: 9, kind: input, shape index: {}]   ;;  %s3234_s10 = inlined_call_operand.vmem [shape: f32[64,32], index: 10, kind: input, shape index: {}]   ;;  %s3235_s11 = inlined_call_operand.vmem [shape: f32[1,32], index: 11, kind: input, shape index: {}]   ;;  %s3236_s12 = inlined_call_operand.vmem [shape: f32[1,32], index: 12, kind: input, shape index: {}]   ;;  %s3237_s13 = inlined_call_operand.vmem [shape: f32[1,32], index: 13, kind: input, shape index: {}]   ;;  %s3238_s14 = inlined_call_operand.vmem [shape: f32[1,32], index: 14, kind: input, shape index: {}]   ;;  %s3239_s15 = inlined_call_operand.vmem [shape: f32[1,32], index: 15, kind: input, shape index: {}]   ;;  %s3240_s16 = inlined_call_operand.hbm [shape: f32[2,16,32], index: 16, kind: output, shape index: {}]  }
   0x1   :  { %3258 = sst [smem:[#allocation23_spill]] %s3224_s0 }
   0x2   :  { %3259 = sst [smem:[#allocation24_spill]] %s3231_s7 }
   0x3   :  { %3260 = sst [smem:[#allocation25_spill]] %s3234_s10 }
   0x4   :  { %3261 = sst [smem:[#allocation26_spill]] %s3235_s11 }
   0x5   :  { %3262 = sst [smem:[#allocation27_spill]] %s3238_s14 }
   0x6   :  { %3263 = sst [smem:[#allocation28_spill]] %s3239_s15 }
   0x7   :  { %3264 = sst [smem:[#allocation29_spill]] %s3240_s16 }
   0x8   :  { %21 = vsyncpa [#allocation4], 0 }
   0x9   :  { %22 = vsyncpa [#allocation7], 0 }
   0xa   :  { %23 = vsyncpa [#allocation5], 0 }
   0xb   :  { %25 = vsyncpa [#allocation5 + $0x1], 0  ;;  %s2757_s21 = smov 0   ;;  %s2759_s22 = smov 0  }
   0xc   :  { %s2761_s23 = smov 0   ;;  %s2763_s24 = smov 0  }
   0xd   :  { %s2765_s25 = smov 0   ;;  %s2767_s26 = smov 0  }
   0xe   :  { %s2769_s27 = smov 0   ;;  %s2771_s28 = smov 0  }
   0xf LB: > { %3265 = sst [smem:[#allocation13_spill]] %s2622_s21  ;;  %s1993_s29 = sadd.s32 4294967295, %s2650_s28   ;;  %s2650_s28 = sphi %s2771_s28, %s31_s28   ;;  %s2646_s27 = sphi %s2769_s27, %s3303_s27   ;;  %s2642_s26 = sphi %s2767_s26, %s3302_s26   ;;  %s2638_s25 = sphi %s2765_s25, %s3301_s25   ;;  %s2634_s24 = sphi %s2763_s24, %s3300_s24   ;;  %s2630_s23 = sphi %s2761_s23, %s3299_s23   ;;  %s2626_s22 = sphi %s2759_s22, %s3305_s22   ;;  %s2622_s21 = sphi %s2757_s21, %s3304_s21  }
  0x10   : > { %3266 = sst [smem:[#allocation14_spill]] %s2630_s23  ;;  %s1994_s30 = sadd.s32 4294967294, %s2650_s28  }
  0x11   : > { %3267 = sst [smem:[#allocation15_spill]] %s2642_s26  ;;  %s40_s0 = sadd.s32 1, %s2642_s26 }
  0x12   : > { %3268 = sst [smem:[#allocation16_spill]] %s2646_s27  ;;  %s43_s17 = sadd.s32 1, %s2646_s27 }
  0x13   : > { %3269 = sst [smem:[#allocation17_spill]] %s2650_s28  ;;  %p41_p0 = scmp.ge.s32.totalorder %s40_s0, 2 }
  0x14   : > { %s398_s18 = sadd.s32 1, %s2630_s23  ;;  %p408_p1 = scmp.ne.s32.totalorder %s2630_s23, %s2626_s22 }
  0x15   : > { %p409_p2 = scmp.eq.s32.totalorder %s1993_s29, 3  ;;  %s3307_s0 = smov (%p41_p0, %s40_s0), 0 }
  0x16   : > { %3270 = sst [smem:[#allocation18_spill]] %s3307_s0  ;;  %s3309_s17 = smov (!%p41_p0, %s43_s17), %s2646_s27 }
  0x17   : > { %s394_s19 = ssub.s32 %s2642_s26, %s3307_s0  ;;  %p2809_p3 = por %p409_p2, %p408_p1 }
  0x18   : > { %p45_p4 = scmp.ge.s32.totalorder %s3309_s17, 2  ;;  %p414_p5 = scmp.ne.s32.totalorder %s2626_s22, %s2622_s21 }
  0x19   : > { %s3271_s20 = scalar_select %p2809_p3, 1, 0 }
  0x1a   : > { %p415_p6 = scmp.eq.s32.totalorder %s1994_s30, 3  ;;  %p1995_p7 = scmp.ge.s32.totalorder %s2650_s28, 1 }
  0x1b   : > { %3272 = sst [smem:[#allocation19_spill]] %s3271_s20  ;;  %s3311_s17 = smov (%p45_p4, %s3309_s17), 0 }
  0x1c   : > { %3273 = sst [smem:[#allocation20_spill]] %s3311_s17  ;;  %p2818_p8 = por %p415_p6, %p414_p5 }
  0x1d   : > { %p422_p9 = scmp.lt.s32.totalorder %s2650_s28, 5  ;;  %s393_s11 = ssub.s32 %s2646_s27, %s3311_s17 }
  0x1e   : > { %s3274_s16 = scalar_select %p2818_p8, 1, 0 }
  0x1f   : > { %s395_s15 = sor.u32 %s394_s19, %s393_s11  ;;  %p2825_p10 = pnand %p1995_p7, %p422_p9 }
  0x20   : > { %3275 = sst [smem:[#allocation21_spill]] %s3274_s16  ;;  %p396_p11 = scmp.eq.s32.totalorder %s395_s15, 0 }
  0x21   : > { %s3276_s0 = scalar_select %p2825_p10, 1, 0 }
  0x22   : > { %p2829_p12 = scmp.eq.s32.totalorder %s1993_s29, 0  ;;  %p2301_p13 = pneg %p2825_p10 }
  0x23   : > { %s2836_s30 = scalar_select %p396_p11, %s2630_s23, %s398_s18  }
  0x24   : > { %s3277_s26 = scalar_select %p2829_p12, 1, 0 }
  0x25   : > { %3278 = sst [smem:[#allocation22_spill]] %s2836_s30  ;;  %p2840_p0 = pnand %p2829_p12, %p2301_p13 }
  0x26   : > { %s2652_s11 = smov [#allocation6]   ;;  %s2464_s29 = scalar_lea.hbm %s3232_s8, 512 }
  0x27   : > { %s462_s19 = sshll.u32 %s2652_s11, 4  ;;  %p2465_p1 = scmp.ne.s32.totalorder %s3232_s8, %s2464_s29  ;;  %s463_s19 = int_to_ptr.vmem [resolvable:$true] %s462_s19 }
  0x28   : > { %p2852_p2 = pneg %p2840_p0  ;;  %p2471_p6 = scmp.lt.u32.totalorder %s2464_s29, %s3232_s8 }
  0x2a   : > { %p2467_p4 = pnand %p2852_p2, %p2465_p1 }
  0x2c   : > { %p2468_p5 = pneg %p2467_p4 }
  0x2e   : > { %p2473_p7 = pnand %p2471_p6, %p2468_p5 }
  0x30   : > { %2476 = shalt.err (!%p2473_p7)
}
  0x31   : > { %s2477_s17 = scalar_lea.vmem %s463_s19, 512  ;;  %p2485_p8 = scmp.lt.s32.totalorder %s463_s19, %s463_s19 }
  0x32   : > { %p2478_p9 = scmp.ne.s32.totalorder %s463_s19, %s2477_s17  ;;  %p2486_p3 = scmp.lt.s32.totalorder %s2477_s17, %s2477_s17 }
  0x34   : > { %p2480_p11 = pnand %p2478_p9, %p2852_p2  ;;  %p2487_p12 = por %p2486_p3, %p2485_p8 }
  0x36   : > { %p2481_p13 = pneg %p2480_p11 }
  0x38   : > { %p2488_p10 = pnand %p2487_p12, %p2481_p13 }
  0x3a   : > { %2491 = shalt.err (!%p2488_p10)
}
  0x3b   : > { %s2653_s21 = smov 128   ;;  %s2654_s27 = smov 8  }
  0x3c   : > { %2307 = dma.hbm_to_vmem [thread:$0]  (!%p2840_p0), %s3232_s8, 512, %s463_s19, [#allocation7], %s2653_s21, %s2653_s21, %s2654_s27  }
  0x3d   : > { %s2655_s29 = smov [#allocation3]   ;;  %s2656_s23 = smov [#allocation8]  }
  0x3e   : > { %s446_s11 = sshll.u32 %s2655_s29, 4  ;;  %s476_s28 = sshll.u32 %s2656_s23, 4  ;;  %s447_s11 = int_to_ptr.vmem [resolvable:$true] %s446_s11  ;;  %s2868_s28 = int_to_ptr.vmem [resolvable:$true] %s476_s28 }
  0x3f   : > { %s2492_s14 = scalar_lea.hbm %s3230_s6, 512 }
  0x40   : > { %p2493_p3 = scmp.ne.s32.totalorder %s3230_s6, %s2492_s14  ;;  %p2499_p12 = scmp.lt.u32.totalorder %s2492_s14, %s3230_s6 }
  0x42   : > { %p2495_p8 = pnand %p2493_p3, %p2852_p2 }
  0x44   : > { %p2496_p10 = pneg %p2495_p8 }
  0x46   : > { %p2501_p1 = pnand %p2499_p12, %p2496_p10 }
  0x48   : > { %2504 = shalt.err (!%p2501_p1)
}
  0x49   : > { %s2505_s23 = scalar_lea.vmem %s447_s11, 512  ;;  %p2513_p7 = scmp.lt.s32.totalorder %s447_s11, %s447_s11 }
  0x4a   : > { %p2506_p4 = scmp.ne.s32.totalorder %s447_s11, %s2505_s23  ;;  %p2514_p9 = scmp.lt.s32.totalorder %s2505_s23, %s2505_s23 }
  0x4c   : > { %p2508_p5 = pnand %p2506_p4, %p2852_p2  ;;  %p2515_p11 = por %p2514_p9, %p2513_p7 }
  0x4e   : > { %p2509_p6 = pneg %p2508_p5 }
  0x50   : > { %p2516_p13 = pnand %p2515_p11, %p2509_p6 }
  0x52   : > { %2519 = shalt.err (!%p2516_p13)
}
  0x53   : > { %2304 = dma.hbm_to_vmem [thread:$0]  (!%p2840_p0), %s3230_s6, 512, %s447_s11, [#allocation4], %s2653_s21, %s2653_s21, %s2654_s27  }
  0x54   : > { %s2520_s15 = scalar_lea.hbm %s3233_s9, 16 }
  0x55   : > { %p2521_p3 = scmp.ne.s32.totalorder %s3233_s9, %s2520_s15  ;;  %p2527_p12 = scmp.lt.u32.totalorder %s2520_s15, %s3233_s9 }
  0x57   : > { %p2523_p8 = pnand %p2521_p3, %p2852_p2 }
  0x59   : > { %p2524_p10 = pneg %p2523_p8 }
  0x5b   : > { %p2529_p1 = pnand %p2527_p12, %p2524_p10 }
  0x5d   : > { %2532 = shalt.err (!%p2529_p1)
}
  0x5e   : > { %s2533_s21 = scalar_lea.vmem %s2868_s28, 16  ;;  %s2540_s27 = scalar_lea.vmem %s2868_s28, 32 }
  0x5f   : > { %p2534_p4 = scmp.ne.s32.totalorder %s2868_s28, %s2533_s21  ;;  %p2541_p7 = scmp.lt.s32.totalorder %s2868_s28, %s2868_s28 }
  0x60   : > { %p2542_p9 = scmp.lt.s32.totalorder %s2540_s27, %s2533_s21 }
  0x61   : > { %p2536_p5 = pnand %p2534_p4, %p2852_p2 }
  0x62   : > { %p2543_p11 = por %p2542_p9, %p2541_p7 }
  0x63   : > { %p2537_p6 = pneg %p2536_p5 }
  0x65   : > { %p2544_p13 = pnand %p2543_p11, %p2537_p6 }
  0x67   : > { %2547 = shalt.err (!%p2544_p13)
}
  0x68   : > { %2310 = dma.hbm_to_vmem [thread:$0]  (!%p2840_p0), %s3233_s9, 16, %s2868_s28, [#allocation7]  }
  0x69   : > { %p3281_p3 = scmp.ne.s32.totalorder %s3276_s0, 0 }
  0x6a   : > { %p3282_p2 = scmp.ne.s32.totalorder (!%p3281_p3), %s3277_s26, 0 }
  0x6b   : > { %521 = sbr.rel (%p3281_p3) target bundleno = 3740 (0xe9c), region = 84 }
  0x72   : > { %2609 = dma.done.wait (%p3282_p2), [#allocation4], 512  }
  0x73   : > { %2611 = vsyncadd (%p3282_p2), [#allocation4], 4294966784 }
  0x74   : > { %2613 = dma.done.wait (%p3282_p2), [#allocation7], 528  }
  0x75   : > { %2615 = vsyncadd (%p3282_p2), [#allocation7], 4294966768  ;;  %s579_s16 = sand.u32 1, %s2626_s22   ;;  %p582_p0 = scmp.lt.s32.totalorder %s2638_s25, 1 }
  0x76   : > { %s2926_s28 = sshll.u32 %s579_s16, 3  ;;  %s3283_s15 = sld [smem:[#allocation23_spill]] }
  0x77   : > { %s2929_s0 = scalar_select %p582_p0, %s2638_s25, 1 }
  0x78   : > { %s581_s17 = scalar_lea.vmem [#allocation9], %s2926_s28  ;;  %p2007_p8 = scmp.ne.s32.totalorder %s2634_s24, 0 }
  0x79   : > { %s2047_s18 = sshll.u32 %s2929_s0, 4  ;;  %s589_s26 = scalar_lea.vmem %s3225_s1, %s2929_s0  ;;  %vm598_vm0 = vcmask (!%p2007_p8), 261120   ;;  %v642_v14 = vld [vmem:[%s3228_s4] sm:$0xff] (!%p2007_p8)  ;;  %v643_v15 = vld [vmem:[%s3228_s4 + $0x8] sm:$0xff] (!%p2007_p8)  ;;  %v644_v16 = vld [vmem:[%s3228_s4 + $0x10] sm:$0xff] (!%p2007_p8)  ;;  %vm734_vm1 = vcmask (!%p2007_p8), 523264  }
  0x7a   : > { %593 = sbr.rel (%p2007_p8) target bundleno = 659 (0x293), region = 100  ;;  %v2221_v17 = vpack.c.bf16 (!%p2007_p8), %v643_v15, %v642_v14  ;;  %v645_v18 = vld [vmem:[%s3228_s4 + $0x18] sm:$0xff] (!%p2007_p8)  ;;  %v2008_v27 = vld [vmem:[%s3236_s12] ss:$0 sm:$0xff] (!%p2007_p8) }
  0x7b   : > { %v2225_v19 = vpack.c.bf16 (!%p2007_p8), %v645_v18, %v644_v16  ;;  %v2009_v29 = vld [vmem:[%s3237_s13] ss:$0 sm:$0xff] (!%p2007_p8) }
  0x7c   : > { %s2939_s29 = scalar_lea.vmem %s3283_s15, %s2047_s18  ;;  %2222 = vmatprep.subr.bf16.mxu0 (!%p2007_p8), %v2221_v17  ;;  %v2010_v36 = vld [vmem:[%s3229_s5] ss:$0 sm:$0xff] (!%p2007_p8) }
  0x7d   : > { %v594_v0 = vld [vmem:[%s2939_s29] sm:$0xff] (!%p2007_p8)  ;;  %v595_v1 = vld [vmem:[%s2939_s29 + $0x8] sm:$0xff] (!%p2007_p8)  ;;  %2224 = vmatpush3.bf16.msra.mxu0 (!%p2007_p8), %v2221_v17 }
  0x7e   : > { %v599_v2 = vsel (!%p2007_p8), %vm598_vm0, %v594_v0, 0.0  ;;  %v602_v3 = vsel (!%p2007_p8), %vm598_vm0, %v595_v1, 0.0  ;;  %2226 = vmatprep.subr.bf16.mxu0 (!%p2007_p8), %v2225_v19 }
  0x7f   : > { %600 = vadd.xlane.f32.xlu0 (!%p2007_p8), %v599_v2 }
  0x81   : > { %2228 = vmatpush3.bf16.msra.mxu0 %v2225_v19 }
  0x83   : > { %603 = vadd.xlane.f32.xlu0 %v602_v3 }
 0x10c   : > { %v601_v4 = vpop.xlane.xlu0 %600 }
 0x10d   : > { %v606_v5 = vmul.f32 0.03125, %v601_v4 }
 0x10f   : > { %v608_v6 = vsub.f32 %v594_v0, %v606_v5 }
 0x110   : > { %v604_v7 = vpop.xlane.xlu0 %603 }
 0x111   : > { %v607_v8 = vmul.f32 0.03125, %v604_v7  ;;  %v610_v9 = vmul.f32 %v608_v6, %v608_v6 }
 0x113   : > { %v609_v10 = vsub.f32 %v595_v1, %v607_v8  ;;  %v612_v11 = vsel %vm598_vm0, %v610_v9, 0.0 }
 0x114   : > { %613 = vadd.xlane.f32.xlu1 %v612_v11 }
 0x115   : > { %v611_v12 = vmul.f32 %v609_v10, %v609_v10 }
 0x117   : > { %v615_v13 = vsel %vm598_vm0, %v611_v12, 0.0 }
 0x118   : > { %616 = vadd.xlane.f32.xlu1 %v615_v13 }
 0x1a1   : > { %v614_v20 = vpop.xlane.xlu1 %613 }
 0x1a2   : > { %v618_v21 = vmul.f32 0.03125, %v614_v20 }
 0x1a4   : > { %v620_v22 = vadd.f32 1e-05, %v618_v21 }
 0x1a5   : > { %v617_v23 = vpop.xlane.xlu1 %616 }
 0x1a6   : > { %2405 = vrsqrt.f32 %v620_v22  ;;  %v619_v24 = vmul.f32 0.03125, %v617_v23 }
 0x1a8   : > { %v621_v25 = vadd.f32 1e-05, %v619_v24 }
 0x1aa   : > { %2407 = vrsqrt.f32 %v621_v25 }
 0x1b0   : > { %v2406_v26 = vpop.eup %2405 }
 0x1b1   : > { %v624_v28 = vmul.f32 %v2406_v26, %v608_v6 }
 0x1b3   : > { %v632_v30 = vmul.f32 %v2008_v27, %v624_v28 }
 0x1b4   : > { %v2408_v31 = vpop.eup %2407 }
 0x1b5   : > { %v625_v32 = vmul.f32 %v2408_v31, %v609_v10  ;;  %v640_v33 = vadd.f32 %v2009_v29, %v632_v30 }
 0x1b7   : > { %v633_v34 = vmul.f32 %v2008_v27, %v625_v32  ;;  %2110 = vmatprep.mubr.msk.f32.mxu0 %vm598_vm0, %v640_v33 }
 0x1b9   : > { %v641_v35 = vadd.f32 %v2009_v29, %v633_v34 }
 0x1bb   : > { %2111 = vmatmul.mubr.msk.f32.vlgmr.msra.gmra.mrb[0].mxu0 %vm598_vm0, %v641_v35 }
 0x28e   : > { %v2112_v37 = vpop.f32.mrb[0].mxu0 }
 0x28f   : > { %v731_v38 = vadd.f32 %v2112_v37, %v2010_v36  ;;  %v725_v39 = vpop.f32.mrb[1].mxu0 }
 0x290   : > { %v726_v40 = vadd.f32 %v2010_v36, %v725_v39 }
 0x291   : > { %736 = vst.msk [vmem:[#allocation2 + $0x8] sm:$0xff] %vm734_vm1, %v731_v38 }
 0x292   : > { %735 = vst.msk [vmem:[#allocation2] sm:$0xff] %vm734_vm1, %v726_v40 }
 0x293 PF: > { %s2013_s21 = sshll.u32 %s2634_s24, 3  ;;  %vm746_vm2 = vcmask 261120   ;;  %v775_v48 = vld [vmem:[%s3226_s2] sm:$0xff]  ;;  %v776_v49 = vld [vmem:[%s3226_s2 + $0x8] sm:$0xff]  ;;  %v777_v50 = vld [vmem:[%s3226_s2 + $0x10] sm:$0xff]  ;;  %v2657_v51 = vmov 0.0|0.0   ;;  %v941_v16 = vlaneseq }
 0x294   : > { %s738_s27 = scalar_lea.vmem %s2939_s29, %s2013_s21  ;;  %2229 = vmatprep.subr.bf16.mxu1 %v2657_v51  ;;  %v2230_v52 = vpack.c.bf16 %v776_v49, %v775_v48  ;;  %v778_v53 = vld [vmem:[%s3226_s2 + $0x18] sm:$0xff]  ;;  %vm2658_vm3 = vmmov 0   ;;  %v2659_v54 = vmov 0.0   ;;  %2239 = vmatprep.subr.bf16.mxu0 %v2657_v51  ;;  %s2660_s15 = smov 120   ;;  %v2014_v63 = vld [vmem:[%s3236_s12] ss:$0 sm:$0xff] }
 0x295   : > { %v2974_v41 = vld [vmem:[%s738_s27] sm:$0xff]  ;;  %2121 = vmatprep.mubr.msk.f32.mxu1 %vm2658_vm3, %v2659_v54  ;;  %2135 = vmatprep.mubr.msk.f32.mxu0 %vm2658_vm3, %v2659_v54  ;;  %v2233_v55 = vpack.c.bf16 %v778_v53, %v777_v50  ;;  %vm860_vm4 = vcmask 64512   ;;  %v942_v18 = vshrl.u32 %v941_v16, 7  ;;  %v2661_v20 = vmov 0   ;;  %s2662_s0 = smov 96   ;;  %s2664_s7 = smov 112  }
 0x296   : > { %v747_v42 = vsel %vm746_vm2, %v2974_v41, 0.0  ;;  %2231 = vmatpush3.bf16.msra.mxu1 %v2230_v52  ;;  %v2015_v1 = vld [vmem:[%s3237_s13] ss:$0 sm:$0xff]  ;;  %vm3011_vm5 = vmpackc.low %vm860_vm4, %vm860_vm4  ;;  %vm947_vm8 = vcmask 130048   ;;  %s2665_s10 = smov 80   ;;  %s2666_s14 = smov 104  }
 0x297   : > { %748 = vadd.xlane.f32.xlu0 %v747_v42  ;;  %2232 = vmatprep.subr.bf16.mxu1 %v2657_v51  ;;  %v2016_v7 = vld [vmem:[%s3227_s3] ss:$0 sm:$0xff]  ;;  %v943_v19 = vsub.s32 0, %v942_v18  ;;  %s2667_s20 = smov 72   ;;  %s2669_s30 = smov 8   ;;  %vm1571_vm9 = vcmask 195584  }
 0x298   : > { %v743_v57 = vld [vmem:[#allocation2 + $0x8] sm:$0xff]  ;;  %v740_v17 = vld [vmem:[%s589_s26] sm:$0x1]  ;;  %s2663_s26 = smov 88   ;;  %s2670_s19 = smov 24   ;;  %vm1787_vm10 = vcmask 523264  }
 0x299   : > { %v742_v56 = vld [vmem:[#allocation2] sm:$0xff]  ;;  %vm741_vm6 = vcmp.gt.s32.totalorder %v740_v17, 0  ;;  %s3286_s11 = sld [smem:[#allocation24_spill]]  ;;  %s3287_s29 = sld [smem:[#allocation25_spill]] }
 0x29a   : > { %2234 = vmatpush3.bf16.msra.mxu1 %v2233_v55  ;;  %v3000_v58 = vpack.i.bf16 %v743_v57, %v742_v56  ;;  %v2236_v3 = vpack.c.bf16 %v743_v57, %v742_v56  ;;  %v940_v21 = vsel %vm741_vm6, 1, %v2661_v20  ;;  %s3288_s23 = sld [smem:[#allocation27_spill]]  ;;  %s1879_s18 = sshll.u32 %s581_s17, 4  ;;  %s3168_s18 = int_to_ptr.vmem [resolvable:$true] %s1879_s18 }
 0x29b   : > { %2235 = vmatprep.subr.bf16.mxu1 %v2657_v51  ;;  %v3038_v22 = vrot.slane %v940_v21, %v943_v19 }
 0x29c   : > { %2410 = vrot.lane.b32.xlu1 %v3000_v58, %s2660_s15 }
 0x29d   : > { %vm945_vm7 = vcmp.eq.s32.totalorder %v3038_v22, 1 }
 0x30e   : > { %v2411_v6 = vpop.permute.xlu1 %2410 }
 0x30f   : > { %v2413_v8 = vunpack.i.h.bf16 %v2411_v6  ;;  %v2412_v9 = vunpack.i.l.bf16 %v2411_v6 }
 0x311   : > { %v2243_v13 = vpack.c.bf16 %v2413_v8, %v2412_v9 }
 0x324   : > { %v749_v43 = vpop.xlane.xlu0 %748 }
 0x325   : > { %v751_v44 = vmul.f32 0.03125, %v749_v43 }
 0x327   : > { %v752_v45 = vsub.f32 %v2974_v41, %v751_v44 }
 0x329   : > { %v753_v46 = vmul.f32 %v752_v45, %v752_v45 }
 0x32b   : > { %v754_v47 = vsel %vm746_vm2, %v753_v46, 0.0 }
 0x32c   : > { %755 = vadd.xlane.f32.xlu0 %v754_v47 }
 0x3b9   : > { %v756_v59 = vpop.xlane.xlu0 %755 }
 0x3ba   : > { %v757_v60 = vmul.f32 0.03125, %v756_v59 }
 0x3bc   : > { %v758_v61 = vadd.f32 1e-05, %v757_v60 }
 0x3be   : > { %2444 = vrsqrt.f32 %v758_v61 }
 0x3c8   : > { %v2445_v62 = vpop.eup %2444 }
 0x3c9   : > { %v760_v0 = vmul.f32 %v2445_v62, %v752_v45 }
 0x3cb   : > { %v767_v2 = vmul.f32 %v2014_v63, %v760_v0 }
 0x3cd   : > { %v774_v4 = vadd.f32 %v2015_v1, %v767_v2 }
 0x3cf   : > { %2122 = vmatmul.mubr.msk.f32.vlgmr.msra.gmra.mrb[0].mxu1 %vm746_vm2, %v774_v4 }
 0x3d0   : > { %2238 = vmatpush3.bf16.xpose.msk.msra.mxu1 %vm3011_vm5, %v2236_v3  ;;  %2128 = vmatprep.mubr.msk.f32.mxu1 %vm2658_vm3, %v2659_v54 }
 0x3d1   : > { %2242 = vmatprep.subr.bf16.mxu1 %v2657_v51 }
 0x4a2   : > { %v855_v10 = vpop.f32.mrb[0].mxu1 }
 0x4a3   : > { %v856_v11 = vadd.f32 %v2016_v7, %v855_v10  ;;  %v2123_v12 = vpop.f32.mrb[1].mxu1 }
 0x4a5   : > { %v859_v14 = vmul.f32 0.35355338, %v856_v11 }
 0x4a7   : > { %1038 = vrot.lane.b32.xlu1 %v859_v14, %s2660_s15  ;;  %2129 = vmatmul.mubr.msk.f32.vlgmr.msra.gmra.mrb[2].mxu1 %vm860_vm4, %v859_v14  ;;  %s2668_s15 = smov 16  }
 0x4a8   : > { %2245 = vmatpush3.bf16.xpose.msk.msra.mxu1 %vm3011_vm5, %v2243_v13  ;;  %2142 = vmatprep.mubr.msk.f32.mxu1 %vm2658_vm3, %v2659_v54 }
 0x4a9   : > { %2253 = vmatprep.subr.bf16.mxu1 %v2657_v51 }
 0x519   : > { %v1039_v15 = vpop.permute.xlu1 %1038 }
 0x51a   : > { %2143 = vmatmul.mubr.msk.f32.vlgmr.msra.gmra.mrb[4].mxu1 %vm860_vm4, %v1039_v15 }
 0x51b   : > { %2163 = vmatprep.mubr.msk.f32.mxu1 %vm2658_vm3, %v2659_v54 }
 0x57a   : > { %v936_v23 = vpop.f32.mrb[2].mxu1 }
 0x57b   : > { %v946_v24 = vsel %vm945_vm7, -1e+09, %v936_v23  ;;  %v2130_v25 = vpop.f32.mrb[3].mxu1 }
 0x57c   : > { %v948_v26 = vsel %vm947_vm8, %v946_v24, -inf }
 0x57d   : > { %949 = vmax.xlane.f32.xlu0 %v948_v26 }
 0x593   : > { %2415 = vrot.lane.b32.xlu0 %v3000_v58, %s2662_s0 }
 0x597   : > { %2420 = vrot.lane.b32.xlu0 %v3000_v58, %s2663_s26  ;;  %s3289_s26 = sld [smem:[#allocation28_spill]] }
 0x59b   : > { %2425 = vrot.lane.b32.xlu0 %v3000_v58, %s2664_s7 }
 0x59f   : > { %1211 = vrot.lane.b32.xlu0 %v859_v14, %s2664_s7  ;;  %s3292_s7 = sld [smem:[#allocation29_spill]] }
 0x5a3   : > { %2430 = vrot.lane.b32.xlu0 %v3000_v58, %s2665_s10 }
 0x5a7   : > { %1384 = vrot.lane.b32.xlu0 %v859_v14, %s2666_s14 }
 0x5ed   : > { %v1116_v27 = vpop.f32.mrb[4].mxu1 }
 0x5ee   : > { %v1120_v28 = vsel %vm945_vm7, -1e+09, %v1116_v27  ;;  %v2144_v29 = vpop.f32.mrb[5].mxu1 }
 0x5ef   : > { %v1121_v30 = vsel %vm947_vm8, %v1120_v28, -inf }
 0x5f0   : > { %1122 = vmax.xlane.f32.xlu1 %v1121_v30 }
 0x60a   : > { %v950_v31 = vpop.xlane.xlu0 %949 }
 0x60b   : > { %v951_v32 = vsub.f32 %v946_v24, %v950_v31 }
 0x60d   : > { %v952_v33 = vmul.f32 1.442695, %v951_v32 }
 0x60e   : > { %v2416_v34 = vpop.permute.xlu0 %2415 }
 0x60f   : > { %2446 = vpow2.f32 %v952_v33  ;;  %v2418_v35 = vunpack.i.h.bf16 %v2416_v34  ;;  %v2417_v36 = vunpack.i.l.bf16 %v2416_v34 }
 0x611   : > { %v2240_v37 = vpack.c.bf16 %v2418_v35, %v2417_v36  ;;  %v1573_v36 = vld [vmem:[#allocation3] sm:$0xff] }
 0x612   : > { %v2421_v38 = vpop.permute.xlu0 %2420 }
 0x613   : > { %v2423_v39 = vunpack.i.h.bf16 %v2421_v38  ;;  %v2422_v40 = vunpack.i.l.bf16 %v2421_v38  ;;  %2241 = vmatpush3.bf16.msra.mxu0 %v2240_v37  ;;  %v1574_v37 = vld [vmem:[#allocation3 + $0x8] sm:$0xff]  ;;  %v1575_v38 = vld [vmem:[#allocation3 + $0x10] sm:$0xff] }
 0x614   : > { %2246 = vmatprep.subr.bf16.mxu0 %v2657_v51 }
 0x615   : > { %v2247_v43 = vpack.c.bf16 %v2423_v39, %v2422_v40  ;;  %v2264_v39 = vpack.c.bf16 %v1574_v37, %v1573_v36  ;;  %v1576_v40 = vld [vmem:[#allocation3 + $0x18] sm:$0xff] }
 0x616   : > { %v2426_v42 = vpop.permute.xlu0 %2425 }
 0x617   : > { %v2428_v55 = vunpack.i.h.bf16 %v2426_v42  ;;  %v2427_v56 = vunpack.i.l.bf16 %v2426_v42  ;;  %v2267_v42 = vpack.c.bf16 %v1576_v40, %v1575_v38 }
 0x619   : > { %v3053_v44 = vpop.eup %2446  ;;  %v2250_v57 = vpack.c.bf16 %v2428_v55, %v2427_v56 }
 0x61a   : > { %v1212_v45 = vpop.permute.xlu0 %1211  ;;  %2136 = vmatmul.mubr.msk.f32.vlgmr.msra.gmra.mrb[0].mxu0 %vm947_vm8, %v3053_v44  ;;  %v954_v32 = vsel %vm947_vm8, %v3053_v44, 0.0 }
 0x61b   : > { %2248 = vmatpush3.bf16.msra.mxu0 %v2247_v43  ;;  %2149 = vmatprep.mubr.msk.f32.mxu0 %vm2658_vm3, %v2659_v54 }
 0x61c   : > { %2249 = vmatprep.subr.bf16.mxu0 %v2657_v51 }
 0x61e   : > { %v2431_v46 = vpop.permute.xlu0 %2430 }
 0x61f   : > { %v2433_v47 = vunpack.i.h.bf16 %v2431_v46  ;;  %v2432_v48 = vunpack.i.l.bf16 %v2431_v46 }
 0x621   : > { %v2254_v49 = vpack.c.bf16 %v2433_v47, %v2432_v48 }
 0x623   : > { %2255 = vmatpush3.bf16.msra.mxu1 %v2254_v49 }
 0x624   : > { %2256 = vmatprep.subr.bf16.mxu1 %v2657_v51 }
 0x67d   : > { %v1123_v50 = vpop.xlane.xlu1 %1122 }
 0x67e   : > { %v1124_v52 = vsub.f32 %v1120_v28, %v1123_v50 }
 0x680   : > { %v1125_v53 = vmul.f32 1.442695, %v1124_v52 }
 0x682   : > { %2448 = vpow2.f32 %v1125_v53 }
 0x68c   : > { %v2449_v59 = vpop.eup %2448 }
 0x68d   : > { %2150 = vmatmul.mubr.msk.f32.vlgmr.msra.gmra.mrb[2].mxu0 %vm947_vm8, %v2449_v59  ;;  %v1127_v4 = vsel %vm947_vm8, %v2449_v59, 0.0 }
 0x68e   : > { %2252 = vmatpush3.bf16.xpose.msk.msra.mxu0 %vm3011_vm5, %v2250_v57  ;;  %2156 = vmatprep.mubr.msk.f32.mxu0 %vm2658_vm3, %v2659_v54 }
 0x68f   : > { %2260 = vmatprep.subr.bf16.mxu0 %v2657_v51 }
 0x695   : > { %2157 = vmatmul.mubr.msk.f32.vlgmr.msra.gmra.mrb[4].mxu0 %vm860_vm4, %v1212_v45 }
 0x696   : > { %2177 = vmatprep.mubr.msk.f32.mxu0 %vm2658_vm3, %v2659_v54 }
 0x6ed   : > { %v3070_v60 = vpop.f32.mrb[0].mxu0 }
 0x6ee   : > { %v2137_v61 = vpop.f32.mrb[1].mxu0 }
 0x6ef   : > { %v2034_v61 = vld [vmem:[%s3286_s11] ss:$0 sm:$0xff]  ;;  %s3291_s11 = sld [smem:[#allocation26_spill]] }
 0x760   : > { %v3072_v62 = vpop.f32.mrb[2].mxu0 }
 0x761   : > { %v2151_v63 = vpop.f32.mrb[3].mxu0 }
 0x768   : > { %v1289_v0 = vpop.f32.mrb[4].mxu0 }
 0x769   : > { %v1293_v1 = vsel %vm945_vm7, -1e+09, %v1289_v0  ;;  %v2158_v2 = vpop.f32.mrb[5].mxu0 }
 0x76a   : > { %v1294_v3 = vsel %vm947_vm8, %v1293_v1, -inf }
 0x76b   : > { %1295 = vmax.xlane.f32.xlu1 %v1294_v3 }
 0x77c   : > { %2435 = vrot.lane.b32.xlu1 %v3000_v58, %s2666_s14  ;;  %s2671_s14 = smov [#allocation9]  }
 0x780   : > { %2440 = vrot.lane.b32.xlu1 %v3000_v58, %s2667_s20  ;;  %v1385_v58 = vpop.permute.xlu0 %1384  ;;  %s2552_s20 = sshll.u32 %s2671_s14, 4  ;;  %s2553_s20 = int_to_ptr.vmem [resolvable:$false] %s2552_s20 }
 0x781   : > { %p2555_p5 = scmp.lt.s32.totalorder %s3168_s18, %s2553_s20 }
 0x7a4   : > { %1128 = vadd.xlane.f32.xlu1 %v1127_v4 }
 0x7f8   : > { %v1296_v6 = vpop.xlane.xlu1 %1295 }
 0x7f9   : > { %v1297_v7 = vsub.f32 %v1293_v1, %v1296_v6 }
 0x7fb   : > { %v1298_v8 = vmul.f32 1.442695, %v1297_v7  ;;  %v1687_v7 = vld [vmem:[#allocation6] sm:$0xff] }
 0x7fc   : > { %v2436_v9 = vpop.permute.xlu1 %2435 }
 0x7fd   : > { %2450 = vpow2.f32 %v1298_v8  ;;  %v2438_v11 = vunpack.i.h.bf16 %v2436_v9  ;;  %v2437_v12 = vunpack.i.l.bf16 %v2436_v9  ;;  %v1688_v8 = vld [vmem:[#allocation6 + $0x8] sm:$0xff] }
 0x7fe   : > { %v2270_v9 = vpack.c.bf16 %v1688_v8, %v1687_v7 }
 0x7ff   : > { %v2257_v16 = vpack.c.bf16 %v2438_v11, %v2437_v12  ;;  %v1772_v12 = vld [vmem:[%s3287_s29] sm:$0xff] }
 0x800   : > { %v2441_v10 = vpop.permute.xlu1 %2440 }
 0x801   : > { %v2443_v13 = vunpack.i.h.bf16 %v2441_v10  ;;  %v2442_v14 = vunpack.i.l.bf16 %v2441_v10  ;;  %v1690_v10 = vld [vmem:[#allocation6 + $0x18] sm:$0xff] }
 0x803   : > { %v2261_v15 = vpack.c.bf16 %v2443_v13, %v2442_v14  ;;  %v1773_v13 = vld [vmem:[%s3287_s29 + $0x8] sm:$0xff]  ;;  %v1774_v14 = vld [vmem:[%s3287_s29 + $0x10] sm:$0xff] }
 0x805   : > { %2262 = vmatpush3.bf16.msra.mxu0 %v2261_v15  ;;  %v2276_v15 = vpack.c.bf16 %v1773_v13, %v1772_v12 }
 0x806   : > { %2263 = vmatprep.subr.bf16.mxu0 %v2657_v51 }
 0x807   : > { %v2451_v17 = vpop.eup %2450 }
 0x808   : > { %2164 = vmatmul.mubr.msk.f32.vlgmr.msra.gmra.mrb[6].mxu1 %vm947_vm8, %v2451_v17  ;;  %v1300_v24 = vsel %vm947_vm8, %v2451_v17, 0.0 }
 0x809   : > { %2259 = vmatpush3.bf16.xpose.msk.msra.mxu1 %vm3011_vm5, %v2257_v16  ;;  %2170 = vmatprep.mubr.msk.f32.mxu1 %vm2658_vm3, %v2659_v54  ;;  %v1775_v16 = vld [vmem:[%s3287_s29 + $0x18] sm:$0xff] }
 0x80a   : > { %2269 = vmatprep.subr.bf16.mxu1 %v2657_v51  ;;  %v2279_v17 = vpack.c.bf16 %v1775_v16, %v1774_v14 }
 0x810   : > { %2171 = vmatmul.mubr.msk.f32.vlgmr.msra.gmra.mrb[8].mxu1 %vm860_vm4, %v1385_v58  ;;  %v1776_v58 = vld [vmem:[%s3287_s29 + $0x20] sm:$0xff] }
 0x811   : > { %2199 = vmatprep.mubr.msk.f32.mxu1 %vm2658_vm3, %v2659_v54  ;;  %2271 = vmatpush3.bf16.msra.mxu1 %v2270_v9 }
 0x812   : > { %2272 = vmatprep.subr.bf16.mxu1 %v2657_v51 }
 0x831   : > { %v1129_v33 = vpop.xlane.xlu1 %1128 }
 0x8db   : > { %v1379_v18 = vpop.f32.mrb[6].mxu1 }
 0x8dc   : > { %v2165_v19 = vpop.f32.mrb[7].mxu1 }
 0x8e3   : > { %v1462_v20 = vpop.f32.mrb[8].mxu1 }
 0x8e4   : > { %v1466_v21 = vsel %vm945_vm7, -1e+09, %v1462_v20  ;;  %v2172_v23 = vpop.f32.mrb[9].mxu1 }
 0x8e5   : > { %v1467_v5 = vsel %vm947_vm8, %v1466_v21, -inf }
 0x8e6   : > { %1468 = vmax.xlane.f32.xlu0 %v1467_v5 }
 0x8ea   : > { %1301 = vadd.xlane.f32.xlu0 %v1300_v24  ;;  %v2036_v24 = vld [vmem:[%s3288_s23] ss:$0 sm:$0xff] }
 0x973   : > { %v1469_v25 = vpop.xlane.xlu0 %1468 }
 0x974   : > { %v1470_v26 = vsub.f32 %v1466_v21, %v1469_v25 }
 0x976   : > { %v1471_v27 = vmul.f32 1.442695, %v1470_v26  ;;  %v2037_v26 = vld [vmem:[%s3289_s26] ss:$0 sm:$0xff] }
 0x977   : > { %v1302_v28 = vpop.xlane.xlu0 %1301 }
 0x978   : > { %2452 = vpow2.f32 %v1471_v27 }
 0x979   : > { %2454 = vrcp.f32 %v1302_v28 }
 0x97a   : > { %2456 = vrcp.f32 %v1129_v33 }
 0x982   : > { %v2453_v29 = vpop.eup %2452 }
 0x983   : > { %v2455_v30 = vpop.eup %2454  ;;  %2178 = vmatmul.mubr.msk.f32.vlgmr.msra.gmra.mrb[6].mxu0 %vm947_vm8, %v2453_v29  ;;  %v1473_v22 = vsel %vm947_vm8, %v2453_v29, 0.0  ;;  %v1779_v29 = vld [vmem:[%s3287_s29 + $0x38] sm:$0xff] }
 0x984   : > { %1474 = vadd.xlane.f32.xlu0 %v1473_v22  ;;  %v1383_v31 = vmul.f32 %v2455_v30, %v1379_v18  ;;  %2188 = vmatprep.mubr.msk.f32.mxu0 %vm2658_vm3, %v2659_v54  ;;  %v2457_v34 = vpop.eup %2456  ;;  %v1777_v18 = vld [vmem:[%s3287_s29 + $0x28] sm:$0xff]  ;;  %v2038_v22 = vld [vmem:[#allocation8] ss:$0 sm:$0xff] }
 0x985   : > { %v1210_v35 = vmul.f32 %v2457_v34, %v3072_v62  ;;  %2265 = vmatpush3.bf16.msra.mxu0 %v2264_v39  ;;  %v2282_v19 = vpack.c.bf16 %v1777_v18, %v1776_v58 }
 0x986   : > { %1562 = vrot.lane.b32.xlu1 %v1383_v31, %s2668_s15  ;;  %2266 = vmatprep.subr.bf16.mxu0 %v2657_v51  ;;  %s3290_s15 = sld [smem:[#allocation19_spill]] }
 0x988   : > { %955 = vadd.xlane.f32.xlu0 %v954_v32 }
 0x989   : > { %2268 = vmatpush3.bf16.msra.mxu0 %v2267_v42 }
 0x98a   : > { %2275 = vmatprep.subr.bf16.mxu0 %v2657_v51 }
 0x98c   : > { %p3293_p12 = scmp.ne.s32.totalorder %s3290_s15, 0 }
 0x99e   : > { %1558 = vrot.lane.b32.xlu0 %v1210_v35, %s2669_s30  ;;  %s2043_s30 = sshll.u32 %s2638_s25, 1  ;;  %v2040_v35 = vld [vmem:[%s3291_s11] ss:$0 sm:$0xff]  ;;  %s2548_s25 = scalar_lea.vmem %s3168_s18, 128 }
 0x99f   : > { %p2549_p10 = scmp.ne.s32.totalorder %s3168_s18, %s2548_s25 }
 0x9a1   : > { %p2550_p1 = pnand %p2549_p10, %p3293_p12 }
 0x9a3   : > { %p2551_p4 = pneg %p2550_p1 }
 0x9f8   : > { %v1563_v55 = vpop.permute.xlu1 %1562 }
 0xa11   : > { %v1475_v43 = vpop.xlane.xlu0 %1474 }
 0xa12   : > { %2458 = vrcp.f32 %v1475_v43 }
 0xa15   : > { %v956_v48 = vpop.xlane.xlu0 %955 }
 0xa16   : > { %2460 = vrcp.f32 %v956_v48 }
 0xa19   : > { %v1559_v52 = vpop.permute.xlu0 %1558 }
 0xa1c   : > { %v2459_v44 = vpop.eup %2458 }
 0xa20   : > { %v2461_v49 = vpop.eup %2460 }
 0xa21   : > { %v1037_v50 = vmul.f32 %v2461_v49, %v3070_v60 }
 0xa23   : > { %v1569_v53 = vsel %vm860_vm4, %v1037_v50, %v1559_v52 }
 0xa24   : > { %v1570_v56 = vsel %vm947_vm8, %v1569_v53, %v1563_v55 }
 0xa56   : > { %v1552_v45 = vpop.f32.mrb[6].mxu0 }
 0xa57   : > { %v1556_v46 = vmul.f32 %v2459_v44, %v1552_v45  ;;  %v2179_v47 = vpop.f32.mrb[7].mxu0 }
 0xa59   : > { %1566 = vrot.lane.b32.xlu0 %v1556_v46, %s2670_s19  ;;  %s1875_s19 = sadd.s32 %s2634_s24, %s2043_s30  ;;  %s1864_s24 = scalar_lea.sflag [#allocation5], %s579_s16 }
 0xa5a   : > { %s2044_s23 = sshll.u32 %s1875_s19, 7  ;;  %s2554_s30 = scalar_lea.vmem %s2553_s20, 256 }
 0xa5b   : > { %s3166_s10 = scalar_lea.hbm %s3292_s7, %s2044_s23  ;;  %p2556_p6 = scmp.lt.s32.totalorder %s2554_s30, %s2548_s25 }
 0xa5d   : > { %p2557_p7 = por %p2556_p6, %p2555_p5 }
 0xa5f   : > { %p2558_p9 = pnand %p2557_p7, %p2551_p4 }
 0xacb   : > { %v1567_v57 = vpop.permute.xlu0 %1566 }
 0xacc   : > { %v1572_v59 = vsel %vm1571_vm9, %v1570_v56, %v1567_v57 }
 0xacd   : > { %2189 = vmatmul.mubr.msk.f32.vlgmr.msra.gmra.mrb[8].mxu0 %vm746_vm2, %v1572_v59 }
 0xace   : > { %2218 = vmatprep.mubr.msk.f32.mxu0 %vm2658_vm3, %v2659_v54  ;;  %2277 = vmatpush3.bf16.msra.mxu0 %v2276_v15 }
 0xacf   : > { %2278 = vmatprep.subr.bf16.mxu0 %v2657_v51 }
 0xad2   : > { %2280 = vmatpush3.bf16.msra.mxu0 %v2279_v17 }
 0xad3   : > { %2281 = vmatprep.subr.bf16.mxu0 %v2657_v51 }
 0xad6   : > { %2283 = vmatpush3.bf16.msra.mxu0 %v2282_v19 }
 0xad7   : > { %2284 = vmatprep.subr.bf16.mxu0 %v2657_v51  ;;  %v1778_v51 = vld [vmem:[%s3287_s29 + $0x30] sm:$0xff] }
 0xad8   : > { %v2285_v30 = vpack.c.bf16 %v1779_v29, %v1778_v51 }
 0xada   : > { %2286 = vmatpush3.bf16.msra.mxu0 %v2285_v30 }
 0xba0   : > { %v1653_v62 = vpop.f32.mrb[8].mxu0 }
 0xba1   : > { %v1654_v60 = vadd.f32 %v2034_v61, %v1653_v62  ;;  %v2190_v63 = vpop.f32.mrb[9].mxu0 }
 0xba3   : > { %v3114_v0 = vadd.f32 %v1654_v60, %v2974_v41  ;;  %v1689_v41 = vld [vmem:[#allocation6 + $0x10] sm:$0xff] }
 0xba4   : > { %v2273_v11 = vpack.c.bf16 %v1690_v10, %v1689_v41 }
 0xba5   : > { %v1660_v1 = vsel %vm746_vm2, %v3114_v0, 0.0 }
 0xba6   : > { %1661 = vadd.xlane.f32.xlu1 %v1660_v1  ;;  %2274 = vmatpush3.bf16.msra.mxu1 %v2273_v11 }
 0xc33   : > { %v1662_v2 = vpop.xlane.xlu1 %1661 }
 0xc34   : > { %v1663_v3 = vmul.f32 0.03125, %v1662_v2 }
 0xc36   : > { %v1664_v4 = vsub.f32 %v3114_v0, %v1663_v3 }
 0xc38   : > { %v1665_v6 = vmul.f32 %v1664_v4, %v1664_v4 }
 0xc3a   : > { %v1666_v54 = vsel %vm746_vm2, %v1665_v6, 0.0 }
 0xc3b   : > { %1667 = vadd.xlane.f32.xlu0 %v1666_v54 }
 0xcc8   : > { %v1668_v20 = vpop.xlane.xlu0 %1667 }
 0xcc9   : > { %v1669_v21 = vmul.f32 0.03125, %v1668_v20 }
 0xccb   : > { %v1670_v23 = vadd.f32 1e-05, %v1669_v21 }
 0xccd   : > { %2462 = vrsqrt.f32 %v1670_v23 }
 0xcd7   : > { %v2463_v5 = vpop.eup %2462 }
 0xcd8   : > { %v1672_v25 = vmul.f32 %v2463_v5, %v1664_v4 }
 0xcda   : > { %v1679_v27 = vmul.f32 %v2036_v24, %v1672_v25 }
 0xcdc   : > { %v1686_v28 = vadd.f32 %v2037_v26, %v1679_v27 }
 0xcde   : > { %2200 = vmatmul.mubr.msk.f32.vlgmr.msra.gmra.mrb[10].mxu1 %vm746_vm2, %v1686_v28 }
 0xdb1   : > { %v1767_v31 = vpop.f32.mrb[10].mxu1 }
 0xdb2   : > { %v1768_v32 = vadd.f32 %v2038_v22, %v1767_v31  ;;  %v2201_v33 = vpop.f32.mrb[11].mxu1 }
 0xdb4   : > { %v1771_v34 = vmax.f32 %v1768_v32, 0.0 }
 0xdb6   : > { %2219 = vmatmul.mubr.msk.f32.vlgmr.msra.gmra.mrb[10].mxu0 %vm1787_vm10, %v1771_v34 }
 0xe89   : > { %v1857_v36 = vpop.f32.mrb[10].mxu0 }
 0xe8a   : > { %v1858_v37 = vadd.f32 %v2040_v35, %v1857_v36  ;;  %v2220_v38 = vpop.f32.mrb[11].mxu0 }
 0xe8c   : > { %v1861_v39 = vadd.f32 %v1858_v37, %v3114_v0 }
 0xe8e   : > { %1862 = vst.msk [vmem:[%s581_s17] sm:$0xff] %vm746_vm2, %v1861_v39 }
 0xe8f   : > { %2561 = shalt.err (!%p2558_p9)
}
 0xe90   : > { %s2562_s16 = scalar_lea.hbm %s3166_s10, 128  ;;  %s2566_s19 = scalar_lea.hbm %s3292_s7, 512 }
 0xe91   : > { %p2563_p11 = scmp.ne.s32.totalorder %s3166_s10, %s2562_s16  ;;  %p2567_p2 = scmp.lt.u32.totalorder %s3166_s10, %s3292_s7 }
 0xe92   : > { %p2568_p0 = scmp.lt.u32.totalorder %s2566_s19, %s2562_s16  ;;  %p2570_p10 = scmp.lt.u32.totalorder %s2562_s16, %s3166_s10 }
 0xe93   : > { %p2564_p13 = pnand %p2563_p11, %p3293_p12 }
 0xe94   : > { %p2569_p8 = por %p2568_p0, %p2567_p2 }
 0xe95   : > { %p2565_p3 = pneg %p2564_p13 }
 0xe96   : > { %p2571_p1 = por %p2570_p10, %p2569_p8 }
 0xe98   : > { %p2572_p4 = pnand %p2571_p1, %p2565_p3 }
 0xe9a   : > { %2575 = shalt.err (!%p2572_p4)
}
 0xe9b   : > { %2299 = dma.vmem_to_hbm [thread:$0]  (%p3293_p12), %s3168_s18, 128, %s3166_s10, %s1864_s24  }
 0xe9c PF: > { %s3294_s11 = sld [smem:[#allocation17_spill]]  ;;  %s3295_s23 = sld [smem:[#allocation13_spill]] }
 0xe9d   : > { %s3296_s0 = sld [smem:[#allocation21_spill]] }
 0xea2   : > { %p2321_p5 = scmp.ge.s32.totalorder %s3294_s11, 2  ;;  %s1891_s26 = sand.u32 1, %s3295_s23  }
 0xea3   : > { %p3297_p6 = scmp.ne.s32.totalorder %s3296_s0, 0  ;;  %s1892_s25 = scalar_lea.sflag [#allocation5], %s1891_s26 }
 0xea5   : > { %p2312_p7 = pnand %p2321_p5, %p3297_p6 }
 0xea7   : > { %2617 = dma.done.wait (!%p2312_p7), %s1892_s25, 128  }
 0xea8   : > { %2619 = vsyncadd (!%p2312_p7), %s1892_s25, 4294967168  ;;  %s31_s28 = sadd.s32 1, %s3294_s11   ;;  %s3298_s14 = sld [smem:[#allocation14_spill]] }
 0xea9   : > { %p28_p9 = scmp.ge.s32.totalorder %s31_s28, 6   ;;  %s3299_s23 = sld [smem:[#allocation22_spill]] }
 0xeaa   : > { %s3300_s24 = sld [smem:[#allocation15_spill]]  ;;  %s3301_s25 = sld [smem:[#allocation16_spill]] }
 0xeab   : > { %s3302_s26 = sld [smem:[#allocation18_spill]]  ;;  %s3303_s27 = sld [smem:[#allocation20_spill]] }
 0xeac   : > { %s3304_s21 = smov %s2626_s22  ;;  %30 = sbr.rel (!%p28_p9) target bundleno = 15 (0xf), region = 140 }
 0xeae   : > { %s3305_s22 = smov %s3298_s14 }
 0xeb3   :  { %1897 = vsyncpa [#allocation4], 1 }
 0xeb4   :  { %1899 = vsyncpa [#allocation4 + $0x1], 1 }
 0xeb5   :  { %1900 = vsyncpa [#allocation7], 1 }
 0xeb6   :  { %1901 = vsyncpa [#allocation5], 1 }
 0xeb7   :  { %1903 = vsyncpa [#allocation5 + $0x1], 1 }

</bundles_post_ra>
